<compile_context>
chip_gen: v6e
topology: v6e:2x2x1
jax: 0.10.0
libtpu: 0.0.40
codegen_flags: <defaults>
</compile_context>

<pallas_src>
import numpy as np

import jax
import jax.numpy as jnp
from jax.experimental import pallas as pl
from jax.experimental.pallas import tpu as pltpu


# ----------------------------------------------------------------------------
# Host-side constant builders (weight preprocessing, pure numpy).
# ----------------------------------------------------------------------------
def _band_weights(w, Wd, pad):
    """Fold the kx taps + channel mixing of a (KH,KW,Cin,Cout) conv into KH banded
    matrices of shape (Wd*Cin, Wd*Cout) acting on (rows, Wd*Cin) slabs."""
    w = np.asarray(w, np.float32)
    KH, KW, Cin, Cout = w.shape
    m = np.zeros((KH, Wd * Cin, Wd * Cout), np.float32)
    for ky in range(KH):
        for wo in range(Wd):
            for kx in range(KW):
                wi = wo + kx - pad
                if 0 <= wi < Wd:
                    m[ky, wi * Cin:(wi + 1) * Cin, wo * Cout:(wo + 1) * Cout] = w[ky, kx]
    return m


def _row_masks(M, Hd, KH, pad):
    """(KH, M, 1) f32 masks: mask[ky, r] = 1 iff row r (batch-folded, r%Hd is the
    in-image row) shifted by (ky - pad) stays inside its own image."""
    m = np.ones((KH, M, 1), np.float32)
    h = np.arange(M) % Hd
    for ky in range(KH):
        o = ky - pad
        valid = (h + o >= 0) & (h + o < Hd)
        m[ky, :, 0] = valid.astype(np.float32)
    return m


def _pool_w_mats(Wd, C):
    """Even/odd W-group selection matrices (2, Wd*C, Wd/2*C) for the 2x2 maxpool."""
    Wo = Wd // 2
    T = np.zeros((2, Wd * C, Wo * C), np.float32)
    for j in range(Wo):
        for c in range(C):
            T[0, (2 * j) * C + c, j * C + c] = 1.0
            T[1, (2 * j + 1) * C + c, j * C + c] = 1.0
    return T


def _bilinear_taps(in_size, out_size):
    """Per-output (i0, i1, w0, w1) with align_corners=True semantics."""
    if out_size == 1:
        return [(0, 0, 1.0, 0.0)]
    scale = (in_size - 1) / (out_size - 1)
    taps = []
    for o in range(out_size):
        src = o * scale
        i0 = min(int(np.floor(src)), in_size - 1)
        i1 = min(i0 + 1, in_size - 1)
        f = float(src - i0)
        taps.append((i0, i1, 1.0 - f, f))
    return taps


def _interp_matrix(in_size, out_size):
    m = np.zeros((out_size, in_size), np.float32)
    for o, (i0, i1, w0, w1) in enumerate(_bilinear_taps(in_size, out_size)):
        m[o, i0] += w0
        m[o, i1] += w1
    return m


def _upsample_mats(Hd, Wd, C):
    """UH (2Hd, Hd) and UW (Wd*C, 2Wd*C) so that  up(x) = UH @ x @ UW  on slabs."""
    UH = _interp_matrix(Hd, 2 * Hd)
    UW = np.zeros((Wd * C, 2 * Wd * C), np.float32)
    for o, (i0, i1, w0, w1) in enumerate(_bilinear_taps(Wd, 2 * Wd)):
        for c in range(C):
            UW[i0 * C + c, o * C + c] += w0
            UW[i1 * C + c, o * C + c] += w1
    return UH, UW


# ----------------------------------------------------------------------------
# Fused whole-stage Pallas kernel.
# ----------------------------------------------------------------------------
_DN = (((1,), (0,)), ((), ()))


def _make_stage_kernel(KH, pad, compute_dtype):
    cdt = compute_dtype

    def _mm(a, b):
        return jax.lax.dot_general(a.astype(cdt), b.astype(cdt), _DN,
                                   preferred_element_type=jnp.float32)

    def kernel(x_ref,
               mk_f_ref, mk_h_ref, mk_q_ref,
               rbw_h_ref, rbb_h_ref, rbw_q_ref, rbb_q_ref,
               cw_f_ref, cb_f_ref,
               p1t_ref, p2t_ref,
               u1h_ref, u1w_ref, u2h_ref, u2w_ref,
               out_ref, skip_scr):

        def shifted(x, o, mk_ref, ky):
            # shifted[r] = x[r + o] within each image; zero at image boundaries.
            # Roll (concat of sublane slices, no MXU work) + (M,1) boundary mask.
            return jnp.roll(x, -o, axis=0) * mk_ref[ky]

        def conv(x, mk_ref, w_ref, wi, b_ref, bi, act="none", add=None, gate=None):
            srcs = []
            for ky in range(KH):
                o = ky - pad
                srcs.append(x if o == 0 else shifted(x, o, mk_ref, ky))
            # Direct dot -> add -> dot chain so v7x can accumulate in the MRB.
            acc = _mm(srcs[0], w_ref[wi, 0])
            for ky in range(1, KH):
                acc = acc + _mm(srcs[ky], w_ref[wi, ky])
            acc = acc + b_ref[bi:bi + 1, :]
            if add is not None:
                acc = acc + add
            if act == "relu":
                acc = jnp.maximum(acc, 0.0)
            elif act == "sigmoid_gate":
                # last_out = (1 + sigmoid(conv)) * gate  (fused epilogue)
                acc = (1.0 + jax.nn.sigmoid(acc)) * gate
            return acc

        def resblock(x, mk_ref, w_ref, b_ref):
            h = conv(x, mk_ref, w_ref, 0, b_ref, 0, act="relu")
            return conv(h, mk_ref, w_ref, 1, b_ref, 1, act="relu", add=x)

        def hpair_max(ref, rows):
            # H-direction 2x max via stride-2 sublane reads (pure VPU, no matmul).
            lo = ref[pl.ds(0, rows // 2, stride=2), :]
            hi = ref[pl.ds(1, rows // 2, stride=2), :]
            return jnp.maximum(lo, hi)

        def wpool(xh, t_ref):
            # W-direction 2x max: even/odd lane-group selection matmuls + VPU max.
            return jnp.maximum(_mm(xh, t_ref[0]), _mm(xh, t_ref[1]))

        def upsample2x(x, uh_ref, uw_ref, adds=()):
            y = _mm(_mm(uh_ref[...], x), uw_ref[...])
            for a in adds:
                y = y + a
            return y

        Mf = x_ref.shape[0]            # Nb*H rows (batch folded into M)
        Mh = Mf // 2

        x = x_ref[...]                                      # (Nb*H, W*C) f32 slab

        # --- soft-mask branch -------------------------------------------------
        mp1 = wpool(hpair_max(x_ref, Mf), p1t_ref)          # (Nb*H/2, W/2*C)
        s1 = resblock(mp1, mk_h_ref, rbw_h_ref, rbb_h_ref)  # out_softmax1
        skip = resblock(s1, mk_h_ref, rbw_h_ref, rbb_h_ref) # out_skip_connection
        # out_mpool2 = out_softmax(out_softmax1) is identical to `skip` -> reuse.
        skip_scr[...] = skip
        s2 = resblock(wpool(hpair_max(skip_scr, Mh), p2t_ref),
                      mk_q_ref, rbw_q_ref, rbb_q_ref)       # (Nb*H/4, W/4*C)
        out1 = upsample2x(s2, u1h_ref, u1w_ref, adds=(s1, skip))
        s3 = resblock(out1, mk_h_ref, rbw_h_ref, rbb_h_ref) # out_softmax3

        # --- trunk branch -----------------------------------------------------
        t = conv(x, mk_f_ref, cw_f_ref, 0, cb_f_ref, 0, act="relu")
        trunk = conv(t, mk_f_ref, cw_f_ref, 1, cb_f_ref, 1, act="relu")

        # --- attention gate ---------------------------------------------------
        out2 = upsample2x(s3, u2h_ref, u2w_ref, adds=(trunk,))
        a1 = conv(out2, mk_f_ref, cw_f_ref, 2, cb_f_ref, 2, act="relu")
        last = conv(a1, mk_f_ref, cw_f_ref, 3, cb_f_ref, 3,
                    act="sigmoid_gate", gate=trunk)
        out_ref[...] = last.astype(out_ref.dtype)

    return kernel


# ----------------------------------------------------------------------------
# Wrapper: layout glue + constant preparation + the single pallas_call.
# ----------------------------------------------------------------------------
def attention_stage1(x_nchw, params, ksize=3, padding=1,
                     batch_per_step=None, compute_dtype=jnp.float32):
    N, C, H, W = x_nchw.shape
    assert H % 4 == 0 and W % 4 == 0, "two 2x2 maxpools need spatial % 4 == 0"
    assert ksize == 2 * padding + 1, "shape-preserving convs required by the forward"

    if batch_per_step is None:
        # >= 2 'parallel' grid steps keep both v7x TensorCores busy; the rest of
        # the batch is folded into the matmul M axis (no benefit from more steps
        # on single-TC v5e/v6e, and per-step overhead is amortized).
        steps = 2 if (N % 2 == 0 and N >= 2) else 1
        batch_per_step = N // steps
    assert N % batch_per_step == 0
    Nb = batch_per_step
    steps = N // Nb

    H2, W2, H4, W4 = H // 2, W // 2, H // 4, W // 4
    KH = ksize
    cdt = compute_dtype
    rb = params["resblock"]

    def band(w, Wd):
        return jnp.asarray(_band_weights(np.asarray(w), Wd, padding), dtype=cdt)

    def brow(b, Wd):
        return jnp.asarray(np.tile(np.asarray(b, np.float32), Wd))

    # Residual-block conv weights at the two resolutions where the block is used.
    rbw_h = jnp.stack([band(rb["w1"], W2), band(rb["w2"], W2)])
    rbb_h = jnp.stack([brow(rb["b1"], W2), brow(rb["b2"], W2)])
    rbw_q = jnp.stack([band(rb["w1"], W4), band(rb["w2"], W4)])
    rbb_q = jnp.stack([brow(rb["b1"], W4), brow(rb["b2"], W4)])
    # Trunk / attention convs at full resolution.
    cw_f = jnp.stack([band(params["trunk1_w"], W), band(params["trunk2_w"], W),
                      band(params["att1_w"], W), band(params["att2_w"], W)])
    cb_f = jnp.stack([brow(params["trunk1_b"], W), brow(params["trunk2_b"], W),
                      brow(params["att1_b"], W), brow(params["att2_b"], W)])

    # Per-resolution ky-shift boundary masks (batch-fold + zero padding safe).
    mk_f = jnp.asarray(_row_masks(Nb * H, H, KH, padding))
    mk_h = jnp.asarray(_row_masks(Nb * H2, H2, KH, padding))
    mk_q = jnp.asarray(_row_masks(Nb * H4, H4, KH, padding))

    p1t = jnp.asarray(_pool_w_mats(W, C), dtype=cdt)
    p2t = jnp.asarray(_pool_w_mats(W2, C), dtype=cdt)

    u1h_np, u1w_np = _upsample_mats(H4, W4, C)
    u2h_np, u2w_np = _upsample_mats(H2, W2, C)
    eye = np.eye(Nb, dtype=np.float32)
    u1h = jnp.asarray(np.kron(eye, u1h_np), dtype=cdt)   # block-diag over folded batch
    u2h = jnp.asarray(np.kron(eye, u2h_np), dtype=cdt)
    u1w = jnp.asarray(u1w_np, dtype=cdt)
    u2w = jnp.asarray(u2w_np, dtype=cdt)

    consts = [mk_f, mk_h, mk_q, rbw_h, rbb_h, rbw_q, rbb_q, cw_f, cb_f,
              p1t, p2t, u1h, u1w, u2h, u2w]

    # Boundary layout glue only: NCHW -> lane-dense (N*H, W*C) slab (f32).
    x = jnp.transpose(x_nchw, (0, 2, 3, 1)).reshape(N * H, W * C).astype(jnp.float32)

    def _const_spec(a):
        z = (0,) * a.ndim
        return pl.BlockSpec(a.shape, lambda n, _z=z: _z)

    in_specs = [pl.BlockSpec((Nb * H, W * C), lambda n: (n, 0))]
    in_specs += [_const_spec(a) for a in consts]
    out_spec = pl.BlockSpec((Nb * H, W * C), lambda n: (n, 0))

    # Advisory cost estimate (band matmuls, pools, upsamples).
    def mmf(m, k, n):
        return 2 * m * k * n
    WC, W2C, W4C = W * C, W2 * C, W4 * C
    rf, rh, rq = N * H, N * H2, N * H4
    flops = (4 * KH * mmf(rf, WC, WC) + 6 * KH * mmf(rh, W2C, W2C)
             + 2 * KH * mmf(rq, W4C, W4C)
             + 2 * mmf(rh, WC, W2C) + 2 * mmf(rq, W2C, W4C)
             + mmf(rh, Nb * H4, W4C) + mmf(rh, W4C, W2C)
             + mmf(rf, Nb * H2, W2C) + mmf(rf, W2C, WC))
    const_bytes = sum(int(a.size) * a.dtype.itemsize for a in consts)
    bytes_accessed = int(2 * 4 * x.size + const_bytes)
    cost = pl.CostEstimate(flops=int(flops), transcendentals=int(N * H * W * C),
                           bytes_accessed=bytes_accessed)

    # Explicit VMEM budget: constants (double-buffered) + live slabs + headroom.
    slab_bytes = 4 * Nb * H * W * C
    vmem_limit = int(min(64 << 20,
                         max(32 << 20, 2 * const_bytes + 16 * slab_bytes + (8 << 20))))

    out = pl.pallas_call(
        _make_stage_kernel(KH, padding, cdt),
        out_shape=jax.ShapeDtypeStruct((N * H, W * C), jnp.float32),
        grid_spec=pltpu.PrefetchScalarGridSpec(
            num_scalar_prefetch=0,
            grid=(steps,),
            in_specs=in_specs,
            out_specs=out_spec,
            scratch_shapes=[pltpu.VMEM((Nb * H2, W2 * C), jnp.float32)],
        ),
        compiler_params=pltpu.CompilerParams(
            dimension_semantics=("parallel",),
            vmem_limit_bytes=vmem_limit,
        ),
        cost_estimate=cost,
    )(x, *consts)

    out = out.reshape(N, H, W, C)
    return jnp.transpose(out, (0, 3, 1, 2)).astype(x_nchw.dtype)


# ----------------------------------------------------------------------------
# Pure-JAX reference (same semantics) for an in-script correctness check.
# ----------------------------------------------------------------------------
def _reference_forward(x_nchw, params, ksize, padding):
    hp = jax.lax.Precision.HIGHEST
    rb = params["resblock"]
    x = jnp.transpose(x_nchw, (0, 2, 3, 1)).astype(jnp.float32)

    def conv(h, w, b):
        y = jax.lax.conv_general_dilated(
            h, w, window_strides=(1, 1),
            padding=[(padding, padding), (padding, padding)],
            dimension_numbers=("NHWC", "HWIO", "NHWC"), precision=hp)
        return y + b

    def resblock(h):
        t = jnp.maximum(conv(h, rb["w1"], rb["b1"]), 0.0)
        return jnp.maximum(conv(t, rb["w2"], rb["b2"]) + h, 0.0)

    def maxpool(h):
        n, hh, ww, c = h.shape
        return jnp.max(h.reshape(n, hh // 2, 2, ww // 2, 2, c), axis=(2, 4))

    def upsample(h):
        n, hh, ww, c = h.shape
        uh = jnp.asarray(_interp_matrix(hh, 2 * hh))
        uw = jnp.asarray(_interp_matrix(ww, 2 * ww))
        t = jnp.einsum("oh,nhwc->nowc", uh, h, precision=hp)
        return jnp.einsum("pw,nowc->nopc", uw, t, precision=hp)

    mp1 = maxpool(x)
    s1 = resblock(mp1)
    skip = resblock(s1)
    mp2 = resblock(s1)
    s2 = resblock(maxpool(mp2))
    out1 = upsample(s2) + s1 + skip
    s3 = resblock(out1)
    t = jnp.maximum(conv(x, params["trunk1_w"], params["trunk1_b"]), 0.0)
    trunk = jnp.maximum(conv(t, params["trunk2_w"], params["trunk2_b"]), 0.0)
    out2 = upsample(s3) + trunk
    a1 = jnp.maximum(conv(out2, params["att1_w"], params["att1_b"]), 0.0)
    att = jax.nn.sigmoid(conv(a1, params["att2_w"], params["att2_b"]))
    last = (1.0 + att) * trunk
    return jnp.transpose(last, (0, 3, 1, 2))


def init_conv_params(key, K, Cin, Cout):
    kw, kb = jax.random.split(key)
    w = jax.random.normal(kw, (K, K, Cin, Cout), jnp.float32) / np.sqrt(K * K * Cin)
    b = 0.01 * jax.random.normal(kb, (Cout,), jnp.float32)
    return w, b


if __name__ == "__main__":
    key = jax.random.PRNGKey(0)
    # Cin == Cout is required by the forward; spatial divisible by 4 (two 2x2
    # pools). C=8, W=16 makes the slabs exactly 128 lanes wide (lane-dense);
    # N=4 gives grid=(2,) parallel steps with 2 batch images folded per step.
    N, C, H, W = 4, 8, 16, 16
    ksize, padding = 3, 1

    kx, k1, k2, k3, k4, k5, k6 = jax.random.split(key, 7)
    x = jax.random.normal(kx, (N, C, H, W), jnp.float32)

    w1, b1 = init_conv_params(k1, ksize, C, C)
    w2, b2 = init_conv_params(k2, ksize, C, C)
    tw1, tb1 = init_conv_params(k3, ksize, C, C)
    tw2, tb2 = init_conv_params(k4, ksize, C, C)
    aw1, ab1 = init_conv_params(k5, ksize, C, C)
    aw2, ab2 = init_conv_params(k6, ksize, C, C)

    params = dict(
        resblock=dict(w1=w1, b1=b1, w2=w2, b2=b2),
        trunk1_w=tw1, trunk1_b=tb1,
        trunk2_w=tw2, trunk2_b=tb2,
        att1_w=aw1, att1_b=ab1,
        att2_w=aw2, att2_b=ab2,
    )

    # f32 compute path (strict check). For v6e/v7x, pass compute_dtype=jnp.bfloat16
    # for ~2x MXU throughput / half the weight footprint (re-verify tolerances).
    out = attention_stage1(x, params, ksize=ksize, padding=padding)
    out = jax.block_until_ready(out)
    assert out.shape == (N, C, H, W), out.shape
    assert bool(jnp.all(jnp.isfinite(out)))

    ref = jax.block_until_ready(_reference_forward(x, params, ksize, padding))
    np.testing.assert_allclose(np.asarray(out), np.asarray(ref), rtol=1e-2, atol=1e-2)

    print("KERNEL_OK")
</pallas_src>

<mosaic_0001>
module attributes {stable_mosaic.version = 11 : i64} {
  func.func @kernel(%arg0: i32, %arg1: memref<32x128xf32, #tpu.memory_space<vmem>>, %arg2: memref<3x32x1xf32, #tpu.memory_space<vmem>>, %arg3: memref<3x16x1xf32, #tpu.memory_space<vmem>>, %arg4: memref<3x8x1xf32, #tpu.memory_space<vmem>>, %arg5: memref<2x3x64x64xf32, #tpu.memory_space<vmem>>, %arg6: memref<2x64xf32, #tpu.memory_space<vmem>>, %arg7: memref<2x3x32x32xf32, #tpu.memory_space<vmem>>, %arg8: memref<2x32xf32, #tpu.memory_space<vmem>>, %arg9: memref<4x3x128x128xf32, #tpu.memory_space<vmem>>, %arg10: memref<4x128xf32, #tpu.memory_space<vmem>>, %arg11: memref<2x128x64xf32, #tpu.memory_space<vmem>>, %arg12: memref<2x64x32xf32, #tpu.memory_space<vmem>>, %arg13: memref<16x8xf32, #tpu.memory_space<vmem>>, %arg14: memref<32x64xf32, #tpu.memory_space<vmem>>, %arg15: memref<32x16xf32, #tpu.memory_space<vmem>>, %arg16: memref<64x128xf32, #tpu.memory_space<vmem>>, %arg17: memref<32x128xf32, #tpu.memory_space<vmem>>, %arg18: memref<16x64xf32, #tpu.memory_space<vmem>>) attributes {dimension_semantics = [#tpu.dimension_semantics<parallel>], iteration_bounds = array<i64: 2>, scalar_prefetch = 0 : i64, scratch_operands = 1 : i64, tpu.core_type = #tpu.core_type<tc>, window_params = [{transform_indices = @transform_0, window_bounds = array<i64: 32, 128>}, {pipeline_mode = #tpu.pipeline_mode<synchronous>, transform_indices = @transform_1, window_bounds = array<i64: 3, 32, 1>}, {pipeline_mode = #tpu.pipeline_mode<synchronous>, transform_indices = @transform_2, window_bounds = array<i64: 3, 16, 1>}, {pipeline_mode = #tpu.pipeline_mode<synchronous>, transform_indices = @transform_3, window_bounds = array<i64: 3, 8, 1>}, {pipeline_mode = #tpu.pipeline_mode<synchronous>, transform_indices = @transform_4, window_bounds = array<i64: 2, 3, 64, 64>}, {pipeline_mode = #tpu.pipeline_mode<synchronous>, transform_indices = @transform_5, window_bounds = array<i64: 2, 64>}, {pipeline_mode = #tpu.pipeline_mode<synchronous>, transform_indices = @transform_6, window_bounds = array<i64: 2, 3, 32, 32>}, {pipeline_mode = #tpu.pipeline_mode<synchronous>, transform_indices = @transform_7, window_bounds = array<i64: 2, 32>}, {pipeline_mode = #tpu.pipeline_mode<synchronous>, transform_indices = @transform_8, window_bounds = array<i64: 4, 3, 128, 128>}, {pipeline_mode = #tpu.pipeline_mode<synchronous>, transform_indices = @transform_9, window_bounds = array<i64: 4, 128>}, {pipeline_mode = #tpu.pipeline_mode<synchronous>, transform_indices = @transform_10, window_bounds = array<i64: 2, 128, 64>}, {pipeline_mode = #tpu.pipeline_mode<synchronous>, transform_indices = @transform_11, window_bounds = array<i64: 2, 64, 32>}, {pipeline_mode = #tpu.pipeline_mode<synchronous>, transform_indices = @transform_12, window_bounds = array<i64: 16, 8>}, {pipeline_mode = #tpu.pipeline_mode<synchronous>, transform_indices = @transform_13, window_bounds = array<i64: 32, 64>}, {pipeline_mode = #tpu.pipeline_mode<synchronous>, transform_indices = @transform_14, window_bounds = array<i64: 32, 16>}, {pipeline_mode = #tpu.pipeline_mode<synchronous>, transform_indices = @transform_15, window_bounds = array<i64: 64, 128>}, {transform_indices = @transform_16, window_bounds = array<i64: 32, 128>}]} {
    %c0 = arith.constant 0 : index
    %c0_0 = arith.constant 0 : index
    %0 = vector.load %arg1[%c0, %c0_0] : memref<32x128xf32, #tpu.memory_space<vmem>>, vector<32x128xf32>
    %c0_1 = arith.constant 0 : index
    %c0_2 = arith.constant 0 : index
    %1 = tpu.strided_load %arg1[%c0_1, %c0_2] {strides = array<i32: 2, 1>} : memref<32x128xf32, #tpu.memory_space<vmem>>, vector<16x128xf32>
    %c1 = arith.constant 1 : index
    %c0_3 = arith.constant 0 : index
    %2 = tpu.strided_load %arg1[%c1, %c0_3] {strides = array<i32: 2, 1>} : memref<32x128xf32, #tpu.memory_space<vmem>>, vector<16x128xf32>
    %3 = arith.maximumf %1, %2 : vector<16x128xf32>
    %c0_4 = arith.constant 0 : index
    %c0_5 = arith.constant 0 : index
    %c0_6 = arith.constant 0 : index
    %4 = vector.load %arg11[%c0_4, %c0_5, %c0_6] : memref<2x128x64xf32, #tpu.memory_space<vmem>>, vector<1x128x64xf32>
    %5 = vector.shape_cast %4 : vector<1x128x64xf32> to vector<128x64xf32>
    %cst = arith.constant dense<0.000000e+00> : vector<16x64xf32>
    %6 = tpu.matmul %3, %5, %cst {dimension_numbers = #tpu.dot_dimension_numbers<[1], [0], [0], [1], [0, 0, 1, 1], [], []>} : vector<16x128xf32>, vector<128x64xf32>, vector<16x64xf32> -> vector<16x64xf32>
    %c1_7 = arith.constant 1 : index
    %c0_8 = arith.constant 0 : index
    %c0_9 = arith.constant 0 : index
    %7 = vector.load %arg11[%c1_7, %c0_8, %c0_9] : memref<2x128x64xf32, #tpu.memory_space<vmem>>, vector<1x128x64xf32>
    %8 = vector.shape_cast %7 : vector<1x128x64xf32> to vector<128x64xf32>
    %cst_10 = arith.constant dense<0.000000e+00> : vector<16x64xf32>
    %9 = tpu.matmul %3, %8, %cst_10 {dimension_numbers = #tpu.dot_dimension_numbers<[1], [0], [0], [1], [0, 0, 1, 1], [], []>} : vector<16x128xf32>, vector<128x64xf32>, vector<16x64xf32> -> vector<16x64xf32>
    %10 = arith.maximumf %6, %9 : vector<16x64xf32>
    %11 = vector.extract_strided_slice %10 {offsets = [15, 0], sizes = [1, 64], strides = [1, 1]} : vector<16x64xf32> to vector<1x64xf32>
    %12 = vector.extract_strided_slice %10 {offsets = [0, 0], sizes = [15, 64], strides = [1, 1]} : vector<16x64xf32> to vector<15x64xf32>
    %13 = tpu.concatenate %11, %12 in 0 : vector<1x64xf32>, vector<15x64xf32> -> vector<16x64xf32>
    %c0_11 = arith.constant 0 : index
    %c0_12 = arith.constant 0 : index
    %c0_13 = arith.constant 0 : index
    %14 = vector.load %arg3[%c0_11, %c0_12, %c0_13] : memref<3x16x1xf32, #tpu.memory_space<vmem>>, vector<1x16x1xf32>
    %15 = vector.shape_cast %14 : vector<1x16x1xf32> to vector<16x1xf32>
    %16 = vector.broadcast %15 : vector<16x1xf32> to vector<16x64xf32>
    %17 = arith.mulf %13, %16 : vector<16x64xf32>
    %18 = vector.extract_strided_slice %10 {offsets = [1, 0], sizes = [15, 64], strides = [1, 1]} : vector<16x64xf32> to vector<15x64xf32>
    %19 = vector.extract_strided_slice %10 {offsets = [0, 0], sizes = [1, 64], strides = [1, 1]} : vector<16x64xf32> to vector<1x64xf32>
    %20 = tpu.concatenate %18, %19 in 0 : vector<15x64xf32>, vector<1x64xf32> -> vector<16x64xf32>
    %c2 = arith.constant 2 : index
    %c0_14 = arith.constant 0 : index
    %c0_15 = arith.constant 0 : index
    %21 = vector.load %arg3[%c2, %c0_14, %c0_15] : memref<3x16x1xf32, #tpu.memory_space<vmem>>, vector<1x16x1xf32>
    %22 = vector.shape_cast %21 : vector<1x16x1xf32> to vector<16x1xf32>
    %23 = vector.broadcast %22 : vector<16x1xf32> to vector<16x64xf32>
    %24 = arith.mulf %20, %23 : vector<16x64xf32>
    %c0_16 = arith.constant 0 : index
    %c0_17 = arith.constant 0 : index
    %c0_18 = arith.constant 0 : index
    %c0_19 = arith.constant 0 : index
    %25 = vector.load %arg5[%c0_16, %c0_17, %c0_18, %c0_19] : memref<2x3x64x64xf32, #tpu.memory_space<vmem>>, vector<1x1x64x64xf32>
    %26 = vector.shape_cast %25 : vector<1x1x64x64xf32> to vector<64x64xf32>
    %cst_20 = arith.constant dense<0.000000e+00> : vector<16x64xf32>
    %27 = tpu.matmul %17, %26, %cst_20 {dimension_numbers = #tpu.dot_dimension_numbers<[1], [0], [0], [1], [0, 0, 1, 1], [], []>} : vector<16x64xf32>, vector<64x64xf32>, vector<16x64xf32> -> vector<16x64xf32>
    %c0_21 = arith.constant 0 : index
    %c1_22 = arith.constant 1 : index
    %c0_23 = arith.constant 0 : index
    %c0_24 = arith.constant 0 : index
    %28 = vector.load %arg5[%c0_21, %c1_22, %c0_23, %c0_24] : memref<2x3x64x64xf32, #tpu.memory_space<vmem>>, vector<1x1x64x64xf32>
    %29 = vector.shape_cast %28 : vector<1x1x64x64xf32> to vector<64x64xf32>
    %cst_25 = arith.constant dense<0.000000e+00> : vector<16x64xf32>
    %30 = tpu.matmul %10, %29, %cst_25 {dimension_numbers = #tpu.dot_dimension_numbers<[1], [0], [0], [1], [0, 0, 1, 1], [], []>} : vector<16x64xf32>, vector<64x64xf32>, vector<16x64xf32> -> vector<16x64xf32>
    %31 = arith.addf %27, %30 : vector<16x64xf32>
    %c0_26 = arith.constant 0 : index
    %c2_27 = arith.constant 2 : index
    %c0_28 = arith.constant 0 : index
    %c0_29 = arith.constant 0 : index
    %32 = vector.load %arg5[%c0_26, %c2_27, %c0_28, %c0_29] : memref<2x3x64x64xf32, #tpu.memory_space<vmem>>, vector<1x1x64x64xf32>
    %33 = vector.shape_cast %32 : vector<1x1x64x64xf32> to vector<64x64xf32>
    %cst_30 = arith.constant dense<0.000000e+00> : vector<16x64xf32>
    %34 = tpu.matmul %24, %33, %cst_30 {dimension_numbers = #tpu.dot_dimension_numbers<[1], [0], [0], [1], [0, 0, 1, 1], [], []>} : vector<16x64xf32>, vector<64x64xf32>, vector<16x64xf32> -> vector<16x64xf32>
    %35 = arith.addf %31, %34 : vector<16x64xf32>
    %c0_31 = arith.constant 0 : index
    %c0_32 = arith.constant 0 : index
    %36 = vector.load %arg6[%c0_31, %c0_32] : memref<2x64xf32, #tpu.memory_space<vmem>>, vector<1x64xf32>
    %37 = vector.broadcast %36 : vector<1x64xf32> to vector<16x64xf32>
    %38 = arith.addf %35, %37 : vector<16x64xf32>
    %cst_33 = arith.constant 0.000000e+00 : f32
    %39 = vector.broadcast %cst_33 : f32 to vector<16x64xf32>
    %40 = arith.maximumf %38, %39 : vector<16x64xf32>
    %41 = vector.extract_strided_slice %40 {offsets = [15, 0], sizes = [1, 64], strides = [1, 1]} : vector<16x64xf32> to vector<1x64xf32>
    %42 = vector.extract_strided_slice %40 {offsets = [0, 0], sizes = [15, 64], strides = [1, 1]} : vector<16x64xf32> to vector<15x64xf32>
    %43 = tpu.concatenate %41, %42 in 0 : vector<1x64xf32>, vector<15x64xf32> -> vector<16x64xf32>
    %c0_34 = arith.constant 0 : index
    %c0_35 = arith.constant 0 : index
    %c0_36 = arith.constant 0 : index
    %44 = vector.load %arg3[%c0_34, %c0_35, %c0_36] : memref<3x16x1xf32, #tpu.memory_space<vmem>>, vector<1x16x1xf32>
    %45 = vector.shape_cast %44 : vector<1x16x1xf32> to vector<16x1xf32>
    %46 = vector.broadcast %45 : vector<16x1xf32> to vector<16x64xf32>
    %47 = arith.mulf %43, %46 : vector<16x64xf32>
    %48 = vector.extract_strided_slice %40 {offsets = [1, 0], sizes = [15, 64], strides = [1, 1]} : vector<16x64xf32> to vector<15x64xf32>
    %49 = vector.extract_strided_slice %40 {offsets = [0, 0], sizes = [1, 64], strides = [1, 1]} : vector<16x64xf32> to vector<1x64xf32>
    %50 = tpu.concatenate %48, %49 in 0 : vector<15x64xf32>, vector<1x64xf32> -> vector<16x64xf32>
    %c2_37 = arith.constant 2 : index
    %c0_38 = arith.constant 0 : index
    %c0_39 = arith.constant 0 : index
    %51 = vector.load %arg3[%c2_37, %c0_38, %c0_39] : memref<3x16x1xf32, #tpu.memory_space<vmem>>, vector<1x16x1xf32>
    %52 = vector.shape_cast %51 : vector<1x16x1xf32> to vector<16x1xf32>
    %53 = vector.broadcast %52 : vector<16x1xf32> to vector<16x64xf32>
    %54 = arith.mulf %50, %53 : vector<16x64xf32>
    %c1_40 = arith.constant 1 : index
    %c0_41 = arith.constant 0 : index
    %c0_42 = arith.constant 0 : index
    %c0_43 = arith.constant 0 : index
    %55 = vector.load %arg5[%c1_40, %c0_41, %c0_42, %c0_43] : memref<2x3x64x64xf32, #tpu.memory_space<vmem>>, vector<1x1x64x64xf32>
    %56 = vector.shape_cast %55 : vector<1x1x64x64xf32> to vector<64x64xf32>
    %cst_44 = arith.constant dense<0.000000e+00> : vector<16x64xf32>
    %57 = tpu.matmul %47, %56, %cst_44 {dimension_numbers = #tpu.dot_dimension_numbers<[1], [0], [0], [1], [0, 0, 1, 1], [], []>} : vector<16x64xf32>, vector<64x64xf32>, vector<16x64xf32> -> vector<16x64xf32>
    %c1_45 = arith.constant 1 : index
    %c1_46 = arith.constant 1 : index
    %c0_47 = arith.constant 0 : index
    %c0_48 = arith.constant 0 : index
    %58 = vector.load %arg5[%c1_45, %c1_46, %c0_47, %c0_48] : memref<2x3x64x64xf32, #tpu.memory_space<vmem>>, vector<1x1x64x64xf32>
    %59 = vector.shape_cast %58 : vector<1x1x64x64xf32> to vector<64x64xf32>
    %cst_49 = arith.constant dense<0.000000e+00> : vector<16x64xf32>
    %60 = tpu.matmul %40, %59, %cst_49 {dimension_numbers = #tpu.dot_dimension_numbers<[1], [0], [0], [1], [0, 0, 1, 1], [], []>} : vector<16x64xf32>, vector<64x64xf32>, vector<16x64xf32> -> vector<16x64xf32>
    %61 = arith.addf %57, %60 : vector<16x64xf32>
    %c1_50 = arith.constant 1 : index
    %c2_51 = arith.constant 2 : index
    %c0_52 = arith.constant 0 : index
    %c0_53 = arith.constant 0 : index
    %62 = vector.load %arg5[%c1_50, %c2_51, %c0_52, %c0_53] : memref<2x3x64x64xf32, #tpu.memory_space<vmem>>, vector<1x1x64x64xf32>
    %63 = vector.shape_cast %62 : vector<1x1x64x64xf32> to vector<64x64xf32>
    %cst_54 = arith.constant dense<0.000000e+00> : vector<16x64xf32>
    %64 = tpu.matmul %54, %63, %cst_54 {dimension_numbers = #tpu.dot_dimension_numbers<[1], [0], [0], [1], [0, 0, 1, 1], [], []>} : vector<16x64xf32>, vector<64x64xf32>, vector<16x64xf32> -> vector<16x64xf32>
    %65 = arith.addf %61, %64 : vector<16x64xf32>
    %c1_55 = arith.constant 1 : index
    %c0_56 = arith.constant 0 : index
    %66 = vector.load %arg6[%c1_55, %c0_56] : memref<2x64xf32, #tpu.memory_space<vmem>>, vector<1x64xf32>
    %67 = vector.broadcast %66 : vector<1x64xf32> to vector<16x64xf32>
    %68 = arith.addf %65, %67 : vector<16x64xf32>
    %69 = arith.addf %68, %10 : vector<16x64xf32>
    %cst_57 = arith.constant 0.000000e+00 : f32
    %70 = vector.broadcast %cst_57 : f32 to vector<16x64xf32>
    %71 = arith.maximumf %69, %70 : vector<16x64xf32>
    %72 = vector.extract_strided_slice %71 {offsets = [15, 0], sizes = [1, 64], strides = [1, 1]} : vector<16x64xf32> to vector<1x64xf32>
    %73 = vector.extract_strided_slice %71 {offsets = [0, 0], sizes = [15, 64], strides = [1, 1]} : vector<16x64xf32> to vector<15x64xf32>
    %74 = tpu.concatenate %72, %73 in 0 : vector<1x64xf32>, vector<15x64xf32> -> vector<16x64xf32>
    %c0_58 = arith.constant 0 : index
    %c0_59 = arith.constant 0 : index
    %c0_60 = arith.constant 0 : index
    %75 = vector.load %arg3[%c0_58, %c0_59, %c0_60] : memref<3x16x1xf32, #tpu.memory_space<vmem>>, vector<1x16x1xf32>
    %76 = vector.shape_cast %75 : vector<1x16x1xf32> to vector<16x1xf32>
    %77 = vector.broadcast %76 : vector<16x1xf32> to vector<16x64xf32>
    %78 = arith.mulf %74, %77 : vector<16x64xf32>
    %79 = vector.extract_strided_slice %71 {offsets = [1, 0], sizes = [15, 64], strides = [1, 1]} : vector<16x64xf32> to vector<15x64xf32>
    %80 = vector.extract_strided_slice %71 {offsets = [0, 0], sizes = [1, 64], strides = [1, 1]} : vector<16x64xf32> to vector<1x64xf32>
    %81 = tpu.concatenate %79, %80 in 0 : vector<15x64xf32>, vector<1x64xf32> -> vector<16x64xf32>
    %c2_61 = arith.constant 2 : index
    %c0_62 = arith.constant 0 : index
    %c0_63 = arith.constant 0 : index
    %82 = vector.load %arg3[%c2_61, %c0_62, %c0_63] : memref<3x16x1xf32, #tpu.memory_space<vmem>>, vector<1x16x1xf32>
    %83 = vector.shape_cast %82 : vector<1x16x1xf32> to vector<16x1xf32>
    %84 = vector.broadcast %83 : vector<16x1xf32> to vector<16x64xf32>
    %85 = arith.mulf %81, %84 : vector<16x64xf32>
    %c0_64 = arith.constant 0 : index
    %c0_65 = arith.constant 0 : index
    %c0_66 = arith.constant 0 : index
    %c0_67 = arith.constant 0 : index
    %86 = vector.load %arg5[%c0_64, %c0_65, %c0_66, %c0_67] : memref<2x3x64x64xf32, #tpu.memory_space<vmem>>, vector<1x1x64x64xf32>
    %87 = vector.shape_cast %86 : vector<1x1x64x64xf32> to vector<64x64xf32>
    %cst_68 = arith.constant dense<0.000000e+00> : vector<16x64xf32>
    %88 = tpu.matmul %78, %87, %cst_68 {dimension_numbers = #tpu.dot_dimension_numbers<[1], [0], [0], [1], [0, 0, 1, 1], [], []>} : vector<16x64xf32>, vector<64x64xf32>, vector<16x64xf32> -> vector<16x64xf32>
    %c0_69 = arith.constant 0 : index
    %c1_70 = arith.constant 1 : index
    %c0_71 = arith.constant 0 : index
    %c0_72 = arith.constant 0 : index
    %89 = vector.load %arg5[%c0_69, %c1_70, %c0_71, %c0_72] : memref<2x3x64x64xf32, #tpu.memory_space<vmem>>, vector<1x1x64x64xf32>
    %90 = vector.shape_cast %89 : vector<1x1x64x64xf32> to vector<64x64xf32>
    %cst_73 = arith.constant dense<0.000000e+00> : vector<16x64xf32>
    %91 = tpu.matmul %71, %90, %cst_73 {dimension_numbers = #tpu.dot_dimension_numbers<[1], [0], [0], [1], [0, 0, 1, 1], [], []>} : vector<16x64xf32>, vector<64x64xf32>, vector<16x64xf32> -> vector<16x64xf32>
    %92 = arith.addf %88, %91 : vector<16x64xf32>
    %c0_74 = arith.constant 0 : index
    %c2_75 = arith.constant 2 : index
    %c0_76 = arith.constant 0 : index
    %c0_77 = arith.constant 0 : index
    %93 = vector.load %arg5[%c0_74, %c2_75, %c0_76, %c0_77] : memref<2x3x64x64xf32, #tpu.memory_space<vmem>>, vector<1x1x64x64xf32>
    %94 = vector.shape_cast %93 : vector<1x1x64x64xf32> to vector<64x64xf32>
    %cst_78 = arith.constant dense<0.000000e+00> : vector<16x64xf32>
    %95 = tpu.matmul %85, %94, %cst_78 {dimension_numbers = #tpu.dot_dimension_numbers<[1], [0], [0], [1], [0, 0, 1, 1], [], []>} : vector<16x64xf32>, vector<64x64xf32>, vector<16x64xf32> -> vector<16x64xf32>
    %96 = arith.addf %92, %95 : vector<16x64xf32>
    %c0_79 = arith.constant 0 : index
    %c0_80 = arith.constant 0 : index
    %97 = vector.load %arg6[%c0_79, %c0_80] : memref<2x64xf32, #tpu.memory_space<vmem>>, vector<1x64xf32>
    %98 = vector.broadcast %97 : vector<1x64xf32> to vector<16x64xf32>
    %99 = arith.addf %96, %98 : vector<16x64xf32>
    %cst_81 = arith.constant 0.000000e+00 : f32
    %100 = vector.broadcast %cst_81 : f32 to vector<16x64xf32>
    %101 = arith.maximumf %99, %100 : vector<16x64xf32>
    %102 = vector.extract_strided_slice %101 {offsets = [15, 0], sizes = [1, 64], strides = [1, 1]} : vector<16x64xf32> to vector<1x64xf32>
    %103 = vector.extract_strided_slice %101 {offsets = [0, 0], sizes = [15, 64], strides = [1, 1]} : vector<16x64xf32> to vector<15x64xf32>
    %104 = tpu.concatenate %102, %103 in 0 : vector<1x64xf32>, vector<15x64xf32> -> vector<16x64xf32>
    %c0_82 = arith.constant 0 : index
    %c0_83 = arith.constant 0 : index
    %c0_84 = arith.constant 0 : index
    %105 = vector.load %arg3[%c0_82, %c0_83, %c0_84] : memref<3x16x1xf32, #tpu.memory_space<vmem>>, vector<1x16x1xf32>
    %106 = vector.shape_cast %105 : vector<1x16x1xf32> to vector<16x1xf32>
    %107 = vector.broadcast %106 : vector<16x1xf32> to vector<16x64xf32>
    %108 = arith.mulf %104, %107 : vector<16x64xf32>
    %109 = vector.extract_strided_slice %101 {offsets = [1, 0], sizes = [15, 64], strides = [1, 1]} : vector<16x64xf32> to vector<15x64xf32>
    %110 = vector.extract_strided_slice %101 {offsets = [0, 0], sizes = [1, 64], strides = [1, 1]} : vector<16x64xf32> to vector<1x64xf32>
    %111 = tpu.concatenate %109, %110 in 0 : vector<15x64xf32>, vector<1x64xf32> -> vector<16x64xf32>
    %c2_85 = arith.constant 2 : index
    %c0_86 = arith.constant 0 : index
    %c0_87 = arith.constant 0 : index
    %112 = vector.load %arg3[%c2_85, %c0_86, %c0_87] : memref<3x16x1xf32, #tpu.memory_space<vmem>>, vector<1x16x1xf32>
    %113 = vector.shape_cast %112 : vector<1x16x1xf32> to vector<16x1xf32>
    %114 = vector.broadcast %113 : vector<16x1xf32> to vector<16x64xf32>
    %115 = arith.mulf %111, %114 : vector<16x64xf32>
    %c1_88 = arith.constant 1 : index
    %c0_89 = arith.constant 0 : index
    %c0_90 = arith.constant 0 : index
    %c0_91 = arith.constant 0 : index
    %116 = vector.load %arg5[%c1_88, %c0_89, %c0_90, %c0_91] : memref<2x3x64x64xf32, #tpu.memory_space<vmem>>, vector<1x1x64x64xf32>
    %117 = vector.shape_cast %116 : vector<1x1x64x64xf32> to vector<64x64xf32>
    %cst_92 = arith.constant dense<0.000000e+00> : vector<16x64xf32>
    %118 = tpu.matmul %108, %117, %cst_92 {dimension_numbers = #tpu.dot_dimension_numbers<[1], [0], [0], [1], [0, 0, 1, 1], [], []>} : vector<16x64xf32>, vector<64x64xf32>, vector<16x64xf32> -> vector<16x64xf32>
    %c1_93 = arith.constant 1 : index
    %c1_94 = arith.constant 1 : index
    %c0_95 = arith.constant 0 : index
    %c0_96 = arith.constant 0 : index
    %119 = vector.load %arg5[%c1_93, %c1_94, %c0_95, %c0_96] : memref<2x3x64x64xf32, #tpu.memory_space<vmem>>, vector<1x1x64x64xf32>
    %120 = vector.shape_cast %119 : vector<1x1x64x64xf32> to vector<64x64xf32>
    %cst_97 = arith.constant dense<0.000000e+00> : vector<16x64xf32>
    %121 = tpu.matmul %101, %120, %cst_97 {dimension_numbers = #tpu.dot_dimension_numbers<[1], [0], [0], [1], [0, 0, 1, 1], [], []>} : vector<16x64xf32>, vector<64x64xf32>, vector<16x64xf32> -> vector<16x64xf32>
    %122 = arith.addf %118, %121 : vector<16x64xf32>
    %c1_98 = arith.constant 1 : index
    %c2_99 = arith.constant 2 : index
    %c0_100 = arith.constant 0 : index
    %c0_101 = arith.constant 0 : index
    %123 = vector.load %arg5[%c1_98, %c2_99, %c0_100, %c0_101] : memref<2x3x64x64xf32, #tpu.memory_space<vmem>>, vector<1x1x64x64xf32>
    %124 = vector.shape_cast %123 : vector<1x1x64x64xf32> to vector<64x64xf32>
    %cst_102 = arith.constant dense<0.000000e+00> : vector<16x64xf32>
    %125 = tpu.matmul %115, %124, %cst_102 {dimension_numbers = #tpu.dot_dimension_numbers<[1], [0], [0], [1], [0, 0, 1, 1], [], []>} : vector<16x64xf32>, vector<64x64xf32>, vector<16x64xf32> -> vector<16x64xf32>
    %126 = arith.addf %122, %125 : vector<16x64xf32>
    %c1_103 = arith.constant 1 : index
    %c0_104 = arith.constant 0 : index
    %127 = vector.load %arg6[%c1_103, %c0_104] : memref<2x64xf32, #tpu.memory_space<vmem>>, vector<1x64xf32>
    %128 = vector.broadcast %127 : vector<1x64xf32> to vector<16x64xf32>
    %129 = arith.addf %126, %128 : vector<16x64xf32>
    %130 = arith.addf %129, %71 : vector<16x64xf32>
    %cst_105 = arith.constant 0.000000e+00 : f32
    %131 = vector.broadcast %cst_105 : f32 to vector<16x64xf32>
    %132 = arith.maximumf %130, %131 : vector<16x64xf32>
    %c0_106 = arith.constant 0 : index
    %c0_107 = arith.constant 0 : index
    %133 = vector.load %arg18[%c0_106, %c0_107] : memref<16x64xf32, #tpu.memory_space<vmem>>, vector<16x64xf32>
    tpu.vector_store %arg18[%c0_106, %c0_107], %132 {strides = array<i32>} : memref<16x64xf32, #tpu.memory_space<vmem>>, vector<16x64xf32>,
    %c0_108 = arith.constant 0 : index
    %c0_109 = arith.constant 0 : index
    %134 = tpu.strided_load %arg18[%c0_108, %c0_109] {strides = array<i32: 2, 1>} : memref<16x64xf32, #tpu.memory_space<vmem>>, vector<8x64xf32>
    %c1_110 = arith.constant 1 : index
    %c0_111 = arith.constant 0 : index
    %135 = tpu.strided_load %arg18[%c1_110, %c0_111] {strides = array<i32: 2, 1>} : memref<16x64xf32, #tpu.memory_space<vmem>>, vector<8x64xf32>
    %136 = arith.maximumf %134, %135 : vector<8x64xf32>
    %c0_112 = arith.constant 0 : index
    %c0_113 = arith.constant 0 : index
    %c0_114 = arith.constant 0 : index
    %137 = vector.load %arg12[%c0_112, %c0_113, %c0_114] : memref<2x64x32xf32, #tpu.memory_space<vmem>>, vector<1x64x32xf32>
    %138 = vector.shape_cast %137 : vector<1x64x32xf32> to vector<64x32xf32>
    %cst_115 = arith.constant dense<0.000000e+00> : vector<8x32xf32>
    %139 = tpu.matmul %136, %138, %cst_115 {dimension_numbers = #tpu.dot_dimension_numbers<[1], [0], [0], [1], [0, 0, 1, 1], [], []>} : vector<8x64xf32>, vector<64x32xf32>, vector<8x32xf32> -> vector<8x32xf32>
    %c1_116 = arith.constant 1 : index
    %c0_117 = arith.constant 0 : index
    %c0_118 = arith.constant 0 : index
    %140 = vector.load %arg12[%c1_116, %c0_117, %c0_118] : memref<2x64x32xf32, #tpu.memory_space<vmem>>, vector<1x64x32xf32>
    %141 = vector.shape_cast %140 : vector<1x64x32xf32> to vector<64x32xf32>
    %cst_119 = arith.constant dense<0.000000e+00> : vector<8x32xf32>
    %142 = tpu.matmul %136, %141, %cst_119 {dimension_numbers = #tpu.dot_dimension_numbers<[1], [0], [0], [1], [0, 0, 1, 1], [], []>} : vector<8x64xf32>, vector<64x32xf32>, vector<8x32xf32> -> vector<8x32xf32>
    %143 = arith.maximumf %139, %142 : vector<8x32xf32>
    %144 = vector.extract_strided_slice %143 {offsets = [7, 0], sizes = [1, 32], strides = [1, 1]} : vector<8x32xf32> to vector<1x32xf32>
    %145 = vector.extract_strided_slice %143 {offsets = [0, 0], sizes = [7, 32], strides = [1, 1]} : vector<8x32xf32> to vector<7x32xf32>
    %146 = tpu.concatenate %144, %145 in 0 : vector<1x32xf32>, vector<7x32xf32> -> vector<8x32xf32>
    %c0_120 = arith.constant 0 : index
    %c0_121 = arith.constant 0 : index
    %c0_122 = arith.constant 0 : index
    %147 = vector.load %arg4[%c0_120, %c0_121, %c0_122] : memref<3x8x1xf32, #tpu.memory_space<vmem>>, vector<1x8x1xf32>
    %148 = vector.shape_cast %147 : vector<1x8x1xf32> to vector<8x1xf32>
    %149 = vector.broadcast %148 : vector<8x1xf32> to vector<8x32xf32>
    %150 = arith.mulf %146, %149 : vector<8x32xf32>
    %151 = vector.extract_strided_slice %143 {offsets = [1, 0], sizes = [7, 32], strides = [1, 1]} : vector<8x32xf32> to vector<7x32xf32>
    %152 = vector.extract_strided_slice %143 {offsets = [0, 0], sizes = [1, 32], strides = [1, 1]} : vector<8x32xf32> to vector<1x32xf32>
    %153 = tpu.concatenate %151, %152 in 0 : vector<7x32xf32>, vector<1x32xf32> -> vector<8x32xf32>
    %c2_123 = arith.constant 2 : index
    %c0_124 = arith.constant 0 : index
    %c0_125 = arith.constant 0 : index
    %154 = vector.load %arg4[%c2_123, %c0_124, %c0_125] : memref<3x8x1xf32, #tpu.memory_space<vmem>>, vector<1x8x1xf32>
    %155 = vector.shape_cast %154 : vector<1x8x1xf32> to vector<8x1xf32>
    %156 = vector.broadcast %155 : vector<8x1xf32> to vector<8x32xf32>
    %157 = arith.mulf %153, %156 : vector<8x32xf32>
    %c0_126 = arith.constant 0 : index
    %c0_127 = arith.constant 0 : index
    %c0_128 = arith.constant 0 : index
    %c0_129 = arith.constant 0 : index
    %158 = vector.load %arg7[%c0_126, %c0_127, %c0_128, %c0_129] : memref<2x3x32x32xf32, #tpu.memory_space<vmem>>, vector<1x1x32x32xf32>
    %159 = vector.shape_cast %158 : vector<1x1x32x32xf32> to vector<32x32xf32>
    %cst_130 = arith.constant dense<0.000000e+00> : vector<8x32xf32>
    %160 = tpu.matmul %150, %159, %cst_130 {dimension_numbers = #tpu.dot_dimension_numbers<[1], [0], [0], [1], [0, 0, 1, 1], [], []>} : vector<8x32xf32>, vector<32x32xf32>, vector<8x32xf32> -> vector<8x32xf32>
    %c0_131 = arith.constant 0 : index
    %c1_132 = arith.constant 1 : index
    %c0_133 = arith.constant 0 : index
    %c0_134 = arith.constant 0 : index
    %161 = vector.load %arg7[%c0_131, %c1_132, %c0_133, %c0_134] : memref<2x3x32x32xf32, #tpu.memory_space<vmem>>, vector<1x1x32x32xf32>
    %162 = vector.shape_cast %161 : vector<1x1x32x32xf32> to vector<32x32xf32>
    %cst_135 = arith.constant dense<0.000000e+00> : vector<8x32xf32>
    %163 = tpu.matmul %143, %162, %cst_135 {dimension_numbers = #tpu.dot_dimension_numbers<[1], [0], [0], [1], [0, 0, 1, 1], [], []>} : vector<8x32xf32>, vector<32x32xf32>, vector<8x32xf32> -> vector<8x32xf32>
    %164 = arith.addf %160, %163 : vector<8x32xf32>
    %c0_136 = arith.constant 0 : index
    %c2_137 = arith.constant 2 : index
    %c0_138 = arith.constant 0 : index
    %c0_139 = arith.constant 0 : index
    %165 = vector.load %arg7[%c0_136, %c2_137, %c0_138, %c0_139] : memref<2x3x32x32xf32, #tpu.memory_space<vmem>>, vector<1x1x32x32xf32>
    %166 = vector.shape_cast %165 : vector<1x1x32x32xf32> to vector<32x32xf32>
    %cst_140 = arith.constant dense<0.000000e+00> : vector<8x32xf32>
    %167 = tpu.matmul %157, %166, %cst_140 {dimension_numbers = #tpu.dot_dimension_numbers<[1], [0], [0], [1], [0, 0, 1, 1], [], []>} : vector<8x32xf32>, vector<32x32xf32>, vector<8x32xf32> -> vector<8x32xf32>
    %168 = arith.addf %164, %167 : vector<8x32xf32>
    %c0_141 = arith.constant 0 : index
    %c0_142 = arith.constant 0 : index
    %169 = vector.load %arg8[%c0_141, %c0_142] : memref<2x32xf32, #tpu.memory_space<vmem>>, vector<1x32xf32>
    %170 = vector.broadcast %169 : vector<1x32xf32> to vector<8x32xf32>
    %171 = arith.addf %168, %170 : vector<8x32xf32>
    %cst_143 = arith.constant 0.000000e+00 : f32
    %172 = vector.broadcast %cst_143 : f32 to vector<8x32xf32>
    %173 = arith.maximumf %171, %172 : vector<8x32xf32>
    %174 = vector.extract_strided_slice %173 {offsets = [7, 0], sizes = [1, 32], strides = [1, 1]} : vector<8x32xf32> to vector<1x32xf32>
    %175 = vector.extract_strided_slice %173 {offsets = [0, 0], sizes = [7, 32], strides = [1, 1]} : vector<8x32xf32> to vector<7x32xf32>
    %176 = tpu.concatenate %174, %175 in 0 : vector<1x32xf32>, vector<7x32xf32> -> vector<8x32xf32>
    %c0_144 = arith.constant 0 : index
    %c0_145 = arith.constant 0 : index
    %c0_146 = arith.constant 0 : index
    %177 = vector.load %arg4[%c0_144, %c0_145, %c0_146] : memref<3x8x1xf32, #tpu.memory_space<vmem>>, vector<1x8x1xf32>
    %178 = vector.shape_cast %177 : vector<1x8x1xf32> to vector<8x1xf32>
    %179 = vector.broadcast %178 : vector<8x1xf32> to vector<8x32xf32>
    %180 = arith.mulf %176, %179 : vector<8x32xf32>
    %181 = vector.extract_strided_slice %173 {offsets = [1, 0], sizes = [7, 32], strides = [1, 1]} : vector<8x32xf32> to vector<7x32xf32>
    %182 = vector.extract_strided_slice %173 {offsets = [0, 0], sizes = [1, 32], strides = [1, 1]} : vector<8x32xf32> to vector<1x32xf32>
    %183 = tpu.concatenate %181, %182 in 0 : vector<7x32xf32>, vector<1x32xf32> -> vector<8x32xf32>
    %c2_147 = arith.constant 2 : index
    %c0_148 = arith.constant 0 : index
    %c0_149 = arith.constant 0 : index
    %184 = vector.load %arg4[%c2_147, %c0_148, %c0_149] : memref<3x8x1xf32, #tpu.memory_space<vmem>>, vector<1x8x1xf32>
    %185 = vector.shape_cast %184 : vector<1x8x1xf32> to vector<8x1xf32>
    %186 = vector.broadcast %185 : vector<8x1xf32> to vector<8x32xf32>
    %187 = arith.mulf %183, %186 : vector<8x32xf32>
    %c1_150 = arith.constant 1 : index
    %c0_151 = arith.constant 0 : index
    %c0_152 = arith.constant 0 : index
    %c0_153 = arith.constant 0 : index
    %188 = vector.load %arg7[%c1_150, %c0_151, %c0_152, %c0_153] : memref<2x3x32x32xf32, #tpu.memory_space<vmem>>, vector<1x1x32x32xf32>
    %189 = vector.shape_cast %188 : vector<1x1x32x32xf32> to vector<32x32xf32>
    %cst_154 = arith.constant dense<0.000000e+00> : vector<8x32xf32>
    %190 = tpu.matmul %180, %189, %cst_154 {dimension_numbers = #tpu.dot_dimension_numbers<[1], [0], [0], [1], [0, 0, 1, 1], [], []>} : vector<8x32xf32>, vector<32x32xf32>, vector<8x32xf32> -> vector<8x32xf32>
    %c1_155 = arith.constant 1 : index
    %c1_156 = arith.constant 1 : index
    %c0_157 = arith.constant 0 : index
    %c0_158 = arith.constant 0 : index
    %191 = vector.load %arg7[%c1_155, %c1_156, %c0_157, %c0_158] : memref<2x3x32x32xf32, #tpu.memory_space<vmem>>, vector<1x1x32x32xf32>
    %192 = vector.shape_cast %191 : vector<1x1x32x32xf32> to vector<32x32xf32>
    %cst_159 = arith.constant dense<0.000000e+00> : vector<8x32xf32>
    %193 = tpu.matmul %173, %192, %cst_159 {dimension_numbers = #tpu.dot_dimension_numbers<[1], [0], [0], [1], [0, 0, 1, 1], [], []>} : vector<8x32xf32>, vector<32x32xf32>, vector<8x32xf32> -> vector<8x32xf32>
    %194 = arith.addf %190, %193 : vector<8x32xf32>
    %c1_160 = arith.constant 1 : index
    %c2_161 = arith.constant 2 : index
    %c0_162 = arith.constant 0 : index
    %c0_163 = arith.constant 0 : index
    %195 = vector.load %arg7[%c1_160, %c2_161, %c0_162, %c0_163] : memref<2x3x32x32xf32, #tpu.memory_space<vmem>>, vector<1x1x32x32xf32>
    %196 = vector.shape_cast %195 : vector<1x1x32x32xf32> to vector<32x32xf32>
    %cst_164 = arith.constant dense<0.000000e+00> : vector<8x32xf32>
    %197 = tpu.matmul %187, %196, %cst_164 {dimension_numbers = #tpu.dot_dimension_numbers<[1], [0], [0], [1], [0, 0, 1, 1], [], []>} : vector<8x32xf32>, vector<32x32xf32>, vector<8x32xf32> -> vector<8x32xf32>
    %198 = arith.addf %194, %197 : vector<8x32xf32>
    %c1_165 = arith.constant 1 : index
    %c0_166 = arith.constant 0 : index
    %199 = vector.load %arg8[%c1_165, %c0_166] : memref<2x32xf32, #tpu.memory_space<vmem>>, vector<1x32xf32>
    %200 = vector.broadcast %199 : vector<1x32xf32> to vector<8x32xf32>
    %201 = arith.addf %198, %200 : vector<8x32xf32>
    %202 = arith.addf %201, %143 : vector<8x32xf32>
    %cst_167 = arith.constant 0.000000e+00 : f32
    %203 = vector.broadcast %cst_167 : f32 to vector<8x32xf32>
    %204 = arith.maximumf %202, %203 : vector<8x32xf32>
    %c0_168 = arith.constant 0 : index
    %c0_169 = arith.constant 0 : index
    %205 = vector.load %arg13[%c0_168, %c0_169] : memref<16x8xf32, #tpu.memory_space<vmem>>, vector<16x8xf32>
    %cst_170 = arith.constant dense<0.000000e+00> : vector<16x32xf32>
    %206 = tpu.matmul %205, %204, %cst_170 {dimension_numbers = #tpu.dot_dimension_numbers<[1], [0], [0], [1], [0, 0, 1, 1], [], []>} : vector<16x8xf32>, vector<8x32xf32>, vector<16x32xf32> -> vector<16x32xf32>
    %c0_171 = arith.constant 0 : index
    %c0_172 = arith.constant 0 : index
    %207 = vector.load %arg14[%c0_171, %c0_172] : memref<32x64xf32, #tpu.memory_space<vmem>>, vector<32x64xf32>
    %cst_173 = arith.constant dense<0.000000e+00> : vector<16x64xf32>
    %208 = tpu.matmul %206, %207, %cst_173 {dimension_numbers = #tpu.dot_dimension_numbers<[1], [0], [0], [1], [0, 0, 1, 1], [], []>} : vector<16x32xf32>, vector<32x64xf32>, vector<16x64xf32> -> vector<16x64xf32>
    %209 = arith.addf %208, %71 : vector<16x64xf32>
    %210 = arith.addf %209, %132 : vector<16x64xf32>
    %211 = vector.extract_strided_slice %210 {offsets = [15, 0], sizes = [1, 64], strides = [1, 1]} : vector<16x64xf32> to vector<1x64xf32>
    %212 = vector.extract_strided_slice %210 {offsets = [0, 0], sizes = [15, 64], strides = [1, 1]} : vector<16x64xf32> to vector<15x64xf32>
    %213 = tpu.concatenate %211, %212 in 0 : vector<1x64xf32>, vector<15x64xf32> -> vector<16x64xf32>
    %c0_174 = arith.constant 0 : index
    %c0_175 = arith.constant 0 : index
    %c0_176 = arith.constant 0 : index
    %214 = vector.load %arg3[%c0_174, %c0_175, %c0_176] : memref<3x16x1xf32, #tpu.memory_space<vmem>>, vector<1x16x1xf32>
    %215 = vector.shape_cast %214 : vector<1x16x1xf32> to vector<16x1xf32>
    %216 = vector.broadcast %215 : vector<16x1xf32> to vector<16x64xf32>
    %217 = arith.mulf %213, %216 : vector<16x64xf32>
    %218 = vector.extract_strided_slice %210 {offsets = [1, 0], sizes = [15, 64], strides = [1, 1]} : vector<16x64xf32> to vector<15x64xf32>
    %219 = vector.extract_strided_slice %210 {offsets = [0, 0], sizes = [1, 64], strides = [1, 1]} : vector<16x64xf32> to vector<1x64xf32>
    %220 = tpu.concatenate %218, %219 in 0 : vector<15x64xf32>, vector<1x64xf32> -> vector<16x64xf32>
    %c2_177 = arith.constant 2 : index
    %c0_178 = arith.constant 0 : index
    %c0_179 = arith.constant 0 : index
    %221 = vector.load %arg3[%c2_177, %c0_178, %c0_179] : memref<3x16x1xf32, #tpu.memory_space<vmem>>, vector<1x16x1xf32>
    %222 = vector.shape_cast %221 : vector<1x16x1xf32> to vector<16x1xf32>
    %223 = vector.broadcast %222 : vector<16x1xf32> to vector<16x64xf32>
    %224 = arith.mulf %220, %223 : vector<16x64xf32>
    %c0_180 = arith.constant 0 : index
    %c0_181 = arith.constant 0 : index
    %c0_182 = arith.constant 0 : index
    %c0_183 = arith.constant 0 : index
    %225 = vector.load %arg5[%c0_180, %c0_181, %c0_182, %c0_183] : memref<2x3x64x64xf32, #tpu.memory_space<vmem>>, vector<1x1x64x64xf32>
    %226 = vector.shape_cast %225 : vector<1x1x64x64xf32> to vector<64x64xf32>
    %cst_184 = arith.constant dense<0.000000e+00> : vector<16x64xf32>
    %227 = tpu.matmul %217, %226, %cst_184 {dimension_numbers = #tpu.dot_dimension_numbers<[1], [0], [0], [1], [0, 0, 1, 1], [], []>} : vector<16x64xf32>, vector<64x64xf32>, vector<16x64xf32> -> vector<16x64xf32>
    %c0_185 = arith.constant 0 : index
    %c1_186 = arith.constant 1 : index
    %c0_187 = arith.constant 0 : index
    %c0_188 = arith.constant 0 : index
    %228 = vector.load %arg5[%c0_185, %c1_186, %c0_187, %c0_188] : memref<2x3x64x64xf32, #tpu.memory_space<vmem>>, vector<1x1x64x64xf32>
    %229 = vector.shape_cast %228 : vector<1x1x64x64xf32> to vector<64x64xf32>
    %cst_189 = arith.constant dense<0.000000e+00> : vector<16x64xf32>
    %230 = tpu.matmul %210, %229, %cst_189 {dimension_numbers = #tpu.dot_dimension_numbers<[1], [0], [0], [1], [0, 0, 1, 1], [], []>} : vector<16x64xf32>, vector<64x64xf32>, vector<16x64xf32> -> vector<16x64xf32>
    %231 = arith.addf %227, %230 : vector<16x64xf32>
    %c0_190 = arith.constant 0 : index
    %c2_191 = arith.constant 2 : index
    %c0_192 = arith.constant 0 : index
    %c0_193 = arith.constant 0 : index
    %232 = vector.load %arg5[%c0_190, %c2_191, %c0_192, %c0_193] : memref<2x3x64x64xf32, #tpu.memory_space<vmem>>, vector<1x1x64x64xf32>
    %233 = vector.shape_cast %232 : vector<1x1x64x64xf32> to vector<64x64xf32>
    %cst_194 = arith.constant dense<0.000000e+00> : vector<16x64xf32>
    %234 = tpu.matmul %224, %233, %cst_194 {dimension_numbers = #tpu.dot_dimension_numbers<[1], [0], [0], [1], [0, 0, 1, 1], [], []>} : vector<16x64xf32>, vector<64x64xf32>, vector<16x64xf32> -> vector<16x64xf32>
    %235 = arith.addf %231, %234 : vector<16x64xf32>
    %c0_195 = arith.constant 0 : index
    %c0_196 = arith.constant 0 : index
    %236 = vector.load %arg6[%c0_195, %c0_196] : memref<2x64xf32, #tpu.memory_space<vmem>>, vector<1x64xf32>
    %237 = vector.broadcast %236 : vector<1x64xf32> to vector<16x64xf32>
    %238 = arith.addf %235, %237 : vector<16x64xf32>
    %cst_197 = arith.constant 0.000000e+00 : f32
    %239 = vector.broadcast %cst_197 : f32 to vector<16x64xf32>
    %240 = arith.maximumf %238, %239 : vector<16x64xf32>
    %241 = vector.extract_strided_slice %240 {offsets = [15, 0], sizes = [1, 64], strides = [1, 1]} : vector<16x64xf32> to vector<1x64xf32>
    %242 = vector.extract_strided_slice %240 {offsets = [0, 0], sizes = [15, 64], strides = [1, 1]} : vector<16x64xf32> to vector<15x64xf32>
    %243 = tpu.concatenate %241, %242 in 0 : vector<1x64xf32>, vector<15x64xf32> -> vector<16x64xf32>
    %c0_198 = arith.constant 0 : index
    %c0_199 = arith.constant 0 : index
    %c0_200 = arith.constant 0 : index
    %244 = vector.load %arg3[%c0_198, %c0_199, %c0_200] : memref<3x16x1xf32, #tpu.memory_space<vmem>>, vector<1x16x1xf32>
    %245 = vector.shape_cast %244 : vector<1x16x1xf32> to vector<16x1xf32>
    %246 = vector.broadcast %245 : vector<16x1xf32> to vector<16x64xf32>
    %247 = arith.mulf %243, %246 : vector<16x64xf32>
    %248 = vector.extract_strided_slice %240 {offsets = [1, 0], sizes = [15, 64], strides = [1, 1]} : vector<16x64xf32> to vector<15x64xf32>
    %249 = vector.extract_strided_slice %240 {offsets = [0, 0], sizes = [1, 64], strides = [1, 1]} : vector<16x64xf32> to vector<1x64xf32>
    %250 = tpu.concatenate %248, %249 in 0 : vector<15x64xf32>, vector<1x64xf32> -> vector<16x64xf32>
    %c2_201 = arith.constant 2 : index
    %c0_202 = arith.constant 0 : index
    %c0_203 = arith.constant 0 : index
    %251 = vector.load %arg3[%c2_201, %c0_202, %c0_203] : memref<3x16x1xf32, #tpu.memory_space<vmem>>, vector<1x16x1xf32>
    %252 = vector.shape_cast %251 : vector<1x16x1xf32> to vector<16x1xf32>
    %253 = vector.broadcast %252 : vector<16x1xf32> to vector<16x64xf32>
    %254 = arith.mulf %250, %253 : vector<16x64xf32>
    %c1_204 = arith.constant 1 : index
    %c0_205 = arith.constant 0 : index
    %c0_206 = arith.constant 0 : index
    %c0_207 = arith.constant 0 : index
    %255 = vector.load %arg5[%c1_204, %c0_205, %c0_206, %c0_207] : memref<2x3x64x64xf32, #tpu.memory_space<vmem>>, vector<1x1x64x64xf32>
    %256 = vector.shape_cast %255 : vector<1x1x64x64xf32> to vector<64x64xf32>
    %cst_208 = arith.constant dense<0.000000e+00> : vector<16x64xf32>
    %257 = tpu.matmul %247, %256, %cst_208 {dimension_numbers = #tpu.dot_dimension_numbers<[1], [0], [0], [1], [0, 0, 1, 1], [], []>} : vector<16x64xf32>, vector<64x64xf32>, vector<16x64xf32> -> vector<16x64xf32>
    %c1_209 = arith.constant 1 : index
    %c1_210 = arith.constant 1 : index
    %c0_211 = arith.constant 0 : index
    %c0_212 = arith.constant 0 : index
    %258 = vector.load %arg5[%c1_209, %c1_210, %c0_211, %c0_212] : memref<2x3x64x64xf32, #tpu.memory_space<vmem>>, vector<1x1x64x64xf32>
    %259 = vector.shape_cast %258 : vector<1x1x64x64xf32> to vector<64x64xf32>
    %cst_213 = arith.constant dense<0.000000e+00> : vector<16x64xf32>
    %260 = tpu.matmul %240, %259, %cst_213 {dimension_numbers = #tpu.dot_dimension_numbers<[1], [0], [0], [1], [0, 0, 1, 1], [], []>} : vector<16x64xf32>, vector<64x64xf32>, vector<16x64xf32> -> vector<16x64xf32>
    %261 = arith.addf %257, %260 : vector<16x64xf32>
    %c1_214 = arith.constant 1 : index
    %c2_215 = arith.constant 2 : index
    %c0_216 = arith.constant 0 : index
    %c0_217 = arith.constant 0 : index
    %262 = vector.load %arg5[%c1_214, %c2_215, %c0_216, %c0_217] : memref<2x3x64x64xf32, #tpu.memory_space<vmem>>, vector<1x1x64x64xf32>
    %263 = vector.shape_cast %262 : vector<1x1x64x64xf32> to vector<64x64xf32>
    %cst_218 = arith.constant dense<0.000000e+00> : vector<16x64xf32>
    %264 = tpu.matmul %254, %263, %cst_218 {dimension_numbers = #tpu.dot_dimension_numbers<[1], [0], [0], [1], [0, 0, 1, 1], [], []>} : vector<16x64xf32>, vector<64x64xf32>, vector<16x64xf32> -> vector<16x64xf32>
    %265 = arith.addf %261, %264 : vector<16x64xf32>
    %c1_219 = arith.constant 1 : index
    %c0_220 = arith.constant 0 : index
    %266 = vector.load %arg6[%c1_219, %c0_220] : memref<2x64xf32, #tpu.memory_space<vmem>>, vector<1x64xf32>
    %267 = vector.broadcast %266 : vector<1x64xf32> to vector<16x64xf32>
    %268 = arith.addf %265, %267 : vector<16x64xf32>
    %269 = arith.addf %268, %210 : vector<16x64xf32>
    %cst_221 = arith.constant 0.000000e+00 : f32
    %270 = vector.broadcast %cst_221 : f32 to vector<16x64xf32>
    %271 = arith.maximumf %269, %270 : vector<16x64xf32>
    %272 = vector.extract_strided_slice %0 {offsets = [31, 0], sizes = [1, 128], strides = [1, 1]} : vector<32x128xf32> to vector<1x128xf32>
    %273 = vector.extract_strided_slice %0 {offsets = [0, 0], sizes = [31, 128], strides = [1, 1]} : vector<32x128xf32> to vector<31x128xf32>
    %274 = tpu.concatenate %272, %273 in 0 : vector<1x128xf32>, vector<31x128xf32> -> vector<32x128xf32>
    %c0_222 = arith.constant 0 : index
    %c0_223 = arith.constant 0 : index
    %c0_224 = arith.constant 0 : index
    %275 = vector.load %arg2[%c0_222, %c0_223, %c0_224] : memref<3x32x1xf32, #tpu.memory_space<vmem>>, vector<1x32x1xf32>
    %276 = vector.shape_cast %275 : vector<1x32x1xf32> to vector<32x1xf32>
    %277 = vector.broadcast %276 : vector<32x1xf32> to vector<32x128xf32>
    %278 = arith.mulf %274, %277 : vector<32x128xf32>
    %279 = vector.extract_strided_slice %0 {offsets = [1, 0], sizes = [31, 128], strides = [1, 1]} : vector<32x128xf32> to vector<31x128xf32>
    %280 = vector.extract_strided_slice %0 {offsets = [0, 0], sizes = [1, 128], strides = [1, 1]} : vector<32x128xf32> to vector<1x128xf32>
    %281 = tpu.concatenate %279, %280 in 0 : vector<31x128xf32>, vector<1x128xf32> -> vector<32x128xf32>
    %c2_225 = arith.constant 2 : index
    %c0_226 = arith.constant 0 : index
    %c0_227 = arith.constant 0 : index
    %282 = vector.load %arg2[%c2_225, %c0_226, %c0_227] : memref<3x32x1xf32, #tpu.memory_space<vmem>>, vector<1x32x1xf32>
    %283 = vector.shape_cast %282 : vector<1x32x1xf32> to vector<32x1xf32>
    %284 = vector.broadcast %283 : vector<32x1xf32> to vector<32x128xf32>
    %285 = arith.mulf %281, %284 : vector<32x128xf32>
    %c0_228 = arith.constant 0 : index
    %c0_229 = arith.constant 0 : index
    %c0_230 = arith.constant 0 : index
    %c0_231 = arith.constant 0 : index
    %286 = vector.load %arg9[%c0_228, %c0_229, %c0_230, %c0_231] : memref<4x3x128x128xf32, #tpu.memory_space<vmem>>, vector<1x1x128x128xf32>
    %287 = vector.shape_cast %286 : vector<1x1x128x128xf32> to vector<128x128xf32>
    %cst_232 = arith.constant dense<0.000000e+00> : vector<32x128xf32>
    %288 = tpu.matmul %278, %287, %cst_232 {dimension_numbers = #tpu.dot_dimension_numbers<[1], [0], [0], [1], [0, 0, 1, 1], [], []>} : vector<32x128xf32>, vector<128x128xf32>, vector<32x128xf32> -> vector<32x128xf32>
    %c0_233 = arith.constant 0 : index
    %c1_234 = arith.constant 1 : index
    %c0_235 = arith.constant 0 : index
    %c0_236 = arith.constant 0 : index
    %289 = vector.load %arg9[%c0_233, %c1_234, %c0_235, %c0_236] : memref<4x3x128x128xf32, #tpu.memory_space<vmem>>, vector<1x1x128x128xf32>
    %290 = vector.shape_cast %289 : vector<1x1x128x128xf32> to vector<128x128xf32>
    %cst_237 = arith.constant dense<0.000000e+00> : vector<32x128xf32>
    %291 = tpu.matmul %0, %290, %cst_237 {dimension_numbers = #tpu.dot_dimension_numbers<[1], [0], [0], [1], [0, 0, 1, 1], [], []>} : vector<32x128xf32>, vector<128x128xf32>, vector<32x128xf32> -> vector<32x128xf32>
    %292 = arith.addf %288, %291 : vector<32x128xf32>
    %c0_238 = arith.constant 0 : index
    %c2_239 = arith.constant 2 : index
    %c0_240 = arith.constant 0 : index
    %c0_241 = arith.constant 0 : index
    %293 = vector.load %arg9[%c0_238, %c2_239, %c0_240, %c0_241] : memref<4x3x128x128xf32, #tpu.memory_space<vmem>>, vector<1x1x128x128xf32>
    %294 = vector.shape_cast %293 : vector<1x1x128x128xf32> to vector<128x128xf32>
    %cst_242 = arith.constant dense<0.000000e+00> : vector<32x128xf32>
    %295 = tpu.matmul %285, %294, %cst_242 {dimension_numbers = #tpu.dot_dimension_numbers<[1], [0], [0], [1], [0, 0, 1, 1], [], []>} : vector<32x128xf32>, vector<128x128xf32>, vector<32x128xf32> -> vector<32x128xf32>
    %296 = arith.addf %292, %295 : vector<32x128xf32>
    %c0_243 = arith.constant 0 : index
    %c0_244 = arith.constant 0 : index
    %297 = vector.load %arg10[%c0_243, %c0_244] : memref<4x128xf32, #tpu.memory_space<vmem>>, vector<1x128xf32>
    %298 = vector.broadcast %297 : vector<1x128xf32> to vector<32x128xf32>
    %299 = arith.addf %296, %298 : vector<32x128xf32>
    %cst_245 = arith.constant 0.000000e+00 : f32
    %300 = vector.broadcast %cst_245 : f32 to vector<32x128xf32>
    %301 = arith.maximumf %299, %300 : vector<32x128xf32>
    %302 = vector.extract_strided_slice %301 {offsets = [31, 0], sizes = [1, 128], strides = [1, 1]} : vector<32x128xf32> to vector<1x128xf32>
    %303 = vector.extract_strided_slice %301 {offsets = [0, 0], sizes = [31, 128], strides = [1, 1]} : vector<32x128xf32> to vector<31x128xf32>
    %304 = tpu.concatenate %302, %303 in 0 : vector<1x128xf32>, vector<31x128xf32> -> vector<32x128xf32>
    %c0_246 = arith.constant 0 : index
    %c0_247 = arith.constant 0 : index
    %c0_248 = arith.constant 0 : index
    %305 = vector.load %arg2[%c0_246, %c0_247, %c0_248] : memref<3x32x1xf32, #tpu.memory_space<vmem>>, vector<1x32x1xf32>
    %306 = vector.shape_cast %305 : vector<1x32x1xf32> to vector<32x1xf32>
    %307 = vector.broadcast %306 : vector<32x1xf32> to vector<32x128xf32>
    %308 = arith.mulf %304, %307 : vector<32x128xf32>
    %309 = vector.extract_strided_slice %301 {offsets = [1, 0], sizes = [31, 128], strides = [1, 1]} : vector<32x128xf32> to vector<31x128xf32>
    %310 = vector.extract_strided_slice %301 {offsets = [0, 0], sizes = [1, 128], strides = [1, 1]} : vector<32x128xf32> to vector<1x128xf32>
    %311 = tpu.concatenate %309, %310 in 0 : vector<31x128xf32>, vector<1x128xf32> -> vector<32x128xf32>
    %c2_249 = arith.constant 2 : index
    %c0_250 = arith.constant 0 : index
    %c0_251 = arith.constant 0 : index
    %312 = vector.load %arg2[%c2_249, %c0_250, %c0_251] : memref<3x32x1xf32, #tpu.memory_space<vmem>>, vector<1x32x1xf32>
    %313 = vector.shape_cast %312 : vector<1x32x1xf32> to vector<32x1xf32>
    %314 = vector.broadcast %313 : vector<32x1xf32> to vector<32x128xf32>
    %315 = arith.mulf %311, %314 : vector<32x128xf32>
    %c1_252 = arith.constant 1 : index
    %c0_253 = arith.constant 0 : index
    %c0_254 = arith.constant 0 : index
    %c0_255 = arith.constant 0 : index
    %316 = vector.load %arg9[%c1_252, %c0_253, %c0_254, %c0_255] : memref<4x3x128x128xf32, #tpu.memory_space<vmem>>, vector<1x1x128x128xf32>
    %317 = vector.shape_cast %316 : vector<1x1x128x128xf32> to vector<128x128xf32>
    %cst_256 = arith.constant dense<0.000000e+00> : vector<32x128xf32>
    %318 = tpu.matmul %308, %317, %cst_256 {dimension_numbers = #tpu.dot_dimension_numbers<[1], [0], [0], [1], [0, 0, 1, 1], [], []>} : vector<32x128xf32>, vector<128x128xf32>, vector<32x128xf32> -> vector<32x128xf32>
    %c1_257 = arith.constant 1 : index
    %c1_258 = arith.constant 1 : index
    %c0_259 = arith.constant 0 : index
    %c0_260 = arith.constant 0 : index
    %319 = vector.load %arg9[%c1_257, %c1_258, %c0_259, %c0_260] : memref<4x3x128x128xf32, #tpu.memory_space<vmem>>, vector<1x1x128x128xf32>
    %320 = vector.shape_cast %319 : vector<1x1x128x128xf32> to vector<128x128xf32>
    %cst_261 = arith.constant dense<0.000000e+00> : vector<32x128xf32>
    %321 = tpu.matmul %301, %320, %cst_261 {dimension_numbers = #tpu.dot_dimension_numbers<[1], [0], [0], [1], [0, 0, 1, 1], [], []>} : vector<32x128xf32>, vector<128x128xf32>, vector<32x128xf32> -> vector<32x128xf32>
    %322 = arith.addf %318, %321 : vector<32x128xf32>
    %c1_262 = arith.constant 1 : index
    %c2_263 = arith.constant 2 : index
    %c0_264 = arith.constant 0 : index
    %c0_265 = arith.constant 0 : index
    %323 = vector.load %arg9[%c1_262, %c2_263, %c0_264, %c0_265] : memref<4x3x128x128xf32, #tpu.memory_space<vmem>>, vector<1x1x128x128xf32>
    %324 = vector.shape_cast %323 : vector<1x1x128x128xf32> to vector<128x128xf32>
    %cst_266 = arith.constant dense<0.000000e+00> : vector<32x128xf32>
    %325 = tpu.matmul %315, %324, %cst_266 {dimension_numbers = #tpu.dot_dimension_numbers<[1], [0], [0], [1], [0, 0, 1, 1], [], []>} : vector<32x128xf32>, vector<128x128xf32>, vector<32x128xf32> -> vector<32x128xf32>
    %326 = arith.addf %322, %325 : vector<32x128xf32>
    %c1_267 = arith.constant 1 : index
    %c0_268 = arith.constant 0 : index
    %327 = vector.load %arg10[%c1_267, %c0_268] : memref<4x128xf32, #tpu.memory_space<vmem>>, vector<1x128xf32>
    %328 = vector.broadcast %327 : vector<1x128xf32> to vector<32x128xf32>
    %329 = arith.addf %326, %328 : vector<32x128xf32>
    %cst_269 = arith.constant 0.000000e+00 : f32
    %330 = vector.broadcast %cst_269 : f32 to vector<32x128xf32>
    %331 = arith.maximumf %329, %330 : vector<32x128xf32>
    %c0_270 = arith.constant 0 : index
    %c0_271 = arith.constant 0 : index
    %332 = vector.load %arg15[%c0_270, %c0_271] : memref<32x16xf32, #tpu.memory_space<vmem>>, vector<32x16xf32>
    %cst_272 = arith.constant dense<0.000000e+00> : vector<32x64xf32>
    %333 = tpu.matmul %332, %271, %cst_272 {dimension_numbers = #tpu.dot_dimension_numbers<[1], [0], [0], [1], [0, 0, 1, 1], [], []>} : vector<32x16xf32>, vector<16x64xf32>, vector<32x64xf32> -> vector<32x64xf32>
    %c0_273 = arith.constant 0 : index
    %c0_274 = arith.constant 0 : index
    %334 = vector.load %arg16[%c0_273, %c0_274] : memref<64x128xf32, #tpu.memory_space<vmem>>, vector<64x128xf32>
    %cst_275 = arith.constant dense<0.000000e+00> : vector<32x128xf32>
    %335 = tpu.matmul %333, %334, %cst_275 {dimension_numbers = #tpu.dot_dimension_numbers<[1], [0], [0], [1], [0, 0, 1, 1], [], []>} : vector<32x64xf32>, vector<64x128xf32>, vector<32x128xf32> -> vector<32x128xf32>
    %336 = arith.addf %335, %331 : vector<32x128xf32>
    %337 = vector.extract_strided_slice %336 {offsets = [31, 0], sizes = [1, 128], strides = [1, 1]} : vector<32x128xf32> to vector<1x128xf32>
    %338 = vector.extract_strided_slice %336 {offsets = [0, 0], sizes = [31, 128], strides = [1, 1]} : vector<32x128xf32> to vector<31x128xf32>
    %339 = tpu.concatenate %337, %338 in 0 : vector<1x128xf32>, vector<31x128xf32> -> vector<32x128xf32>
    %c0_276 = arith.constant 0 : index
    %c0_277 = arith.constant 0 : index
    %c0_278 = arith.constant 0 : index
    %340 = vector.load %arg2[%c0_276, %c0_277, %c0_278] : memref<3x32x1xf32, #tpu.memory_space<vmem>>, vector<1x32x1xf32>
    %341 = vector.shape_cast %340 : vector<1x32x1xf32> to vector<32x1xf32>
    %342 = vector.broadcast %341 : vector<32x1xf32> to vector<32x128xf32>
    %343 = arith.mulf %339, %342 : vector<32x128xf32>
    %344 = vector.extract_strided_slice %336 {offsets = [1, 0], sizes = [31, 128], strides = [1, 1]} : vector<32x128xf32> to vector<31x128xf32>
    %345 = vector.extract_strided_slice %336 {offsets = [0, 0], sizes = [1, 128], strides = [1, 1]} : vector<32x128xf32> to vector<1x128xf32>
    %346 = tpu.concatenate %344, %345 in 0 : vector<31x128xf32>, vector<1x128xf32> -> vector<32x128xf32>
    %c2_279 = arith.constant 2 : index
    %c0_280 = arith.constant 0 : index
    %c0_281 = arith.constant 0 : index
    %347 = vector.load %arg2[%c2_279, %c0_280, %c0_281] : memref<3x32x1xf32, #tpu.memory_space<vmem>>, vector<1x32x1xf32>
    %348 = vector.shape_cast %347 : vector<1x32x1xf32> to vector<32x1xf32>
    %349 = vector.broadcast %348 : vector<32x1xf32> to vector<32x128xf32>
    %350 = arith.mulf %346, %349 : vector<32x128xf32>
    %c2_282 = arith.constant 2 : index
    %c0_283 = arith.constant 0 : index
    %c0_284 = arith.constant 0 : index
    %c0_285 = arith.constant 0 : index
    %351 = vector.load %arg9[%c2_282, %c0_283, %c0_284, %c0_285] : memref<4x3x128x128xf32, #tpu.memory_space<vmem>>, vector<1x1x128x128xf32>
    %352 = vector.shape_cast %351 : vector<1x1x128x128xf32> to vector<128x128xf32>
    %cst_286 = arith.constant dense<0.000000e+00> : vector<32x128xf32>
    %353 = tpu.matmul %343, %352, %cst_286 {dimension_numbers = #tpu.dot_dimension_numbers<[1], [0], [0], [1], [0, 0, 1, 1], [], []>} : vector<32x128xf32>, vector<128x128xf32>, vector<32x128xf32> -> vector<32x128xf32>
    %c2_287 = arith.constant 2 : index
    %c1_288 = arith.constant 1 : index
    %c0_289 = arith.constant 0 : index
    %c0_290 = arith.constant 0 : index
    %354 = vector.load %arg9[%c2_287, %c1_288, %c0_289, %c0_290] : memref<4x3x128x128xf32, #tpu.memory_space<vmem>>, vector<1x1x128x128xf32>
    %355 = vector.shape_cast %354 : vector<1x1x128x128xf32> to vector<128x128xf32>
    %cst_291 = arith.constant dense<0.000000e+00> : vector<32x128xf32>
    %356 = tpu.matmul %336, %355, %cst_291 {dimension_numbers = #tpu.dot_dimension_numbers<[1], [0], [0], [1], [0, 0, 1, 1], [], []>} : vector<32x128xf32>, vector<128x128xf32>, vector<32x128xf32> -> vector<32x128xf32>
    %357 = arith.addf %353, %356 : vector<32x128xf32>
    %c2_292 = arith.constant 2 : index
    %c2_293 = arith.constant 2 : index
    %c0_294 = arith.constant 0 : index
    %c0_295 = arith.constant 0 : index
    %358 = vector.load %arg9[%c2_292, %c2_293, %c0_294, %c0_295] : memref<4x3x128x128xf32, #tpu.memory_space<vmem>>, vector<1x1x128x128xf32>
    %359 = vector.shape_cast %358 : vector<1x1x128x128xf32> to vector<128x128xf32>
    %cst_296 = arith.constant dense<0.000000e+00> : vector<32x128xf32>
    %360 = tpu.matmul %350, %359, %cst_296 {dimension_numbers = #tpu.dot_dimension_numbers<[1], [0], [0], [1], [0, 0, 1, 1], [], []>} : vector<32x128xf32>, vector<128x128xf32>, vector<32x128xf32> -> vector<32x128xf32>
    %361 = arith.addf %357, %360 : vector<32x128xf32>
    %c2_297 = arith.constant 2 : index
    %c0_298 = arith.constant 0 : index
    %362 = vector.load %arg10[%c2_297, %c0_298] : memref<4x128xf32, #tpu.memory_space<vmem>>, vector<1x128xf32>
    %363 = vector.broadcast %362 : vector<1x128xf32> to vector<32x128xf32>
    %364 = arith.addf %361, %363 : vector<32x128xf32>
    %cst_299 = arith.constant 0.000000e+00 : f32
    %365 = vector.broadcast %cst_299 : f32 to vector<32x128xf32>
    %366 = arith.maximumf %364, %365 : vector<32x128xf32>
    %367 = vector.extract_strided_slice %366 {offsets = [31, 0], sizes = [1, 128], strides = [1, 1]} : vector<32x128xf32> to vector<1x128xf32>
    %368 = vector.extract_strided_slice %366 {offsets = [0, 0], sizes = [31, 128], strides = [1, 1]} : vector<32x128xf32> to vector<31x128xf32>
    %369 = tpu.concatenate %367, %368 in 0 : vector<1x128xf32>, vector<31x128xf32> -> vector<32x128xf32>
    %c0_300 = arith.constant 0 : index
    %c0_301 = arith.constant 0 : index
    %c0_302 = arith.constant 0 : index
    %370 = vector.load %arg2[%c0_300, %c0_301, %c0_302] : memref<3x32x1xf32, #tpu.memory_space<vmem>>, vector<1x32x1xf32>
    %371 = vector.shape_cast %370 : vector<1x32x1xf32> to vector<32x1xf32>
    %372 = vector.broadcast %371 : vector<32x1xf32> to vector<32x128xf32>
    %373 = arith.mulf %369, %372 : vector<32x128xf32>
    %374 = vector.extract_strided_slice %366 {offsets = [1, 0], sizes = [31, 128], strides = [1, 1]} : vector<32x128xf32> to vector<31x128xf32>
    %375 = vector.extract_strided_slice %366 {offsets = [0, 0], sizes = [1, 128], strides = [1, 1]} : vector<32x128xf32> to vector<1x128xf32>
    %376 = tpu.concatenate %374, %375 in 0 : vector<31x128xf32>, vector<1x128xf32> -> vector<32x128xf32>
    %c2_303 = arith.constant 2 : index
    %c0_304 = arith.constant 0 : index
    %c0_305 = arith.constant 0 : index
    %377 = vector.load %arg2[%c2_303, %c0_304, %c0_305] : memref<3x32x1xf32, #tpu.memory_space<vmem>>, vector<1x32x1xf32>
    %378 = vector.shape_cast %377 : vector<1x32x1xf32> to vector<32x1xf32>
    %379 = vector.broadcast %378 : vector<32x1xf32> to vector<32x128xf32>
    %380 = arith.mulf %376, %379 : vector<32x128xf32>
    %c3 = arith.constant 3 : index
    %c0_306 = arith.constant 0 : index
    %c0_307 = arith.constant 0 : index
    %c0_308 = arith.constant 0 : index
    %381 = vector.load %arg9[%c3, %c0_306, %c0_307, %c0_308] : memref<4x3x128x128xf32, #tpu.memory_space<vmem>>, vector<1x1x128x128xf32>
    %382 = vector.shape_cast %381 : vector<1x1x128x128xf32> to vector<128x128xf32>
    %cst_309 = arith.constant dense<0.000000e+00> : vector<32x128xf32>
    %383 = tpu.matmul %373, %382, %cst_309 {dimension_numbers = #tpu.dot_dimension_numbers<[1], [0], [0], [1], [0, 0, 1, 1], [], []>} : vector<32x128xf32>, vector<128x128xf32>, vector<32x128xf32> -> vector<32x128xf32>
    %c3_310 = arith.constant 3 : index
    %c1_311 = arith.constant 1 : index
    %c0_312 = arith.constant 0 : index
    %c0_313 = arith.constant 0 : index
    %384 = vector.load %arg9[%c3_310, %c1_311, %c0_312, %c0_313] : memref<4x3x128x128xf32, #tpu.memory_space<vmem>>, vector<1x1x128x128xf32>
    %385 = vector.shape_cast %384 : vector<1x1x128x128xf32> to vector<128x128xf32>
    %cst_314 = arith.constant dense<0.000000e+00> : vector<32x128xf32>
    %386 = tpu.matmul %366, %385, %cst_314 {dimension_numbers = #tpu.dot_dimension_numbers<[1], [0], [0], [1], [0, 0, 1, 1], [], []>} : vector<32x128xf32>, vector<128x128xf32>, vector<32x128xf32> -> vector<32x128xf32>
    %387 = arith.addf %383, %386 : vector<32x128xf32>
    %c3_315 = arith.constant 3 : index
    %c2_316 = arith.constant 2 : index
    %c0_317 = arith.constant 0 : index
    %c0_318 = arith.constant 0 : index
    %388 = vector.load %arg9[%c3_315, %c2_316, %c0_317, %c0_318] : memref<4x3x128x128xf32, #tpu.memory_space<vmem>>, vector<1x1x128x128xf32>
    %389 = vector.shape_cast %388 : vector<1x1x128x128xf32> to vector<128x128xf32>
    %cst_319 = arith.constant dense<0.000000e+00> : vector<32x128xf32>
    %390 = tpu.matmul %380, %389, %cst_319 {dimension_numbers = #tpu.dot_dimension_numbers<[1], [0], [0], [1], [0, 0, 1, 1], [], []>} : vector<32x128xf32>, vector<128x128xf32>, vector<32x128xf32> -> vector<32x128xf32>
    %391 = arith.addf %387, %390 : vector<32x128xf32>
    %c3_320 = arith.constant 3 : index
    %c0_321 = arith.constant 0 : index
    %392 = vector.load %arg10[%c3_320, %c0_321] : memref<4x128xf32, #tpu.memory_space<vmem>>, vector<1x128xf32>
    %393 = vector.broadcast %392 : vector<1x128xf32> to vector<32x128xf32>
    %394 = arith.addf %391, %393 : vector<32x128xf32>
    %395 = arith.negf %394 : vector<32x128xf32>
    %396 = math.exp %395 : vector<32x128xf32>
    %cst_322 = arith.constant 1.000000e+00 : f32
    %397 = vector.broadcast %cst_322 : f32 to vector<32x128xf32>
    %398 = arith.addf %397, %396 : vector<32x128xf32>
    %399 = arith.divf %397, %398 : vector<32x128xf32>
    %cst_323 = arith.constant 1.000000e+00 : f32
    %400 = vector.broadcast %cst_323 : f32 to vector<32x128xf32>
    %401 = arith.addf %400, %399 : vector<32x128xf32>
    %402 = arith.mulf %401, %331 : vector<32x128xf32>
    %c0_324 = arith.constant 0 : index
    %c0_325 = arith.constant 0 : index
    %403 = vector.load %arg17[%c0_324, %c0_325] : memref<32x128xf32, #tpu.memory_space<vmem>>, vector<32x128xf32>
    tpu.vector_store %arg17[%c0_324, %c0_325], %402 {strides = array<i32>} : memref<32x128xf32, #tpu.memory_space<vmem>>, vector<32x128xf32>,
    return
  }
  func.func @transform_0(%arg0: i32) -> (i32, i32) {
    %c0_i32 = arith.constant 0 : i32
    %c0_i32_0 = arith.constant 0 : i32
    return %arg0, %c0_i32 : i32, i32
  }
  func.func @transform_1(%arg0: i32) -> (i32, i32, i32) {
    %c0_i32 = arith.constant 0 : i32
    %c0_i32_0 = arith.constant 0 : i32
    %c0_i32_1 = arith.constant 0 : i32
    %c0_i32_2 = arith.constant 0 : i32
    return %c0_i32, %c0_i32_0, %c0_i32_1 : i32, i32, i32
  }
  func.func @transform_2(%arg0: i32) -> (i32, i32, i32) {
    %c0_i32 = arith.constant 0 : i32
    %c0_i32_0 = arith.constant 0 : i32
    %c0_i32_1 = arith.constant 0 : i32
    %c0_i32_2 = arith.constant 0 : i32
    return %c0_i32, %c0_i32_0, %c0_i32_1 : i32, i32, i32
  }
  func.func @transform_3(%arg0: i32) -> (i32, i32, i32) {
    %c0_i32 = arith.constant 0 : i32
    %c0_i32_0 = arith.constant 0 : i32
    %c0_i32_1 = arith.constant 0 : i32
    %c0_i32_2 = arith.constant 0 : i32
    return %c0_i32, %c0_i32_0, %c0_i32_1 : i32, i32, i32
  }
  func.func @transform_4(%arg0: i32) -> (i32, i32, i32, i32) {
    %c0_i32 = arith.constant 0 : i32
    %c0_i32_0 = arith.constant 0 : i32
    %c0_i32_1 = arith.constant 0 : i32
    %c0_i32_2 = arith.constant 0 : i32
    %c0_i32_3 = arith.constant 0 : i32
    return %c0_i32, %c0_i32_0, %c0_i32_1, %c0_i32_2 : i32, i32, i32, i32
  }
  func.func @transform_5(%arg0: i32) -> (i32, i32) {
    %c0_i32 = arith.constant 0 : i32
    %c0_i32_0 = arith.constant 0 : i32
    %c0_i32_1 = arith.constant 0 : i32
    return %c0_i32, %c0_i32_0 : i32, i32
  }
  func.func @transform_6(%arg0: i32) -> (i32, i32, i32, i32) {
    %c0_i32 = arith.constant 0 : i32
    %c0_i32_0 = arith.constant 0 : i32
    %c0_i32_1 = arith.constant 0 : i32
    %c0_i32_2 = arith.constant 0 : i32
    %c0_i32_3 = arith.constant 0 : i32
    return %c0_i32, %c0_i32_0, %c0_i32_1, %c0_i32_2 : i32, i32, i32, i32
  }
  func.func @transform_7(%arg0: i32) -> (i32, i32) {
    %c0_i32 = arith.constant 0 : i32
    %c0_i32_0 = arith.constant 0 : i32
    %c0_i32_1 = arith.constant 0 : i32
    return %c0_i32, %c0_i32_0 : i32, i32
  }
  func.func @transform_8(%arg0: i32) -> (i32, i32, i32, i32) {
    %c0_i32 = arith.constant 0 : i32
    %c0_i32_0 = arith.constant 0 : i32
    %c0_i32_1 = arith.constant 0 : i32
    %c0_i32_2 = arith.constant 0 : i32
    %c0_i32_3 = arith.constant 0 : i32
    return %c0_i32, %c0_i32_0, %c0_i32_1, %c0_i32_2 : i32, i32, i32, i32
  }
  func.func @transform_9(%arg0: i32) -> (i32, i32) {
    %c0_i32 = arith.constant 0 : i32
    %c0_i32_0 = arith.constant 0 : i32
    %c0_i32_1 = arith.constant 0 : i32
    return %c0_i32, %c0_i32_0 : i32, i32
  }
  func.func @transform_10(%arg0: i32) -> (i32, i32, i32) {
    %c0_i32 = arith.constant 0 : i32
    %c0_i32_0 = arith.constant 0 : i32
    %c0_i32_1 = arith.constant 0 : i32
    %c0_i32_2 = arith.constant 0 : i32
    return %c0_i32, %c0_i32_0, %c0_i32_1 : i32, i32, i32
  }
  func.func @transform_11(%arg0: i32) -> (i32, i32, i32) {
    %c0_i32 = arith.constant 0 : i32
    %c0_i32_0 = arith.constant 0 : i32
    %c0_i32_1 = arith.constant 0 : i32
    %c0_i32_2 = arith.constant 0 : i32
    return %c0_i32, %c0_i32_0, %c0_i32_1 : i32, i32, i32
  }
  func.func @transform_12(%arg0: i32) -> (i32, i32) {
    %c0_i32 = arith.constant 0 : i32
    %c0_i32_0 = arith.constant 0 : i32
    %c0_i32_1 = arith.constant 0 : i32
    return %c0_i32, %c0_i32_0 : i32, i32
  }
  func.func @transform_13(%arg0: i32) -> (i32, i32) {
    %c0_i32 = arith.constant 0 : i32
    %c0_i32_0 = arith.constant 0 : i32
    %c0_i32_1 = arith.constant 0 : i32
    return %c0_i32, %c0_i32_0 : i32, i32
  }
  func.func @transform_14(%arg0: i32) -> (i32, i32) {
    %c0_i32 = arith.constant 0 : i32
    %c0_i32_0 = arith.constant 0 : i32
    %c0_i32_1 = arith.constant 0 : i32
    return %c0_i32, %c0_i32_0 : i32, i32
  }
  func.func @transform_15(%arg0: i32) -> (i32, i32) {
    %c0_i32 = arith.constant 0 : i32
    %c0_i32_0 = arith.constant 0 : i32
    %c0_i32_1 = arith.constant 0 : i32
    return %c0_i32, %c0_i32_0 : i32, i32
  }
  func.func @transform_16(%arg0: i32) -> (i32, i32) {
    %c0_i32 = arith.constant 0 : i32
    %c0_i32_0 = arith.constant 0 : i32
    return %arg0, %c0_i32 : i32, i32
  }
}

</mosaic_0001>

<bundles_post_ra>
// kernel: tpu_custom_call.1
= control target key start
LH: loop header
LB: loop body
LE: loop exit
PB: predicated region body
PF: predicated region fallthrough
CT: control target
= control target key end

     0   :  { %s9175_s0 = inlined_call_operand.hbm [shape: f32[64,128], index: 0, kind: input, shape index: {}]   ;;  %s9176_s1 = inlined_call_operand.vmem [shape: f32[3,32,1], index: 1, kind: input, shape index: {}]   ;;  %s9177_s2 = inlined_call_operand.vmem [shape: f32[3,16,1], index: 2, kind: input, shape index: {}]   ;;  %s9178_s3 = inlined_call_operand.vmem [shape: f32[3,8,1], index: 3, kind: input, shape index: {}]   ;;  %s9179_s4 = inlined_call_operand.vmem [shape: f32[2,3,64,64], index: 4, kind: input, shape index: {}]   ;;  %s9180_s5 = inlined_call_operand.hbm [shape: f32[2,64], index: 5, kind: input, shape index: {}]   ;;  %s9181_s6 = inlined_call_operand.vmem [shape: f32[2,3,32,32], index: 6, kind: input, shape index: {}]   ;;  %s9182_s7 = inlined_call_operand.hbm [shape: f32[2,32], index: 7, kind: input, shape index: {}]   ;;  %s9183_s8 = inlined_call_operand.hbm [shape: f32[4,3,128,128], index: 8, kind: input, shape index: {}]   ;;  %s9184_s9 = inlined_call_operand.hbm [shape: f32[4,128], index: 9, kind: input, shape index: {}]   ;;  %s9185_s10 = inlined_call_operand.vmem [shape: f32[2,128,64], index: 10, kind: input, shape index: {}]   ;;  %s9186_s11 = inlined_call_operand.vmem [shape: f32[2,64,32], index: 11, kind: input, shape index: {}]   ;;  %s9187_s12 = inlined_call_operand.vmem [shape: f32[16,8], index: 12, kind: input, shape index: {}]   ;;  %s9188_s13 = inlined_call_operand.hbm [shape: f32[32,64], index: 13, kind: input, shape index: {}]   ;;  %s9189_s14 = inlined_call_operand.vmem [shape: f32[32,16], index: 14, kind: input, shape index: {}]   ;;  %s9190_s15 = inlined_call_operand.vmem [shape: f32[64,128], index: 15, kind: input, shape index: {}]   ;;  %s9191_s16 = inlined_call_operand.hbm [shape: f32[64,128], index: 16, kind: output, shape index: {}]  }
   0x1   :  { %9212 = sst [smem:[#allocation28_spill]] %s9175_s0 }
   0x2   :  { %9213 = sst [smem:[#allocation29_spill]] %s9180_s5 }
   0x3   :  { %9214 = sst [smem:[#allocation30_spill]] %s9182_s7 }
   0x4   :  { %9215 = sst [smem:[#allocation31_spill]] %s9183_s8 }
   0x5   :  { %9216 = sst [smem:[#allocation32_spill]] %s9184_s9 }
   0x6   :  { %9217 = sst [smem:[#allocation33_spill]] %s9188_s13 }
   0x7   :  { %9218 = sst [smem:[#allocation34_spill]] %s9191_s16 }
   0x8   :  { %21 = vsyncpa [#allocation4], 0 }
   0x9   :  { %23 = vsyncpa [#allocation4 + $0x1], 0 }
   0xa   :  { %24 = vsyncpa [#allocation7], 0 }
   0xb   :  { %25 = vsyncpa [#allocation10], 0 }
   0xc   :  { %26 = vsyncpa [#allocation13], 0 }
   0xd   :  { %27 = vsyncpa [#allocation5], 0 }
   0xe   :  { %29 = vsyncpa [#allocation5 + $0x1], 0  ;;  %s7546_s21 = smov 0   ;;  %s7548_s22 = smov 0  }
   0xf   :  { %s7550_s23 = smov 0   ;;  %s7552_s24 = smov 0  }
  0x10 LB: > { %9219 = sst [smem:[#allocation20_spill]] %s7433_s21  ;;  %s7447_s25 = smov [#allocation6]   ;;  %s7445_s24 = sphi %s7552_s24, %s9260_s24   ;;  %s7441_s23 = sphi %s7550_s23, %s9262_s23   ;;  %s7437_s22 = sphi %s7548_s22, %s9264_s22   ;;  %s7433_s21 = sphi %s7546_s21, %s9263_s21  }
  0x11   : > { %9220 = sst [smem:[#allocation21_spill]] %s7441_s23  ;;  %s432_s26 = sshll.u32 %s7447_s25, 4  ;;  %s433_s26 = int_to_ptr.vmem [resolvable:$true] %s432_s26 }
  0x12   : > { %9221 = sst [smem:[#allocation22_spill]] %s7445_s24  ;;  %s7567_s27 = sadd.s32 4294967295, %s7445_s24  }
  0x13   : > { %p5307_p0 = scmp.ge.s32.totalorder %s7445_s24, 1  ;;  %p9198_p1 = scmp.eq.s32.totalorder %s7567_s27, 0 }
  0x14   : > { %p407_p2 = scmp.lt.s32.totalorder %s7445_s24, 3  ;;  %s7448_s29 = smov [#allocation9]  }
  0x15   : > { %s456_s30 = sshll.u32 %s7448_s29, 4  ;;  %s7449_s17 = smov [#allocation8]   ;;  %s7579_s30 = int_to_ptr.vmem [resolvable:$true] %s456_s30 }
  0x16   : > { %p7572_p3 = pnand %p5307_p0, %p407_p2  ;;  %s446_s18 = sshll.u32 %s7449_s17, 4  ;;  %s7587_s18 = int_to_ptr.vmem [resolvable:$true] %s446_s18 }
  0x17   : > { %s7222_s20 = scalar_lea.vmem %s433_s26, 32  ;;  %p7230_p11 = scmp.lt.s32.totalorder %s433_s26, %s433_s26 }
  0x18   : > { %s9222_s28 = scalar_select %p7572_p3, 1, 0 }
  0x19   : > { %p7113_p5 = pneg %p7572_p3  ;;  %p7223_p8 = scmp.ne.s32.totalorder %s433_s26, %s7222_s20 }
  0x1a   : > { %p7231_p12 = scmp.lt.s32.totalorder %s7222_s20, %s7222_s20 }
  0x1b   : > { %p7583_p6 = pnand %p7113_p5, %p9198_p1 }
  0x1c   : > { %p7232_p13 = por %p7231_p12, %p7230_p11 }
  0x1d   : > { %p7591_p7 = pneg %p7583_p6 }
  0x1f   : > { %p7225_p9 = pnand %p7223_p8, %p7591_p7 }
  0x21   : > { %p7226_p10 = pneg %p7225_p9 }
  0x23   : > { %p7233_p0 = pnand %p7232_p13, %p7226_p10 }
  0x25   : > { %7236 = shalt.err (!%p7233_p0)
}
  0x26   : > { %s9225_s5 = sld [smem:[#allocation29_spill]]  ;;  %s7248_s17 = scalar_lea.vmem %s7579_s30, 24576 }
  0x27   : > { %p7249_p2 = scmp.ne.s32.totalorder %s7579_s30, %s7248_s17  ;;  %p7256_p9 = scmp.lt.s32.totalorder %s7579_s30, %s7579_s30 }
  0x28   : > { %p7257_p11 = scmp.lt.s32.totalorder %s7248_s17, %s7248_s17 }
  0x29   : > { %p7251_p5 = pnand %p7249_p2, %p7591_p7 }
  0x2a   : > { %p7258_p10 = por %p7257_p11, %p7256_p9 }
  0x2b   : > { %p7252_p8 = pneg %p7251_p5 }
  0x2c   : > { %7116 = dma.hbm_to_vmem [thread:$0]  (!%p7583_p6), %s9225_s5, 32, %s433_s26, [#allocation7]  }
  0x2d   : > { %p7259_p12 = pnand %p7258_p10, %p7252_p8 }
  0x2f   : > { %7262 = shalt.err (!%p7259_p12)
}
  0x30   : > { %s9194_s20 = smov 128   ;;  %s9196_s25 = smov 8  }
  0x31   : > { %s9226_s8 = sld [smem:[#allocation31_spill]]  ;;  %s7274_s17 = scalar_lea.vmem %s7587_s18, 32 }
  0x32   : > { %p7275_p13 = scmp.ne.s32.totalorder %s7587_s18, %s7274_s17  ;;  %p7282_p5 = scmp.lt.s32.totalorder %s7587_s18, %s7587_s18 }
  0x33   : > { %p7283_p8 = scmp.lt.s32.totalorder %s7274_s17, %s7274_s17 }
  0x34   : > { %p7277_p0 = pnand %p7275_p13, %p7591_p7 }
  0x35   : > { %p7284_p9 = por %p7283_p8, %p7282_p5 }
  0x36   : > { %p7278_p2 = pneg %p7277_p0 }
  0x37   : > { %7122 = dma.hbm_to_vmem [thread:$0]  (!%p7583_p6), %s9226_s8, 24576, %s7579_s30, [#allocation10], %s9194_s20, %s9194_s20, %s9196_s25  }
  0x38   : > { %p7285_p11 = pnand %p7284_p9, %p7278_p2 }
  0x3a   : > { %7288 = shalt.err (!%p7285_p11)
}
  0x3b   : > { %s9227_s7 = sld [smem:[#allocation30_spill]]  ;;  %s7452_s30 = smov [#allocation11]  }
  0x3c   : > { %s470_s26 = sshll.u32 %s7452_s30, 4  ;;  %s7453_s29 = smov [#allocation12]   ;;  %s471_s26 = int_to_ptr.vmem [resolvable:$true] %s470_s26 }
  0x3d   : > { %s489_s20 = sshll.u32 %s7453_s29, 4  ;;  %s7300_s25 = scalar_lea.vmem %s471_s26, 64  ;;  %s490_s20 = int_to_ptr.vmem [resolvable:$true] %s489_s20 }
  0x3e   : > { %p7301_p10 = scmp.ne.s32.totalorder %s471_s26, %s7300_s25  ;;  %p7308_p0 = scmp.lt.s32.totalorder %s471_s26, %s471_s26 }
  0x3f   : > { %p7309_p2 = scmp.lt.s32.totalorder %s7300_s25, %s7300_s25 }
  0x40   : > { %p7303_p12 = pnand %p7301_p10, %p7591_p7 }
  0x41   : > { %7119 = dma.hbm_to_vmem [thread:$0]  (!%p7583_p6), %s9227_s7, 32, %s7587_s18, [#allocation7]  }
  0x42   : > { %p7304_p13 = pneg %p7303_p12  ;;  %p7310_p5 = por %p7309_p2, %p7308_p0 }
  0x44   : > { %p7311_p8 = pnand %p7310_p5, %p7304_p13 }
  0x46   : > { %7314 = shalt.err (!%p7311_p8)
}
  0x47   : > { %s9228_s9 = sld [smem:[#allocation32_spill]]  ;;  %s7326_s18 = scalar_lea.vmem %s490_s20, 512 }
  0x48   : > { %p7327_p9 = scmp.ne.s32.totalorder %s490_s20, %s7326_s18  ;;  %p7334_p10 = scmp.lt.s32.totalorder %s490_s20, %s490_s20 }
  0x49   : > { %p7335_p12 = scmp.lt.s32.totalorder %s7326_s18, %s7326_s18 }
  0x4a   : > { %p7329_p11 = pnand %p7327_p9, %p7591_p7 }
  0x4b   : > { %p7336_p1 = por %p7335_p12, %p7334_p10 }
  0x4c   : > { %p7330_p4 = pneg %p7329_p11 }
  0x4d   : > { %7125 = dma.hbm_to_vmem [thread:$0]  (!%p7583_p6), %s9228_s9, 64, %s471_s26, [#allocation10]  }
  0x4e   : > { %p7337_p3 = pnand %p7336_p1, %p7330_p4 }
  0x50   : > { %7340 = shalt.err (!%p7337_p3)
}
  0x51   : > { %s9229_s25 = smov 8   ;;  %s9230_s17 = smov 128  }
  0x52   : > { %s9231_s13 = sld [smem:[#allocation33_spill]]  ;;  %s5306_s0 = sadd.s32 4294967294, %s7445_s24  }
  0x53   : > { %s7648_s19 = sadd.s32 1, %s7445_s24   ;;  %s42_s26 = sadd.s32 1, %s7441_s23 }
  0x54   : > { %9232 = sst [smem:[#allocation23_spill]] %s7648_s19  ;;  %s39_s5 = ssub.s32 %s7445_s24, %s7648_s19 }
  0x55   : > { %p49_p1 = scmp.ne.s32.totalorder %s7441_s23, %s7437_s22  ;;  %p40_p3 = scmp.eq.s32.totalorder %s39_s5, 0 }
  0x56   : > { %p50_p4 = scmp.eq.s32.totalorder %s7445_s24, 0  ;;  %p55_p7 = scmp.ne.s32.totalorder %s7437_s22, %s7433_s21 }
  0x57   : > { %p394_p13 = scmp.eq.s32.totalorder %s7567_s27, 1  ;;  %p9234_p2 = scmp.eq.s32.totalorder %s7567_s27, 0 }
  0x58   : > { %7128 = dma.hbm_to_vmem [thread:$0]  (!%p7583_p6), %s9231_s13, 512, %s490_s20, [#allocation13], %s9230_s17, %s9230_s17, %s9229_s25  }
  0x59   : > { %s7660_s16 = scalar_select %p40_p3, %s7441_s23, %s42_s26  }
  0x5a   : > { %p51_p0 = por %p50_p4, %p49_p1  ;;  %p7664_p5 = por %p9234_p2, %p55_p7 }
  0x5b   : > { %9233 = sst [smem:[#allocation24_spill]] %s7660_s16  ;;  %p7668_p6 = por %p394_p13, %p49_p1 }
  0x5c   : > { %s9235_s18 = scalar_select %p7664_p5, 1, 0 }
  0x5d   : > { %s9236_s20 = scalar_select %p7668_p6, 1, 0 }
  0x5e   : > { %p400_p8 = scmp.eq.s32.totalorder %s5306_s0, 1  ;;  %p7142_p9 = scmp.lt.s32.totalorder %s7445_s24, 2 }
  0x5f   : > { %s509_s30 = sand.u32 1, %s7441_s23   ;;  %s5536_s26 = sshll.u32 %s7445_s24, 9 }
  0x60   : > { %p7674_p11 = por %p400_p8, %p55_p7  ;;  %s5314_s5 = sshll.u32 %s509_s30, 5 }
  0x61   : > { %s9239_s9 = sld [smem:[#allocation28_spill]]  ;;  %s513_s16 = scalar_lea.vmem [#allocation3], %s5314_s5 }
  0x62   : > { %s9237_s29 = scalar_select %p7674_p11, 1, 0 }
  0x63   : > { %s520_s19 = sshll.u32 %s513_s16, 4  ;;  %p7684_p10 = pnand %p7142_p9, %p51_p0  ;;  %s7688_s19 = int_to_ptr.vmem [resolvable:$true] %s520_s19 }
  0x64   : > { %9238 = sst [smem:[#allocation25_spill]] %s9237_s29  ;;  %s7690_s23 = scalar_lea.sflag [#allocation4], %s509_s30 }
  0x65   : > { %p7343_p1 = pneg %p7684_p10 }
  0x67   : > { %s7682_s13 = scalar_lea.hbm %s9239_s9, %s5536_s26  ;;  %s7346_s5 = scalar_lea.hbm %s9239_s9, 1024 }
  0x68   : > { %s7341_s24 = scalar_lea.hbm %s7682_s13, 512  ;;  %p7347_p7 = scmp.lt.s32.totalorder %s7682_s13, %s9239_s9 }
  0x69   : > { %p7342_p12 = scmp.ne.s32.totalorder %s7682_s13, %s7341_s24  ;;  %p7348_p13 = scmp.lt.s32.totalorder %s7346_s5, %s7341_s24 }
  0x6b   : > { %p7344_p3 = pnand %p7343_p1, %p7342_p12  ;;  %p7349_p0 = por %p7348_p13, %p7347_p7 }
  0x6d   : > { %p7345_p4 = pneg %p7344_p3 }
  0x6f   : > { %p7350_p2 = pnand %p7349_p0, %p7345_p4 }
  0x71   : > { %7353 = shalt.err (!%p7350_p2)
}
  0x72   : > { %s7354_s30 = scalar_lea.vmem %s7688_s19, 512  ;;  %s7454_s29 = smov [#allocation3]  }
  0x73   : > { %p7355_p8 = scmp.ne.s32.totalorder %s7688_s19, %s7354_s30  ;;  %s7359_s21 = sshll.u32 %s7454_s29, 4  ;;  %s7360_s21 = int_to_ptr.vmem [resolvable:$false] %s7359_s21 }
  0x74   : > { %s7361_s7 = scalar_lea.vmem %s7360_s21, 1024  ;;  %p7362_p3 = scmp.lt.s32.totalorder %s7688_s19, %s7360_s21 }
  0x75   : > { %p7357_p9 = pnand %p7355_p8, %p7343_p1  ;;  %p7363_p11 = scmp.lt.s32.totalorder %s7361_s7, %s7354_s30 }
  0x77   : > { %p7358_p12 = pneg %p7357_p9  ;;  %p7364_p6 = por %p7363_p11, %p7362_p3 }
  0x79   : > { %p7365_p5 = pnand %p7364_p6, %p7358_p12 }
  0x7b   : > { %7368 = shalt.err (!%p7365_p5)
}
  0x7c   : > { %7132 = dma.hbm_to_vmem [thread:$0]  (!%p7684_p10), %s7682_s13, 512, %s7688_s19, %s7690_s23, %s9230_s17, %s9230_s17, %s9229_s25  }
  0x7d   : > { %p9241_p1 = scmp.ne.s32.totalorder %s9222_s28, 0 }
  0x7f   : > { %532 = sbr.rel (%p9241_p1) target bundleno = 3703 (0xe77), region = 84 }
  0x84   : > { %s7717_s24 = sand.u32 1, %s7437_s22   ;;  %p9242_p5 = scmp.ne.s32.totalorder %s9235_s18, 0 }
  0x85   : > { %s5318_s21 = sshll.u32 %s7717_s24, 5  ;;  %s535_s29 = scalar_lea.sflag [#allocation4], %s7717_s24 }
  0x86   : > { %s7723_s0 = scalar_lea.vmem [#allocation3], %s5318_s21 }
  0x87   : > { %7412 = dma.done.wait (%p9242_p5), %s535_s29, 512  }
  0x88   : > { %7414 = vsyncadd (%p9242_p5), %s535_s29, 4294966784  ;;  %p9243_p6 = scmp.eq.s32.totalorder %s7567_s27, 0 }
  0x8a   : > { %7416 = dma.done.wait (%p9243_p6), [#allocation7], 64   ;;  %p9244_p11 = pmov %p9243_p6 }
  0x8b   : > { %p9245_p10 = pmov %p9243_p6 }
  0x8c   : > { %7418 = vsyncadd (%p9244_p11), [#allocation7], 4294967232 }
  0x8d   : > { %7420 = dma.done.wait (%p9245_p10), [#allocation10], 24640   ;;  %p9246_p4 = pmov %p9243_p6 }
  0x8f   : > { %7422 = vsyncadd (%p9246_p4), [#allocation10], 4294942656  ;;  %p9247_p7 = pmov %p9246_p4 }
  0x90   : > { %p9248_p13 = pmov %p9246_p4 }
  0x91   : > { %7424 = dma.done.wait (%p9247_p7), [#allocation13], 512  }
  0x92   : > { %7426 = vsyncadd (%p9248_p13), [#allocation13], 4294966784  ;;  %v7455_v0 = vmov 0   ;;  %v637_v1 = vld [vmem:[%s9185_s10 + $0x78] sm:$0xff]  ;;  %v636_v3 = vld [vmem:[%s9185_s10 + $0x70] sm:$0xff]  ;;  %vm871_vm0 = vcmask 523264  }
  0x93   : > { %7193 = vset.pattern.permute.xlu0 %v7455_v0  ;;  %7194 = vset.pattern.permute.xlu1 %v7455_v0  ;;  %v5343_v2 = vld [vmem:[%s9185_s10 + $0xf8] sm:$0xff]  ;;  %v5342_v4 = vld [vmem:[%s9185_s10 + $0xf0] sm:$0xff]  ;;  %v635_v5 = vld [vmem:[%s9185_s10 + $0x68] sm:$0xff]  ;;  %vm811_vm1 = vcmask 1040384   ;;  %vm831_vm2 = vcmask 1046528   ;;  %vm7457_vm3 = vmmov 0  }
  0x94   : > { %6069 = vmatprep.subr.mxu0 %v637_v1  ;;  %6104 = vmatprep.subr.mxu1 %v5343_v2  ;;  %v5341_v6 = vld [vmem:[%s9185_s10 + $0xe8] sm:$0xff]  ;;  %v634_v7 = vld [vmem:[%s9185_s10 + $0x60] sm:$0xff]  ;;  %v633_v9 = vld [vmem:[%s9185_s10 + $0x58] sm:$0xff]  ;;  %vm2168_vm4 = vcmask 261120   ;;  %vm2653_vm5 = vcmask 64512   ;;  %vm4214_vm6 = vcmask 130048  }
  0x95   : > { %6070 = vmatpush3.msra.mxu0 %v637_v1  ;;  %6105 = vmatpush3.msra.mxu1 %v5343_v2  ;;  %v5340_v8 = vld [vmem:[%s9185_s10 + $0xe0] sm:$0xff]  ;;  %v5339_v10 = vld [vmem:[%s9185_s10 + $0xd8] sm:$0xff]  ;;  %v632_v11 = vld [vmem:[%s9185_s10 + $0x50] sm:$0xff]  ;;  %s606_s7 = scalar_lea.vmem [#allocation14], %s5318_s21  ;;  %s5537_s29 = sshll.u32 %s7567_s27, 9 }
  0x96   : > { %6071 = vmatprep.subr.mxu0 %v636_v3  ;;  %6106 = vmatprep.subr.mxu1 %v5342_v4  ;;  %v5338_v12 = vld [vmem:[%s9185_s10 + $0xd0] sm:$0xff]  ;;  %v631_v13 = vld [vmem:[%s9185_s10 + $0x48] sm:$0xff]  ;;  %v630_v15 = vld [vmem:[%s9185_s10 + $0x40] sm:$0xff]  ;;  %s5185_s13 = sshll.u32 %s606_s7, 4  ;;  %s9253_s25 = sld [smem:[#allocation34_spill]]  ;;  %s9130_s13 = int_to_ptr.vmem [resolvable:$true] %s5185_s13 }
  0x97   : > { %6072 = vmatpush3.msra.mxu0 %v636_v3  ;;  %6107 = vmatpush3.msra.mxu1 %v5342_v4  ;;  %v5337_v14 = vld [vmem:[%s9185_s10 + $0xc8] sm:$0xff]  ;;  %v5336_v16 = vld [vmem:[%s9185_s10 + $0xc0] sm:$0xff]  ;;  %v629_v17 = vld [vmem:[%s9185_s10 + $0x38] sm:$0xff]  ;;  %s5172_s27 = scalar_lea.sflag [#allocation5], %s7717_s24  ;;  %s7369_s21 = scalar_lea.vmem %s9130_s13, 512 }
  0x98   : > { %6073 = vmatprep.subr.mxu0 %v635_v5  ;;  %6108 = vmatprep.subr.mxu1 %v5341_v6  ;;  %v5335_v18 = vld [vmem:[%s9185_s10 + $0xb8] sm:$0xff]  ;;  %v628_v19 = vld [vmem:[%s9185_s10 + $0x30] sm:$0xff]  ;;  %v627_v21 = vld [vmem:[%s9185_s10 + $0x28] sm:$0xff]  ;;  %p7370_p0 = scmp.ne.s32.totalorder %s9130_s13, %s7369_s21  ;;  %p9254_p2 = scmp.ne.s32.totalorder %s9236_s20, 0 }
  0x99   : > { %6074 = vmatpush3.msra.mxu0 %v635_v5  ;;  %6109 = vmatpush3.msra.mxu1 %v5341_v6  ;;  %v5334_v20 = vld [vmem:[%s9185_s10 + $0xb0] sm:$0xff]  ;;  %v5333_v22 = vld [vmem:[%s9185_s10 + $0xa8] sm:$0xff]  ;;  %v626_v23 = vld [vmem:[%s9185_s10 + $0x20] sm:$0xff]  ;;  %s7458_s17 = smov [#allocation14]  }
  0x9a   : > { %6075 = vmatprep.subr.mxu0 %v634_v7  ;;  %6110 = vmatprep.subr.mxu1 %v5340_v8  ;;  %v5332_v24 = vld [vmem:[%s9185_s10 + $0xa0] sm:$0xff]  ;;  %v625_v25 = vld [vmem:[%s9185_s10 + $0x18] sm:$0xff]  ;;  %v624_v27 = vld [vmem:[%s9185_s10 + $0x10] sm:$0xff]  ;;  %p7371_p8 = pnand %p7370_p0, %p9254_p2  ;;  %s7373_s19 = sshll.u32 %s7458_s17, 4  ;;  %s7374_s19 = int_to_ptr.vmem [resolvable:$false] %s7373_s19 }
  0x9b   : > { %6076 = vmatpush3.msra.mxu0 %v634_v7  ;;  %6111 = vmatpush3.msra.mxu1 %v5340_v8  ;;  %v5331_v26 = vld [vmem:[%s9185_s10 + $0x98] sm:$0xff]  ;;  %v5330_v28 = vld [vmem:[%s9185_s10 + $0x90] sm:$0xff]  ;;  %v623_v31 = vld [vmem:[%s9185_s10 + $0x8] sm:$0xff]  ;;  %s7375_s18 = scalar_lea.vmem %s7374_s19, 1024  ;;  %p7376_p12 = scmp.lt.s32.totalorder %s9130_s13, %s7374_s19 }
  0x9c   : > { %6077 = vmatprep.subr.mxu0 %v633_v9  ;;  %6112 = vmatprep.subr.mxu1 %v5339_v10  ;;  %v613_v29 = vld [vmem:[%s7723_s0] ss:$2 sm:$0xff]  ;;  %v5326_v30 = vld [vmem:[%s7723_s0 + $0x1] ss:$2 sm:$0xff]  ;;  %v5329_v32 = vld [vmem:[%s9185_s10 + $0x88] sm:$0xff]  ;;  %p7372_p9 = pneg %p7371_p8  ;;  %p7377_p3 = scmp.lt.s32.totalorder %s7375_s18, %s7369_s21 }
  0x9d   : > { %6078 = vmatpush3.msra.mxu0 %v633_v9  ;;  %6113 = vmatpush3.msra.mxu1 %v5339_v10  ;;  %v5325_v33 = vld [vmem:[%s7723_s0 + $0x10] ss:$2 sm:$0xff]  ;;  %v5327_v34 = vld [vmem:[%s7723_s0 + $0x11] ss:$2 sm:$0xff]  ;;  %v620_v37 = vmax.f32 %v613_v29, %v5326_v30  ;;  %v7856_v43 = vld [vmem:[%s9179_s4 + $0x78] sm:$0xff] }
  0x9e   : > { %6079 = vmatprep.subr.mxu0 %v632_v11  ;;  %6114 = vmatprep.subr.mxu1 %v5338_v12  ;;  %v622_v35 = vld [vmem:[%s9185_s10] sm:$0xff]  ;;  %v621_v38 = vmax.f32 %v5325_v33, %v5327_v34  ;;  %v818_v41 = vld [vmem:[%s9177_s2 + $0x8] sm:$0xff]  ;;  %v7861_v44 = vld [vmem:[%s9179_s4 + $0x70] sm:$0xff]  ;;  %p7378_p1 = por %p7377_p3, %p7376_p12 }
  0x9f   : > { %6080 = vmatpush3.msra.mxu0 %v632_v11  ;;  %6115 = vmatpush3.msra.mxu1 %v5338_v12  ;;  %v5328_v36 = vld [vmem:[%s9185_s10 + $0x80] sm:$0xff]  ;;  %v5345_v42 = vld [vmem:[%s9177_s2 + $0x28] sm:$0xff]  ;;  %v5422_v46 = vld [vmem:[%s9178_s3 + $0x10] sm:$0xff] }
  0xa0   : > { %6081 = vmatprep.subr.mxu0 %v631_v13  ;;  %6116 = vmatprep.subr.mxu1 %v5337_v14  ;;  %v817_v39 = vld [vmem:[%s9177_s2] sm:$0xff]  ;;  %v7875_v47 = vld [vmem:[%s9179_s4 + $0x68] sm:$0xff]  ;;  %v7880_v48 = vld [vmem:[%s9179_s4 + $0x38] sm:$0xff]  ;;  %p7379_p5 = pnand %p7378_p1, %p7372_p9 }
  0xa1   : > { %6082 = vmatpush3.msra.mxu0 %v631_v13  ;;  %6117 = vmatpush3.msra.mxu1 %v5337_v14  ;;  %v5344_v40 = vld [vmem:[%s9177_s2 + $0x20] sm:$0xff]  ;;  %v7895_v50 = vld [vmem:[%s9179_s4 + $0x30] sm:$0xff]  ;;  %v7900_v51 = vld [vmem:[%s9179_s4 + $0x58] sm:$0xff] }
  0xa2   : > { %6083 = vmatprep.subr.mxu0 %v630_v15  ;;  %6118 = vmatprep.subr.mxu1 %v5336_v16  ;;  %v2141_v45 = vld [vmem:[%s9178_s3] sm:$0xff]  ;;  %v7905_v52 = vld [vmem:[%s9179_s4 + $0x28] sm:$0xff]  ;;  %v7915_v53 = vld [vmem:[%s9179_s4 + $0x50] sm:$0xff] }
  0xa3   : > { %6084 = vmatpush3.msra.mxu0 %v630_v15  ;;  %6119 = vmatpush3.msra.mxu1 %v5336_v16  ;;  %v7888_v49 = vld [vmem:[%s9179_s4 + $0x60] sm:$0xff]  ;;  %v3458_v55 = vld [vmem:[%s9176_s1 + $0x8] sm:$0xff]  ;;  %v3459_v58 = vld [vmem:[%s9176_s1 + $0x10] sm:$0xff] }
  0xa4   : > { %6085 = vmatprep.subr.mxu0 %v629_v17  ;;  %6120 = vmatprep.subr.mxu1 %v5335_v18  ;;  %v3457_v54 = vld [vmem:[%s9176_s1] sm:$0xff]  ;;  %v5512_v57 = vld [vmem:[%s9176_s1 + $0x48] sm:$0xff]  ;;  %v3460_v59 = vld [vmem:[%s9176_s1 + $0x18] sm:$0xff] }
  0xa5   : > { %6086 = vmatpush3.msra.mxu0 %v629_v17  ;;  %6121 = vmatpush3.msra.mxu1 %v5335_v18  ;;  %v5511_v56 = vld [vmem:[%s9176_s1 + $0x40] sm:$0xff]  ;;  %v5513_v60 = vld [vmem:[%s9176_s1 + $0x50] sm:$0xff]  ;;  %v5514_v61 = vld [vmem:[%s9176_s1 + $0x58] sm:$0xff] }
  0xa6   : > { %6087 = vmatprep.subr.mxu0 %v628_v19  ;;  %6122 = vmatprep.subr.mxu1 %v5334_v20  ;;  %v7949_v62 = vld [vmem:[%s9179_s4 + $0x48] sm:$0xff]  ;;  %v7954_v63 = vld [vmem:[%s9179_s4 + $0x20] sm:$0xff]  ;;  %v7968_v1 = vld [vmem:[%s9179_s4 + $0x18] sm:$0xff] }
  0xa7   : > { %6088 = vmatpush3.msra.mxu0 %v628_v19  ;;  %6123 = vmatpush3.msra.mxu1 %v5334_v20  ;;  %v7963_v0 = vld [vmem:[%s9179_s4 + $0x40] sm:$0xff]  ;;  %v7977_v2 = vld [vmem:[%s9179_s4 + $0x10] sm:$0xff]  ;;  %v7982_v3 = vld [vmem:[%s9179_s4 + $0xb8] sm:$0xff] }
  0xa8   : > { %6089 = vmatprep.subr.mxu0 %v627_v21  ;;  %6124 = vmatprep.subr.mxu1 %v5333_v22  ;;  %v7990_v4 = vld [vmem:[%s9179_s4 + $0x8] sm:$0xff]  ;;  %v7997_v5 = vld [vmem:[%s9179_s4] sm:$0xff]  ;;  %v8016_v17 = vld [vmem:[%s9179_s4 + $0xb0] sm:$0xff] }
  0xa9   : > { %6090 = vmatpush3.msra.mxu0 %v627_v21  ;;  %6125 = vmatpush3.msra.mxu1 %v5333_v22  ;;  %v8028_v20 = vld [vmem:[%s9179_s4 + $0xa8] sm:$0xff]  ;;  %v8058_v29 = vld [vmem:[%s9179_s4 + $0x90] sm:$0xff] }
  0xaa   : > { %6091 = vmatprep.subr.mxu0 %v626_v23  ;;  %6126 = vmatprep.subr.mxu1 %v5332_v24  ;;  %v8065_v30 = vld [vmem:[%s9179_s4 + $0x88] sm:$0xff] }
  0xab   : > { %6092 = vmatpush3.msra.mxu0 %v626_v23  ;;  %6127 = vmatpush3.msra.mxu1 %v5332_v24 }
  0xac   : > { %6093 = vmatprep.subr.mxu0 %v625_v25  ;;  %6128 = vmatprep.subr.mxu1 %v5331_v26 }
  0xad   : > { %6094 = vmatpush3.msra.mxu0 %v625_v25  ;;  %6129 = vmatpush3.msra.mxu1 %v5331_v26 }
  0xae   : > { %6095 = vmatprep.subr.mxu0 %v624_v27  ;;  %6130 = vmatprep.subr.mxu1 %v5330_v28 }
  0xaf   : > { %6096 = vmatpush3.msra.mxu0 %v624_v27  ;;  %6131 = vmatpush3.msra.mxu1 %v5330_v28  ;;  %v8041_v27 = vld [vmem:[%s9179_s4 + $0xa0] sm:$0xff]  ;;  %v8050_v28 = vld [vmem:[%s9179_s4 + $0x98] sm:$0xff] }
  0xb0   : > { %6097 = vmatprep.subr.mxu0 %v623_v31  ;;  %6132 = vmatprep.subr.mxu1 %v5329_v32 }
  0xb1   : > { %6098 = vmatpush3.msra.mxu0 %v623_v31  ;;  %6133 = vmatpush3.msra.mxu1 %v5329_v32  ;;  %v8072_v31 = vld [vmem:[%s9179_s4 + $0x80] sm:$0xff] }
  0xb2   : > { %6099 = vmatprep.subr.mxu0 %v622_v35  ;;  %6134 = vmatprep.subr.mxu1 %v5328_v36 }
  0xb3   : > { %6100 = vmatpush3.msra.mxu0 %v622_v35  ;;  %6101 = vmatprep.mubr.f32.mxu0 %v620_v37  ;;  %v8086_v35 = vld [vmem:[%s9179_s4 + $0x138] sm:$0xff] }
  0xb4   : > { %6135 = vmatpush3.msra.mxu1 %v5328_v36  ;;  %6136 = vmatprep.mubr.f32.mxu1 %v620_v37  ;;  %v8092_v36 = vld [vmem:[%s9179_s4 + $0x130] sm:$0xff]  ;;  %v8098_v37 = vld [vmem:[%s9179_s4 + $0x128] sm:$0xff] }
  0xb5   : > { %6102 = vmatmul.mubr.f32.vlgmr.msra.gmra.mxu0 %v621_v38  ;;  %6137 = vmatmul.mubr.f32.vlgmr.msra.gmra.mxu1 %v621_v38  ;;  %v8103_v38 = vld [vmem:[%s9179_s4 + $0xf8] sm:$0xff] }
  0xb6   : > { %821 = vperm.xlu0 %7193, %v817_v39   ;;  %844 = vperm.xlu1 %7194, %v5344_v40  }
  0xb7   : > { %6139 = vmatprep.subr.mxu0 %v7856_v43  ;;  %6158 = vmatprep.subr.mxu1 %v7880_v48 }
  0xb8   : > { %6140 = vmatpush3.msra.mxu0 %v7856_v43  ;;  %6159 = vmatpush3.msra.mxu1 %v7880_v48 }
  0xb9   : > { %6141 = vmatprep.subr.mxu0 %v7861_v44  ;;  %6160 = vmatprep.subr.mxu1 %v7895_v50 }
  0xba   : > { %826 = vperm.xlu0 %7193, %v818_v41   ;;  %849 = vperm.xlu1 %7194, %v5345_v42  }
  0xbb   : > { %6142 = vmatpush3.msra.mxu0 %v7861_v44  ;;  %6161 = vmatpush3.msra.mxu1 %v7895_v50 }
  0xbc   : > { %6143 = vmatprep.subr.mxu0 %v7875_v47  ;;  %6162 = vmatprep.subr.mxu1 %v7905_v52 }
  0xbd   : > { %6144 = vmatpush3.msra.mxu0 %v7875_v47  ;;  %6163 = vmatpush3.msra.mxu1 %v7905_v52 }
  0xbe   : > { %2144 = vperm.xlu0 %7193, %v2141_v45   ;;  %2155 = vperm.xlu1 %7194, %v5422_v46   ;;  %v8140_v45 = vld [vmem:[%s9179_s4 + $0xe8] sm:$0xff] }
  0xbf   : > { %6145 = vmatprep.subr.mxu0 %v7888_v49  ;;  %6164 = vmatprep.subr.mxu1 %v7954_v63  ;;  %v8149_v46 = vld [vmem:[%s9179_s4 + $0x108] sm:$0xff] }
  0xc0   : > { %6146 = vmatpush3.msra.mxu0 %v7888_v49  ;;  %6165 = vmatpush3.msra.mxu1 %v7954_v63 }
  0xc1   : > { %6147 = vmatprep.subr.mxu0 %v7900_v51  ;;  %6166 = vmatprep.subr.mxu1 %v7968_v1 }
  0xc2   : > { %2835 = vperm.xlu0 %7193, %v817_v39   ;;  %2840 = vperm.xlu1 %7194, %v818_v41   ;;  %v8111_v39 = vld [vmem:[%s9179_s4 + $0x120] sm:$0xff]  ;;  %v8126_v41 = vld [vmem:[%s9179_s4 + $0xf0] sm:$0xff] }
  0xc3   : > { %6148 = vmatpush3.msra.mxu0 %v7900_v51  ;;  %6167 = vmatpush3.msra.mxu1 %v7968_v1 }
  0xc4   : > { %6149 = vmatprep.subr.mxu0 %v7915_v53  ;;  %6168 = vmatprep.subr.mxu1 %v7977_v2 }
  0xc5   : > { %6150 = vmatpush3.msra.mxu0 %v7915_v53  ;;  %6169 = vmatpush3.msra.mxu1 %v7977_v2 }
  0xc6   : > { %2856 = vperm.xlu0 %7193, %v5344_v40   ;;  %2861 = vperm.xlu1 %7194, %v5345_v42   ;;  %v8121_v40 = vld [vmem:[%s9179_s4 + $0x118] sm:$0xff]  ;;  %v8135_v42 = vld [vmem:[%s9179_s4 + $0x110] sm:$0xff] }
  0xc7   : > { %6151 = vmatprep.subr.mxu0 %v7949_v62  ;;  %6170 = vmatprep.subr.mxu1 %v7990_v4 }
  0xc8   : > { %6152 = vmatpush3.msra.mxu0 %v7949_v62  ;;  %6171 = vmatpush3.msra.mxu1 %v7990_v4 }
  0xc9   : > { %6153 = vmatprep.subr.mxu0 %v7963_v0  ;;  %6172 = vmatprep.subr.mxu1 %v7997_v5 }
  0xca   : > { %3463 = vperm.xlu0 %7193, %v3457_v54   ;;  %3468 = vperm.xlu1 %7194, %v3458_v55   ;;  %v8154_v54 = vld [vmem:[%s9179_s4 + $0xe0] sm:$0xff] }
  0xcb   : > { %6154 = vmatpush3.msra.mxu0 %v7963_v0  ;;  %6173 = vmatpush3.msra.mxu1 %v7997_v5  ;;  %v8163_v55 = vld [vmem:[%s9179_s4 + $0x100] sm:$0xff] }
  0xcc   : > { %6177 = vmatprep.subr.mxu0 %v7982_v3  ;;  %6196 = vmatprep.subr.mxu1 %v8086_v35 }
  0xce   : > { %3505 = vperm.xlu0 %7193, %v5511_v56   ;;  %3510 = vperm.xlu1 %7194, %v5512_v57   ;;  %v8168_v56 = vld [vmem:[%s9179_s4 + $0xd8] sm:$0xff]  ;;  %v8177_v57 = vld [vmem:[%s9179_s4 + $0xd0] sm:$0xff] }
  0xd2   : > { %3473 = vperm.xlu0 %7193, %v3459_v58   ;;  %3478 = vperm.xlu1 %7194, %v3460_v59   ;;  %v8182_v58 = vld [vmem:[%s9179_s4 + $0x178] sm:$0xff]  ;;  %v8190_v59 = vld [vmem:[%s9179_s4 + $0xc8] sm:$0xff] }
  0xd3   : > { %9249 = vst [vmem:[#allocation26_spill] sm:$0xff] %v8190_v59 }
  0xd6   : > { %3515 = vperm.xlu0 %7193, %v5513_v60   ;;  %3520 = vperm.xlu1 %7194, %v5514_v61   ;;  %v8197_v60 = vld [vmem:[%s9179_s4 + $0xc0] sm:$0xff] }
  0xd7   : > { %9250 = vst [vmem:[#allocation27_spill] sm:$0xff] %v8197_v60 }
 0x131   : > { %v8001_v8 = vpop.permute.xlu0 %821  ;;  %v8020_v18 = vpop.permute.xlu1 %844 }
 0x135   : > { %v8022_v19 = vpop.permute.xlu0 %826  ;;  %v8076_v33 = vpop.permute.xlu1 %849 }
 0x175   : > { %v6103_v6 = vpop.f32.mrf.mxu0  ;;  %v6138_v7 = vpop.f32.mrf.mxu1 }
 0x176   : > { %v8003_v9 = vmax.f32 %v6103_v6, %v6138_v7 }
 0x177   : > { %v704_v10 = vpop.f32.mrf.mxu0  ;;  %v796_v11 = vpop.f32.mrf.mxu1 }
 0x178   : > { %v8005_v12 = vmax.f32 %v704_v10, %v796_v11  ;;  %v808_v13 = vrot.slane %v8003_v9, 7  ;;  %v833_v14 = vrot.slane %v8003_v9, 1 }
 0x17a   : > { %v812_v15 = vrot.slane %v8005_v12, 7  ;;  %v832_v16 = vrot.slane %v8005_v12, 1  ;;  %6155 = vmatprep.mubr.msk.f32.mxu0 %vm871_vm0, %v8005_v12 }
 0x17b   : > { %6156 = vmatmul.mubr.msk.f32.vlgmr.msra.gmra.mxu0 %vm871_vm0, %v8003_v9 }
 0x17c   : > { %6178 = vmatpush3.msra.mxu0 %v7982_v3  ;;  %v816_v21 = vsel %vm811_vm1, %v808_v13, %v812_v15  ;;  %v834_v22 = vsel %vm831_vm2, %v832_v16, %v833_v14  ;;  %v813_v23 = vsel %vm811_vm1, %v812_v15, %v808_v13  ;;  %v838_v32 = vsel %vm831_vm2, %v833_v14, %v832_v16  ;;  %v8202_v14 = vld [vmem:[#allocation6] ss:$0 sm:$0xff] }
 0x17d   : > { %6179 = vmatprep.subr.mxu0 %v8016_v17  ;;  %v829_v24 = vmul.f32 %v8001_v8, %v816_v21  ;;  %v852_v25 = vmul.f32 %v8020_v18, %v834_v22  ;;  %v830_v26 = vmul.f32 %v8022_v19, %v813_v23  ;;  %v853_v34 = vmul.f32 %v8076_v33, %v838_v32 }
 0x17e   : > { %6180 = vmatpush3.msra.mxu0 %v8016_v17 }
 0x17f   : > { %6181 = vmatprep.subr.mxu0 %v8028_v20  ;;  %6174 = vmatprep.mubr.msk.f32.mxu1 %vm871_vm0, %v829_v24 }
 0x180   : > { %6182 = vmatpush3.msra.mxu0 %v8028_v20  ;;  %6193 = vmatprep.mubr.msk.f32.mxu0 %vm871_vm0, %v852_v25 }
 0x181   : > { %6175 = vmatmul.mubr.msk.f32.vlgmr.msra.gmra.mxu1 %vm871_vm0, %v830_v26  ;;  %6183 = vmatprep.subr.mxu0 %v8041_v27 }
 0x182   : > { %6184 = vmatpush3.msra.mxu0 %v8041_v27  ;;  %6197 = vmatpush3.msra.mxu1 %v8086_v35 }
 0x183   : > { %6185 = vmatprep.subr.mxu0 %v8050_v28  ;;  %6198 = vmatprep.subr.mxu1 %v8092_v36 }
 0x184   : > { %6186 = vmatpush3.msra.mxu0 %v8050_v28  ;;  %6199 = vmatpush3.msra.mxu1 %v8092_v36 }
 0x185   : > { %6187 = vmatprep.subr.mxu0 %v8058_v29  ;;  %6200 = vmatprep.subr.mxu1 %v8098_v37 }
 0x186   : > { %6188 = vmatpush3.msra.mxu0 %v8058_v29  ;;  %6201 = vmatpush3.msra.mxu1 %v8098_v37 }
 0x187   : > { %6189 = vmatprep.subr.mxu0 %v8065_v30  ;;  %6202 = vmatprep.subr.mxu1 %v8111_v39 }
 0x188   : > { %6190 = vmatpush3.msra.mxu0 %v8065_v30  ;;  %6203 = vmatpush3.msra.mxu1 %v8111_v39 }
 0x189   : > { %6191 = vmatprep.subr.mxu0 %v8072_v31  ;;  %6204 = vmatprep.subr.mxu1 %v8121_v40 }
 0x18a   : > { %6192 = vmatpush3.msra.mxu0 %v8072_v31  ;;  %6205 = vmatpush3.msra.mxu1 %v8121_v40 }
 0x18b   : > { %6194 = vmatmul.mubr.msk.f32.vlgmr.msra.gmra.mxu0 %vm871_vm0, %v853_v34  ;;  %6215 = vmatprep.subr.mxu0 %v8103_v38 }
 0x18c   : > { %6216 = vmatpush3.msra.mxu0 %v8103_v38  ;;  %6206 = vmatprep.subr.mxu1 %v8135_v42 }
 0x18d   : > { %6217 = vmatprep.subr.mxu0 %v8126_v41  ;;  %6207 = vmatpush3.msra.mxu1 %v8135_v42 }
 0x18e   : > { %6218 = vmatpush3.msra.mxu0 %v8126_v41  ;;  %6208 = vmatprep.subr.mxu1 %v8149_v46 }
 0x18f   : > { %6219 = vmatprep.subr.mxu0 %v8140_v45  ;;  %6209 = vmatpush3.msra.mxu1 %v8149_v46 }
 0x190   : > { %6220 = vmatpush3.msra.mxu0 %v8140_v45  ;;  %6210 = vmatprep.subr.mxu1 %v8163_v55 }
 0x191   : > { %6221 = vmatprep.subr.mxu0 %v8154_v54  ;;  %6211 = vmatpush3.msra.mxu1 %v8163_v55 }
 0x192   : > { %6222 = vmatpush3.msra.mxu0 %v8154_v54  ;;  %6234 = vmatprep.subr.mxu1 %v8182_v58 }
 0x193   : > { %6223 = vmatprep.subr.mxu0 %v8168_v56 }
 0x194   : > { %6224 = vmatpush3.msra.mxu0 %v8168_v56 }
 0x195   : > { %6225 = vmatprep.subr.mxu0 %v8177_v57 }
 0x196   : > { %6226 = vmatpush3.msra.mxu0 %v8177_v57 }
 0x197   : > { %6227 = vmatprep.subr.mxu0 %v8190_v59 }
 0x198   : > { %6228 = vmatpush3.msra.mxu0 %v8190_v59 }
 0x199   : > { %6229 = vmatprep.subr.mxu0 %v8197_v60 }
 0x19a   : > { %6230 = vmatpush3.msra.mxu0 %v8197_v60 }
 0x19b   : > { %6253 = vmatprep.subr.mxu0 %v7856_v43 }
 0x23b   : > { %v6157_v61 = vpop.f32.mrf.mxu0 }
 0x23d   : > { %v942_v7 = vpop.f32.mrf.mxu0 }
 0x241   : > { %v6176_v6 = vpop.f32.mrf.mxu1 }
 0x242   : > { %v1029_v11 = vadd.f32 %v6176_v6, %v6157_v61  ;;  %v8210_v61 = vld [vmem:[%s9179_s4 + $0x170] sm:$0xff] }
 0x243   : > { %v1023_v10 = vpop.f32.mrf.mxu1 }
 0x244   : > { %v1024_v15 = vadd.f32 %v1023_v10, %v942_v7  ;;  %v8218_v7 = vld [vmem:[%s9179_s4 + $0x168] sm:$0xff] }
 0x24b   : > { %v6195_v13 = vpop.f32.mrf.mxu0 }
 0x24c   : > { %v1123_v16 = vadd.f32 %v6195_v13, %v1029_v11 }
 0x24d   : > { %v1113_v21 = vpop.f32.mrf.mxu0 }
 0x24e   : > { %v1130_v22 = vadd.f32 %v8202_v14, %v1123_v16  ;;  %v1122_v23 = vadd.f32 %v1113_v21, %v1024_v15  ;;  %v8230_v21 = vld [vmem:[%s9179_s4 + $0x160] sm:$0xff] }
 0x250   : > { %v1132_v24 = vmax.f32 %v1130_v22, 0.0  ;;  %v1129_v25 = vadd.f32 %v8202_v14, %v1122_v23  ;;  %v8247_v22 = vld [vmem:[%s9179_s4 + $0x150] sm:$0xff]  ;;  %v8256_v23 = vld [vmem:[%s9179_s4 + $0x148] sm:$0xff] }
 0x252   : > { %v1131_v26 = vmax.f32 %v1129_v25, 0.0  ;;  %v1134_v32 = vrot.slane %v1132_v24, 7  ;;  %v1145_v34 = vrot.slane %v1132_v24, 1 }
 0x254   : > { %v1137_v60 = vrot.slane %v1131_v26, 7  ;;  %v1144_v59 = vrot.slane %v1131_v26, 1  ;;  %6212 = vmatprep.mubr.msk.f32.mxu1 %vm871_vm0, %v1131_v26 }
 0x255   : > { %6213 = vmatmul.mubr.msk.f32.vlgmr.msra.gmra.mxu1 %vm871_vm0, %v1132_v24 }
 0x256   : > { %v1138_v6 = vsel %vm811_vm1, %v1137_v60, %v1134_v32  ;;  %6235 = vmatpush3.msra.mxu1 %v8182_v58  ;;  %v1141_v10 = vsel %vm811_vm1, %v1134_v32, %v1137_v60  ;;  %v1146_v11 = vsel %vm831_vm2, %v1144_v59, %v1145_v34  ;;  %v8239_v60 = vld [vmem:[%s9179_s4 + $0x158] sm:$0xff]  ;;  %v1150_v24 = vsel %vm831_vm2, %v1145_v34, %v1144_v59 }
 0x257   : > { %6236 = vmatprep.subr.mxu1 %v8210_v61  ;;  %v1142_v13 = vmul.f32 %v1141_v10, %v8001_v8  ;;  %v1151_v15 = vmul.f32 %v1146_v11, %v8020_v18  ;;  %v1143_v16 = vmul.f32 %v1138_v6, %v8022_v19 }
 0x258   : > { %6237 = vmatpush3.msra.mxu1 %v8210_v61 }
 0x259   : > { %6238 = vmatprep.subr.mxu1 %v8218_v7  ;;  %6231 = vmatprep.mubr.msk.f32.mxu0 %vm871_vm0, %v1142_v13 }
 0x25a   : > { %6239 = vmatpush3.msra.mxu1 %v8218_v7  ;;  %6250 = vmatprep.mubr.msk.f32.mxu1 %vm871_vm0, %v1151_v15 }
 0x25b   : > { %6232 = vmatmul.mubr.msk.f32.vlgmr.msra.gmra.mxu0 %vm871_vm0, %v1143_v16  ;;  %6240 = vmatprep.subr.mxu1 %v8230_v21 }
 0x25c   : > { %6241 = vmatpush3.msra.mxu1 %v8230_v21  ;;  %6254 = vmatpush3.msra.mxu0 %v7856_v43  ;;  %v8266_v43 = vld [vmem:[%s9179_s4 + $0x140] sm:$0xff] }
 0x25d   : > { %6242 = vmatprep.subr.mxu1 %v8239_v60  ;;  %6255 = vmatprep.subr.mxu0 %v7861_v44 }
 0x25e   : > { %6243 = vmatpush3.msra.mxu1 %v8239_v60  ;;  %6256 = vmatpush3.msra.mxu0 %v7861_v44  ;;  %v1152_v44 = vmul.f32 %v1150_v24, %v8076_v33 }
 0x25f   : > { %6244 = vmatprep.subr.mxu1 %v8247_v22  ;;  %6257 = vmatprep.subr.mxu0 %v7875_v47 }
 0x260   : > { %6245 = vmatpush3.msra.mxu1 %v8247_v22  ;;  %6258 = vmatpush3.msra.mxu0 %v7875_v47 }
 0x261   : > { %6246 = vmatprep.subr.mxu1 %v8256_v23  ;;  %6259 = vmatprep.subr.mxu0 %v7888_v49 }
 0x262   : > { %6247 = vmatpush3.msra.mxu1 %v8256_v23  ;;  %6260 = vmatpush3.msra.mxu0 %v7888_v49 }
 0x263   : > { %6248 = vmatprep.subr.mxu1 %v8266_v43  ;;  %6261 = vmatprep.subr.mxu0 %v7900_v51 }
 0x264   : > { %6249 = vmatpush3.msra.mxu1 %v8266_v43  ;;  %6262 = vmatpush3.msra.mxu0 %v7900_v51 }
 0x265   : > { %6251 = vmatmul.mubr.msk.f32.vlgmr.msra.gmra.mxu1 %vm871_vm0, %v1152_v44  ;;  %6272 = vmatprep.subr.mxu1 %v7880_v48 }
 0x266   : > { %6273 = vmatpush3.msra.mxu1 %v7880_v48  ;;  %6263 = vmatprep.subr.mxu0 %v7915_v53 }
 0x267   : > { %6274 = vmatprep.subr.mxu1 %v7895_v50  ;;  %6264 = vmatpush3.msra.mxu0 %v7915_v53  ;;  %v8303_v53 = vld [vmem:[#allocation6 + $0x1] ss:$0 sm:$0xff] }
 0x268   : > { %6275 = vmatpush3.msra.mxu1 %v7895_v50  ;;  %6265 = vmatprep.subr.mxu0 %v7949_v62 }
 0x269   : > { %6276 = vmatprep.subr.mxu1 %v7905_v52  ;;  %6266 = vmatpush3.msra.mxu0 %v7949_v62 }
 0x26a   : > { %6277 = vmatpush3.msra.mxu1 %v7905_v52  ;;  %6267 = vmatprep.subr.mxu0 %v7963_v0 }
 0x26b   : > { %6278 = vmatprep.subr.mxu1 %v7954_v63  ;;  %6268 = vmatpush3.msra.mxu0 %v7963_v0 }
 0x26c   : > { %6279 = vmatpush3.msra.mxu1 %v7954_v63  ;;  %6291 = vmatprep.subr.mxu0 %v7982_v3 }
 0x26d   : > { %6280 = vmatprep.subr.mxu1 %v7968_v1 }
 0x26e   : > { %6281 = vmatpush3.msra.mxu1 %v7968_v1 }
 0x26f   : > { %6282 = vmatprep.subr.mxu1 %v7977_v2 }
 0x270   : > { %6283 = vmatpush3.msra.mxu1 %v7977_v2 }
 0x271   : > { %6284 = vmatprep.subr.mxu1 %v7990_v4 }
 0x272   : > { %6285 = vmatpush3.msra.mxu1 %v7990_v4 }
 0x273   : > { %6286 = vmatprep.subr.mxu1 %v7997_v5 }
 0x274   : > { %6287 = vmatpush3.msra.mxu1 %v7997_v5 }
 0x275   : > { %6310 = vmatprep.subr.mxu1 %v8086_v35 }
 0x315   : > { %v6214_v47 = vpop.f32.mrf.mxu1 }
 0x317   : > { %v1241_v49 = vpop.f32.mrf.mxu1 }
 0x31b   : > { %v6233_v48 = vpop.f32.mrf.mxu0 }
 0x31c   : > { %v1328_v51 = vadd.f32 %v6233_v48, %v6214_v47 }
 0x31d   : > { %v1322_v50 = vpop.f32.mrf.mxu0 }
 0x31e   : > { %v1323_v62 = vadd.f32 %v1322_v50, %v1241_v49  ;;  %v5416_v50 = vld [vmem:[%s9186_s11 + $0x58] sm:$0xff] }
 0x325   : > { %v6252_v52 = vpop.f32.mrf.mxu1 }
 0x326   : > { %v1422_v63 = vadd.f32 %v6252_v52, %v1328_v51  ;;  %v1978_v51 = vld [vmem:[%s9186_s11 + $0x10] sm:$0xff] }
 0x327   : > { %v1412_v0 = vpop.f32.mrf.mxu1  ;;  %v5415_v52 = vld [vmem:[%s9186_s11 + $0x50] sm:$0xff] }
 0x328   : > { %v1429_v1 = vadd.f32 %v8303_v53, %v1422_v63  ;;  %v1421_v2 = vadd.f32 %v1412_v0, %v1323_v62  ;;  %v1977_v62 = vld [vmem:[%s9186_s11 + $0x8] sm:$0xff]  ;;  %v1976_v0 = vld [vmem:[%s9186_s11] sm:$0xff] }
 0x329   : > { %v5414_v63 = vld [vmem:[%s9186_s11 + $0x48] sm:$0xff] }
 0x32a   : > { %v1431_v4 = vadd.f32 %v1429_v1, %v8003_v9  ;;  %v1428_v5 = vadd.f32 %v8303_v53, %v1421_v2  ;;  %v5413_v1 = vld [vmem:[%s9186_s11 + $0x40] sm:$0xff] }
 0x32c   : > { %v8308_v59 = vmax.f32 %v1431_v4, 0.0  ;;  %v1430_v25 = vadd.f32 %v1428_v5, %v8005_v12 }
 0x32e   : > { %v8311_v26 = vmax.f32 %v1430_v25, 0.0  ;;  %v1435_v32 = vrot.slane %v8308_v59, 7  ;;  %v1446_v10 = vrot.slane %v8308_v59, 1 }
 0x330   : > { %6269 = vmatprep.mubr.msk.f32.mxu0 %vm871_vm0, %v8311_v26  ;;  %v1438_v34 = vrot.slane %v8311_v26, 7  ;;  %v1445_v6 = vrot.slane %v8311_v26, 1 }
 0x331   : > { %6270 = vmatmul.mubr.msk.f32.vlgmr.msra.gmra.mxu0 %vm871_vm0, %v8308_v59 }
 0x332   : > { %6292 = vmatpush3.msra.mxu0 %v7982_v3  ;;  %v1442_v9 = vsel %vm811_vm1, %v1435_v32, %v1438_v34  ;;  %v1447_v12 = vsel %vm831_vm2, %v1445_v6, %v1446_v10  ;;  %v1439_v11 = vsel %vm811_vm1, %v1438_v34, %v1435_v32  ;;  %v1451_v3 = vsel %vm831_vm2, %v1446_v10, %v1445_v6 }
 0x333   : > { %6293 = vmatprep.subr.mxu0 %v8016_v17  ;;  %v1443_v13 = vmul.f32 %v1442_v9, %v8001_v8  ;;  %v1452_v15 = vmul.f32 %v1447_v12, %v8020_v18  ;;  %v1444_v16 = vmul.f32 %v1439_v11, %v8022_v19 }
 0x334   : > { %6294 = vmatpush3.msra.mxu0 %v8016_v17  ;;  %v1453_v17 = vmul.f32 %v1451_v3, %v8076_v33 }
 0x335   : > { %6295 = vmatprep.subr.mxu0 %v8028_v20  ;;  %6288 = vmatprep.mubr.msk.f32.mxu1 %vm871_vm0, %v1443_v13 }
 0x336   : > { %6296 = vmatpush3.msra.mxu0 %v8028_v20  ;;  %6307 = vmatprep.mubr.msk.f32.mxu0 %vm871_vm0, %v1452_v15  ;;  %v9251_v20 = vld [vmem:[#allocation26_spill] sm:$0xff] }
 0x337   : > { %6289 = vmatmul.mubr.msk.f32.vlgmr.msra.gmra.mxu1 %vm871_vm0, %v1444_v16  ;;  %6297 = vmatprep.subr.mxu0 %v8041_v27 }
 0x338   : > { %6298 = vmatpush3.msra.mxu0 %v8041_v27  ;;  %6311 = vmatpush3.msra.mxu1 %v8086_v35  ;;  %v9252_v27 = vld [vmem:[#allocation27_spill] sm:$0xff] }
 0x339   : > { %6299 = vmatprep.subr.mxu0 %v8050_v28  ;;  %6312 = vmatprep.subr.mxu1 %v8092_v36 }
 0x33a   : > { %6300 = vmatpush3.msra.mxu0 %v8050_v28  ;;  %6313 = vmatpush3.msra.mxu1 %v8092_v36 }
 0x33b   : > { %6301 = vmatprep.subr.mxu0 %v8058_v29  ;;  %6314 = vmatprep.subr.mxu1 %v8098_v37 }
 0x33c   : > { %6302 = vmatpush3.msra.mxu0 %v8058_v29  ;;  %6315 = vmatpush3.msra.mxu1 %v8098_v37 }
 0x33d   : > { %6303 = vmatprep.subr.mxu0 %v8065_v30  ;;  %6316 = vmatprep.subr.mxu1 %v8111_v39 }
 0x33e   : > { %6304 = vmatpush3.msra.mxu0 %v8065_v30  ;;  %6317 = vmatpush3.msra.mxu1 %v8111_v39 }
 0x33f   : > { %6305 = vmatprep.subr.mxu0 %v8072_v31  ;;  %6318 = vmatprep.subr.mxu1 %v8121_v40 }
 0x340   : > { %6306 = vmatpush3.msra.mxu0 %v8072_v31  ;;  %6319 = vmatpush3.msra.mxu1 %v8121_v40 }
 0x341   : > { %6308 = vmatmul.mubr.msk.f32.vlgmr.msra.gmra.mxu0 %vm871_vm0, %v1453_v17  ;;  %6329 = vmatprep.subr.mxu0 %v8103_v38 }
 0x342   : > { %6330 = vmatpush3.msra.mxu0 %v8103_v38  ;;  %6320 = vmatprep.subr.mxu1 %v8135_v42 }
 0x343   : > { %6331 = vmatprep.subr.mxu0 %v8126_v41  ;;  %6321 = vmatpush3.msra.mxu1 %v8135_v42 }
 0x344   : > { %6332 = vmatpush3.msra.mxu0 %v8126_v41  ;;  %6322 = vmatprep.subr.mxu1 %v8149_v46 }
 0x345   : > { %6333 = vmatprep.subr.mxu0 %v8140_v45  ;;  %6323 = vmatpush3.msra.mxu1 %v8149_v46 }
 0x346   : > { %6334 = vmatpush3.msra.mxu0 %v8140_v45  ;;  %6324 = vmatprep.subr.mxu1 %v8163_v55 }
 0x347   : > { %6335 = vmatprep.subr.mxu0 %v8154_v54  ;;  %6325 = vmatpush3.msra.mxu1 %v8163_v55 }
 0x348   : > { %6336 = vmatpush3.msra.mxu0 %v8154_v54  ;;  %6348 = vmatprep.subr.mxu1 %v8182_v58 }
 0x349   : > { %6337 = vmatprep.subr.mxu0 %v8168_v56 }
 0x34a   : > { %6338 = vmatpush3.msra.mxu0 %v8168_v56 }
 0x34b   : > { %6339 = vmatprep.subr.mxu0 %v8177_v57 }
 0x34c   : > { %6340 = vmatpush3.msra.mxu0 %v8177_v57 }
 0x34d   : > { %6341 = vmatprep.subr.mxu0 %v9251_v20 }
 0x34e   : > { %6342 = vmatpush3.msra.mxu0 %v9251_v20 }
 0x34f   : > { %6343 = vmatprep.subr.mxu0 %v9252_v27 }
 0x350   : > { %6344 = vmatpush3.msra.mxu0 %v9252_v27 }
 0x3f1   : > { %v6271_v28 = vpop.f32.mrf.mxu0 }
 0x3f3   : > { %v1524_v30 = vpop.f32.mrf.mxu0 }
 0x3f7   : > { %v6290_v29 = vpop.f32.mrf.mxu1 }
 0x3f8   : > { %v1611_v35 = vadd.f32 %v6290_v29, %v6271_v28  ;;  %v5425_v29 = vld [vmem:[%s9181_s6 + $0x30] sm:$0xff] }
 0x3f9   : > { %v1605_v31 = vpop.f32.mrf.mxu1 }
 0x3fa   : > { %v1606_v37 = vadd.f32 %v1605_v31, %v1524_v30  ;;  %v5424_v30 = vld [vmem:[%s9181_s6 + $0x28] sm:$0xff]  ;;  %v5423_v31 = vld [vmem:[%s9181_s6 + $0x20] sm:$0xff] }
 0x401   : > { %v6309_v36 = vpop.f32.mrf.mxu0 }
 0x402   : > { %v1696_v38 = vadd.f32 %v6309_v36, %v1611_v35 }
 0x403   : > { %v1686_v39 = vpop.f32.mrf.mxu0 }
 0x404   : > { %v1698_v40 = vadd.f32 %v8202_v14, %v1696_v38  ;;  %v1695_v41 = vadd.f32 %v1686_v39, %v1606_v37  ;;  %v2162_v38 = vld [vmem:[%s9181_s6 + $0x18] sm:$0xff] }
 0x406   : > { %v1700_v42 = vmax.f32 %v1698_v40, 0.0  ;;  %v1697_v45 = vadd.f32 %v8202_v14, %v1695_v41  ;;  %v2161_v41 = vld [vmem:[%s9181_s6 + $0x10] sm:$0xff] }
 0x408   : > { %v1699_v46 = vmax.f32 %v1697_v45, 0.0  ;;  %v1702_v54 = vrot.slane %v1700_v42, 7  ;;  %v1713_v55 = vrot.slane %v1700_v42, 1  ;;  %v2160_v45 = vld [vmem:[%s9181_s6 + $0x8] sm:$0xff] }
 0x40a   : > { %v1705_v56 = vrot.slane %v1699_v46, 7  ;;  %v1712_v57 = vrot.slane %v1699_v46, 1  ;;  %6326 = vmatprep.mubr.msk.f32.mxu1 %vm871_vm0, %v1699_v46  ;;  %v2159_v46 = vld [vmem:[%s9181_s6] sm:$0xff] }
 0x40b   : > { %6327 = vmatmul.mubr.msk.f32.vlgmr.msra.gmra.mxu1 %vm871_vm0, %v1700_v42 }
 0x40c   : > { %v1706_v24 = vsel %vm811_vm1, %v1705_v56, %v1702_v54  ;;  %6349 = vmatpush3.msra.mxu1 %v8182_v58  ;;  %v1709_v44 = vsel %vm811_vm1, %v1702_v54, %v1705_v56  ;;  %v1714_v47 = vsel %vm831_vm2, %v1712_v57, %v1713_v55  ;;  %v1983_v58 = vld [vmem:[%s9186_s11 + $0x38] sm:$0xff]  ;;  %v8540_v54 = vpop.permute.xlu0 %2144 }
 0x40d   : > { %6350 = vmatprep.subr.mxu1 %v8210_v61  ;;  %v1710_v14 = vmul.f32 %v1709_v44, %v8001_v8  ;;  %v1719_v48 = vmul.f32 %v1714_v47, %v8020_v18  ;;  %v1711_v49 = vmul.f32 %v1706_v24, %v8022_v19  ;;  %v1718_v8 = vsel %vm831_vm2, %v1713_v55, %v1712_v57  ;;  %v5432_v56 = vld [vmem:[%s9181_s6 + $0x58] sm:$0xff]  ;;  %v5431_v57 = vld [vmem:[%s9181_s6 + $0x50] sm:$0xff]  ;;  %v5430_v44 = vld [vmem:[%s9181_s6 + $0x48] sm:$0xff] }
 0x40e   : > { %6351 = vmatpush3.msra.mxu1 %v8210_v61  ;;  %v1720_v18 = vmul.f32 %v1718_v8, %v8076_v33  ;;  %v7456_v19 = vmov 0.0   ;;  %v5420_v61 = vld [vmem:[%s9186_s11 + $0x78] sm:$0xff]  ;;  %v1982_v33 = vld [vmem:[%s9186_s11 + $0x30] sm:$0xff]  ;;  %v5429_v47 = vld [vmem:[%s9181_s6 + $0x40] sm:$0xff] }
 0x40f   : > { %6352 = vmatprep.subr.mxu1 %v8218_v7  ;;  %6345 = vmatprep.mubr.msk.f32.mxu0 %vm871_vm0, %v1710_v14  ;;  %v2156_v14 = vpop.permute.xlu1 %2155  ;;  %v5441_v8 = vld [vmem:[%s9181_s6 + $0x90] sm:$0xff] }
 0x410   : > { %6353 = vmatpush3.msra.mxu1 %v8218_v7  ;;  %6364 = vmatprep.mubr.msk.f32.mxu1 %vm871_vm0, %v1719_v48  ;;  %v5419_v7 = vld [vmem:[%s9186_s11 + $0x70] sm:$0xff] }
 0x411   : > { %6346 = vmatmul.mubr.msk.f32.vlgmr.msra.gmra.mxu0 %vm871_vm0, %v1711_v49  ;;  %6354 = vmatprep.subr.mxu1 %v8230_v21  ;;  %v5442_v49 = vld [vmem:[%s9181_s6 + $0x98] sm:$0xff] }
 0x412   : > { %6355 = vmatpush3.msra.mxu1 %v8230_v21  ;;  %6367 = vmatprep.subr.mxu0 %v7456_v19  ;;  %v1981_v21 = vld [vmem:[%s9186_s11 + $0x28] sm:$0xff] }
 0x413   : > { %6356 = vmatprep.subr.mxu1 %v8239_v60  ;;  %6368 = vmatpush3.msra.mxu0 %v1983_v58  ;;  %v5438_v58 = vld [vmem:[%s9181_s6 + $0x78] sm:$0xff] }
 0x414   : > { %6357 = vmatpush3.msra.mxu1 %v8239_v60  ;;  %6369 = vmatprep.subr.mxu0 %v7456_v19  ;;  %v5418_v60 = vld [vmem:[%s9186_s11 + $0x68] sm:$0xff] }
 0x415   : > { %6358 = vmatprep.subr.mxu1 %v8247_v22  ;;  %6370 = vmatpush3.msra.mxu0 %v1982_v33  ;;  %v5437_v33 = vld [vmem:[%s9181_s6 + $0x70] sm:$0xff] }
 0x416   : > { %6359 = vmatpush3.msra.mxu1 %v8247_v22  ;;  %6371 = vmatprep.subr.mxu0 %v7456_v19  ;;  %v1980_v22 = vld [vmem:[%s9186_s11 + $0x20] sm:$0xff] }
 0x417   : > { %6360 = vmatprep.subr.mxu1 %v8256_v23  ;;  %6372 = vmatpush3.msra.mxu0 %v1981_v21  ;;  %v5435_v21 = vld [vmem:[%s9181_s6 + $0x60] sm:$0xff] }
 0x418   : > { %6361 = vmatpush3.msra.mxu1 %v8256_v23  ;;  %6373 = vmatprep.subr.mxu0 %v7456_v19  ;;  %v5417_v23 = vld [vmem:[%s9186_s11 + $0x60] sm:$0xff] }
 0x419   : > { %6362 = vmatprep.subr.mxu1 %v8266_v43  ;;  %6374 = vmatpush3.msra.mxu0 %v1980_v22 }
 0x41a   : > { %6363 = vmatpush3.msra.mxu1 %v8266_v43  ;;  %v1979_v43 = vld [vmem:[%s9186_s11 + $0x18] sm:$0xff]  ;;  %6375 = vmatprep.subr.mxu0 %v7456_v19 }
 0x41b   : > { %6365 = vmatmul.mubr.msk.f32.vlgmr.msra.gmra.mxu1 %vm871_vm0, %v1720_v18  ;;  %6386 = vmatprep.subr.mxu1 %v7456_v19  ;;  %v5440_v18 = vld [vmem:[%s9181_s6 + $0x88] sm:$0xff] }
 0x41c   : > { %6387 = vmatpush3.msra.mxu1 %v5420_v61  ;;  %6376 = vmatpush3.msra.mxu0 %v1979_v43  ;;  %v5439_v61 = vld [vmem:[%s9181_s6 + $0x80] sm:$0xff] }
 0x41d   : > { %6388 = vmatprep.subr.mxu1 %v7456_v19  ;;  %6377 = vmatprep.subr.mxu0 %v7456_v19 }
 0x41e   : > { %6389 = vmatpush3.msra.mxu1 %v5419_v7  ;;  %6378 = vmatpush3.msra.mxu0 %v1978_v51  ;;  %v5436_v7 = vld [vmem:[%s9181_s6 + $0x68] sm:$0xff] }
 0x41f   : > { %6390 = vmatprep.subr.mxu1 %v7456_v19  ;;  %6379 = vmatprep.subr.mxu0 %v7456_v19 }
 0x420   : > { %6391 = vmatpush3.msra.mxu1 %v5418_v60  ;;  %6380 = vmatpush3.msra.mxu0 %v1977_v62 }
 0x421   : > { %6392 = vmatprep.subr.mxu1 %v7456_v19  ;;  %6381 = vmatprep.subr.mxu0 %v7456_v19 }
 0x422   : > { %6393 = vmatpush3.msra.mxu1 %v5417_v23  ;;  %6382 = vmatpush3.msra.mxu0 %v1976_v0 }
 0x423   : > { %6394 = vmatprep.subr.mxu1 %v7456_v19  ;;  %6383 = vmatprep.mubr.msk.f32.mxu0 %vm7457_vm3, %v7456_v19 }
 0x424   : > { %6395 = vmatpush3.msra.mxu1 %v5416_v50  ;;  %6402 = vmatprep.mubr.msk.f32.mxu1 %vm7457_vm3, %v7456_v19 }
 0x425   : > { %6396 = vmatprep.subr.mxu1 %v7456_v19  ;;  %6405 = vmatprep.subr.mxu0 %v7456_v19 }
 0x426   : > { %6397 = vmatpush3.msra.mxu1 %v5415_v52  ;;  %v5434_v52 = vld [vmem:[#allocation8] ss:$0 sm:$0xff] }
 0x427   : > { %6398 = vmatprep.subr.mxu1 %v7456_v19 }
 0x428   : > { %6399 = vmatpush3.msra.mxu1 %v5414_v63 }
 0x429   : > { %6400 = vmatprep.subr.mxu1 %v7456_v19 }
 0x42a   : > { %6401 = vmatpush3.msra.mxu1 %v5413_v1 }
 0x42b   : > { %6438 = vmatprep.subr.mxu1 %v7456_v19 }
 0x4cb   : > { %v6328_v2 = vpop.f32.mrf.mxu1 }
 0x4cd   : > { %v1791_v5 = vpop.f32.mrf.mxu1 }
 0x4d1   : > { %v6347_v4 = vpop.f32.mrf.mxu0 }
 0x4d2   : > { %v1878_v32 = vadd.f32 %v6347_v4, %v6328_v2  ;;  %v5448_v2 = vld [vmem:[%s9181_s6 + $0xb8] sm:$0xff] }
 0x4d3   : > { %v1872_v25 = vpop.f32.mrf.mxu0 }
 0x4d4   : > { %v1873_v6 = vadd.f32 %v1872_v25, %v1791_v5  ;;  %v5447_v5 = vld [vmem:[%s9181_s6 + $0xb0] sm:$0xff] }
 0x4db   : > { %v6366_v34 = vpop.f32.mrf.mxu1 }
 0x4dc   : > { %v1963_v10 = vadd.f32 %v6366_v34, %v1878_v32  ;;  %v5446_v34 = vld [vmem:[%s9181_s6 + $0xa8] sm:$0xff] }
 0x4dd   : > { %v1953_v9 = vpop.f32.mrf.mxu1 }
 0x4de   : > { %v1965_v12 = vadd.f32 %v8303_v53, %v1963_v10  ;;  %v1962_v11 = vadd.f32 %v1953_v9, %v1873_v6  ;;  %v5445_v6 = vld [vmem:[%s9181_s6 + $0xa0] sm:$0xff] }
 0x4df   : > { %v2651_v9 = vld [vmem:[%s9187_s12] sm:$0xff] }
 0x4e0   : > { %v8483_v13 = vadd.f32 %v1965_v12, %v8308_v59  ;;  %v1964_v15 = vadd.f32 %v8303_v53, %v1962_v11  ;;  %v5426_v53 = vld [vmem:[%s9181_s6 + $0x38] sm:$0xff]  ;;  %v2738_v12 = vld [vmem:[#allocation12 + $0x18] sm:$0xff]  ;;  %v2737_v11 = vld [vmem:[#allocation12 + $0x10] sm:$0xff] }
 0x4e2   : > { %v1969_v16 = vmax.f32 %v8483_v13, 0.0  ;;  %v8488_v3 = vadd.f32 %v1964_v15, %v8311_v26  ;;  %v5475_v13 = vld [vmem:[%s9179_s4 + $0xb0] sm:$0xff] }
 0x4e4   : > { %1971 = vst.msk [vmem:[#allocation2 + $0x8] sm:$0xff] %vm871_vm0, %v1969_v16  ;;  %v1968_v17 = vmax.f32 %v8488_v3, 0.0  ;;  %v5474_v3 = vld [vmem:[%s9179_s4 + $0xa8] sm:$0xff] }
 0x4e6   : > { %1970 = vst.msk [vmem:[#allocation2] sm:$0xff] %vm871_vm0, %v1968_v17 }
 0x4ed   : > { %v1972_v20 = vld [vmem:[#allocation2] ss:$2 sm:$0xff]  ;;  %v1974_v27 = vld [vmem:[#allocation2 + $0x1] ss:$2 sm:$0xff] }
 0x4ee   : > { %v1975_v28 = vmax.f32 %v1972_v20, %v1974_v27 }
 0x4f0   : > { %6384 = vmatmul.mubr.msk.f32.vlgmr.msra.gmra.mxu0 %vm871_vm0, %v1975_v28  ;;  %6403 = vmatmul.mubr.msk.f32.vlgmr.msra.gmra.mxu1 %vm871_vm0, %v1975_v28 }
 0x4f1   : > { %6406 = vmatpush3.msra.mxu0 %v5426_v53  ;;  %6413 = vmatprep.mubr.msk.f32.mxu0 %vm7457_vm3, %v7456_v19 }
 0x4f2   : > { %6407 = vmatprep.subr.mxu0 %v7456_v19  ;;  %6446 = vmatprep.mubr.msk.f32.mxu1 %vm7457_vm3, %v7456_v19 }
 0x4f3   : > { %6408 = vmatpush3.msra.mxu0 %v5425_v29  ;;  %6439 = vmatpush3.msra.mxu1 %v5442_v49  ;;  %v5450_v29 = vld [vmem:[#allocation8 + $0x1] ss:$0 sm:$0xff]  ;;  %v5457_v49 = vld [vmem:[%s9179_s4 + $0x40] sm:$0xff] }
 0x4f4   : > { %6409 = vmatprep.subr.mxu0 %v7456_v19  ;;  %6440 = vmatprep.subr.mxu1 %v7456_v19 }
 0x4f5   : > { %6410 = vmatpush3.msra.mxu0 %v5424_v30  ;;  %6441 = vmatpush3.msra.mxu1 %v5441_v8  ;;  %v2869_v8 = vld [vmem:[%s9179_s4 + $0x18] sm:$0xff] }
 0x4f6   : > { %6411 = vmatprep.subr.mxu0 %v7456_v19  ;;  %6442 = vmatprep.subr.mxu1 %v7456_v19 }
 0x4f7   : > { %6412 = vmatpush3.msra.mxu0 %v5423_v31  ;;  %6443 = vmatpush3.msra.mxu1 %v5440_v18  ;;  %v2868_v18 = vld [vmem:[%s9179_s4 + $0x10] sm:$0xff] }
 0x4f8   : > { %6416 = vmatprep.subr.mxu0 %v7456_v19  ;;  %6444 = vmatprep.subr.mxu1 %v7456_v19 }
 0x4f9   : > { %6445 = vmatpush3.msra.mxu1 %v5439_v61  ;;  %v2867_v61 = vld [vmem:[%s9179_s4 + $0x8] sm:$0xff] }
 0x4fa   : > { %6460 = vmatprep.subr.mxu1 %v7456_v19 }
 0x5b0   : > { %v2053_v35 = vpop.f32.mrf.mxu0  ;;  %v2132_v36 = vpop.f32.mrf.mxu1 }
 0x5b1   : > { %v8519_v37 = vmax.f32 %v2053_v35, %v2132_v36 }
 0x5b2   : > { %v6385_v39 = vpop.f32.mrf.mxu0  ;;  %v6404_v40 = vpop.f32.mrf.mxu1 }
 0x5b3   : > { %6414 = vmatmul.mubr.msk.f32.vlgmr.msra.gmra.mxu0 %vm2168_vm4, %v8519_v37  ;;  %v2138_v42 = vrot.slane %v8519_v37, 7  ;;  %v2148_v24 = vrot.slane %v8519_v37, 1  ;;  %v2652_v39 = vld [vmem:[%s9187_s12 + $0x8] sm:$0xff]  ;;  %v2736_v40 = vld [vmem:[#allocation12 + $0x8] sm:$0xff] }
 0x5b4   : > { %6417 = vmatpush3.msra.mxu0 %v2162_v38  ;;  %6424 = vmatprep.mubr.msk.f32.mxu0 %vm7457_vm3, %v7456_v19 }
 0x5b5   : > { %6418 = vmatprep.subr.mxu0 %v7456_v19  ;;  %v2147_v55 = vmul.f32 %v8540_v54, %v2138_v42  ;;  %v2158_v48 = vmul.f32 %v2156_v14, %v2148_v24  ;;  %v5464_v42 = vld [vmem:[%s9179_s4 + $0x78] sm:$0xff]  ;;  %v2872_v24 = vld [vmem:[%s9179_s4 + $0x30] sm:$0xff] }
 0x5b6   : > { %6419 = vmatpush3.msra.mxu0 %v2161_v41  ;;  %v2735_v41 = vld [vmem:[#allocation12] sm:$0xff] }
 0x5b7   : > { %6420 = vmatprep.subr.mxu0 %v7456_v19 }
 0x5b8   : > { %6421 = vmatpush3.msra.mxu0 %v2160_v45  ;;  %v2873_v45 = vld [vmem:[%s9179_s4 + $0x38] sm:$0xff] }
 0x5b9   : > { %6422 = vmatprep.subr.mxu0 %v7456_v19 }
 0x5ba   : > { %6423 = vmatpush3.msra.mxu0 %v2159_v46  ;;  %v5462_v46 = vld [vmem:[%s9179_s4 + $0x68] sm:$0xff] }
 0x5bb   : > { %6425 = vmatmul.mubr.msk.f32.vlgmr.msra.gmra.mxu0 %vm2168_vm4, %v2147_v55  ;;  %6427 = vmatprep.subr.mxu0 %v7456_v19  ;;  %v5460_v55 = vld [vmem:[%s9179_s4 + $0x58] sm:$0xff] }
 0x5bc   : > { %6428 = vmatpush3.msra.mxu0 %v5432_v56  ;;  %6435 = vmatprep.mubr.msk.f32.mxu0 %vm7457_vm3, %v7456_v19 }
 0x5bd   : > { %6429 = vmatprep.subr.mxu0 %v7456_v19 }
 0x5be   : > { %6430 = vmatpush3.msra.mxu0 %v5431_v57 }
 0x5bf   : > { %6431 = vmatprep.subr.mxu0 %v7456_v19 }
 0x5c0   : > { %6432 = vmatpush3.msra.mxu0 %v5430_v44  ;;  %v5459_v44 = vld [vmem:[%s9179_s4 + $0x50] sm:$0xff] }
 0x5c1   : > { %6433 = vmatprep.subr.mxu0 %v7456_v19 }
 0x5c2   : > { %6434 = vmatpush3.msra.mxu0 %v5429_v47  ;;  %v2871_v47 = vld [vmem:[%s9179_s4 + $0x28] sm:$0xff] }
 0x5c3   : > { %6436 = vmatmul.mubr.msk.f32.vlgmr.msra.gmra.mxu0 %vm2168_vm4, %v2158_v48  ;;  %6449 = vmatprep.subr.mxu0 %v7456_v19  ;;  %v2870_v48 = vld [vmem:[%s9179_s4 + $0x20] sm:$0xff] }
 0x5c4   : > { %6457 = vmatprep.mubr.msk.f32.mxu0 %vm7457_vm3, %v7456_v19  ;;  %6450 = vmatpush3.msra.mxu0 %v5438_v58  ;;  %v5476_v58 = vld [vmem:[%s9179_s4 + $0xb8] sm:$0xff] }
 0x5c5   : > { %6451 = vmatprep.subr.mxu0 %v7456_v19 }
 0x5c6   : > { %6452 = vmatpush3.msra.mxu0 %v5437_v33  ;;  %v2866_v33 = vld [vmem:[%s9179_s4] sm:$0xff] }
 0x5c7   : > { %6453 = vmatprep.subr.mxu0 %v7456_v19 }
 0x5c8   : > { %6454 = vmatpush3.msra.mxu0 %v5436_v7 }
 0x5c9   : > { %6455 = vmatprep.subr.mxu0 %v7456_v19 }
 0x5ca   : > { %6456 = vmatpush3.msra.mxu0 %v5435_v21 }
 0x673   : > { %v2237_v60 = vpop.f32.mrf.mxu0 }
 0x675   : > { %v6415_v22 = vpop.f32.mrf.mxu0 }
 0x676   : > { %v8683_v22 = vpop.permute.xlu0 %2835 }
 0x67b   : > { %v2310_v23 = vpop.f32.mrf.mxu0 }
 0x67c   : > { %v2311_v50 = vadd.f32 %v2310_v23, %v2237_v60 }
 0x67d   : > { %v6426_v43 = vpop.f32.mrf.mxu0 }
 0x683   : > { %v2388_v51 = vpop.f32.mrf.mxu0 }
 0x684   : > { %v2392_v62 = vadd.f32 %v2388_v51, %v2311_v50 }
 0x685   : > { %v6437_v63 = vpop.f32.mrf.mxu0 }
 0x686   : > { %v2398_v0 = vadd.f32 %v5434_v52, %v2392_v62 }
 0x688   : > { %v2399_v1 = vmax.f32 %v2398_v0, 0.0 }
 0x68a   : > { %v2401_v4 = vrot.slane %v2399_v1, 7  ;;  %6447 = vmatmul.mubr.msk.f32.vlgmr.msra.gmra.mxu1 %vm2168_vm4, %v2399_v1  ;;  %v2405_v32 = vrot.slane %v2399_v1, 1 }
 0x68b   : > { %6461 = vmatpush3.msra.mxu1 %v5448_v2  ;;  %6468 = vmatprep.mubr.msk.f32.mxu1 %vm7457_vm3, %v7456_v19 }
 0x68c   : > { %v2404_v25 = vmul.f32 %v2401_v4, %v8540_v54  ;;  %6462 = vmatprep.subr.mxu1 %v7456_v19  ;;  %v2408_v10 = vmul.f32 %v2405_v32, %v2156_v14  ;;  %v5461_v54 = vld [vmem:[%s9179_s4 + $0x60] sm:$0xff]  ;;  %v5458_v14 = vld [vmem:[%s9179_s4 + $0x48] sm:$0xff]  ;;  %v5471_v32 = vld [vmem:[%s9179_s4 + $0x90] sm:$0xff] }
 0x68d   : > { %6463 = vmatpush3.msra.mxu1 %v5447_v5  ;;  %v5473_v5 = vld [vmem:[%s9179_s4 + $0xa0] sm:$0xff] }
 0x68e   : > { %6464 = vmatprep.subr.mxu1 %v7456_v19  ;;  %6458 = vmatmul.mubr.msk.f32.vlgmr.msra.gmra.mxu0 %vm2168_vm4, %v2404_v25  ;;  %v5472_v25 = vld [vmem:[%s9179_s4 + $0x98] sm:$0xff] }
 0x68f   : > { %6465 = vmatpush3.msra.mxu1 %v5446_v34  ;;  %6473 = vmatprep.mubr.msk.f32.mxu0 %vm2653_vm5, %v2651_v9  ;;  %v5470_v34 = vld [vmem:[%s9179_s4 + $0x88] sm:$0xff] }
 0x690   : > { %6466 = vmatprep.subr.mxu1 %v7456_v19 }
 0x691   : > { %6467 = vmatpush3.msra.mxu1 %v5445_v6  ;;  %v5469_v6 = vld [vmem:[%s9179_s4 + $0x80] sm:$0xff] }
 0x692   : > { %6469 = vmatmul.mubr.msk.f32.vlgmr.msra.gmra.mxu1 %vm2168_vm4, %v2408_v10  ;;  %6476 = vmatprep.subr.mxu1 %v2738_v12 }
 0x693   : > { %6477 = vmatpush3.msra.mxu1 %v2738_v12 }
 0x694   : > { %6478 = vmatprep.subr.mxu1 %v2737_v11 }
 0x695   : > { %6479 = vmatpush3.msra.mxu1 %v2737_v11  ;;  %v5495_v11 = vld [vmem:[%s9179_s4 + $0x138] sm:$0xff] }
 0x696   : > { %6480 = vmatprep.subr.mxu1 %v2736_v40 }
 0x697   : > { %6481 = vmatpush3.msra.mxu1 %v2736_v40  ;;  %v5507_v40 = vld [vmem:[%s9179_s4 + $0x178] sm:$0xff] }
 0x698   : > { %6482 = vmatprep.subr.mxu1 %v2735_v41 }
 0x699   : > { %6483 = vmatpush3.msra.mxu1 %v2735_v41  ;;  %v5481_v41 = vld [vmem:[%s9179_s4 + $0xc8] sm:$0xff] }
 0x69a   : > { %6506 = vmatprep.subr.mxu1 %v2873_v45 }
 0x74a   : > { %v2487_v15 = vpop.f32.mrf.mxu1 }
 0x74c   : > { %v6448_v20 = vpop.f32.mrf.mxu1 }
 0x74d   : > { %v5487_v20 = vld [vmem:[%s9179_s4 + $0xf8] sm:$0xff] }
 0x74e   : > { %v2560_v27 = vpop.f32.mrf.mxu0 }
 0x74f   : > { %v2561_v19 = vadd.f32 %v2560_v27, %v2487_v15  ;;  %v5494_v15 = vld [vmem:[%s9179_s4 + $0x130] sm:$0xff]  ;;  %v5493_v27 = vld [vmem:[%s9179_s4 + $0x128] sm:$0xff] }
 0x750   : > { %v6459_v28 = vpop.f32.mrf.mxu0 }
 0x751   : > { %v5486_v28 = vld [vmem:[%s9179_s4 + $0xf0] sm:$0xff] }
 0x752   : > { %v2638_v53 = vpop.f32.mrf.mxu1 }
 0x753   : > { %v2642_v30 = vadd.f32 %v2638_v53, %v2561_v19  ;;  %v5492_v19 = vld [vmem:[%s9179_s4 + $0x120] sm:$0xff]  ;;  %v5491_v53 = vld [vmem:[%s9179_s4 + $0x118] sm:$0xff] }
 0x754   : > { %v6470_v31 = vpop.f32.mrf.mxu1 }
 0x755   : > { %v2648_v35 = vadd.f32 %v5450_v29, %v2642_v30  ;;  %v5485_v29 = vld [vmem:[%s9179_s4 + $0xe8] sm:$0xff]  ;;  %v5490_v30 = vld [vmem:[%s9179_s4 + $0x110] sm:$0xff]  ;;  %v5484_v31 = vld [vmem:[%s9179_s4 + $0xe0] sm:$0xff] }
 0x757   : > { %v2649_v36 = vadd.f32 %v2648_v35, %v8519_v37  ;;  %v5463_v37 = vld [vmem:[%s9179_s4 + $0x70] sm:$0xff]  ;;  %v5489_v35 = vld [vmem:[%s9179_s4 + $0x108] sm:$0xff] }
 0x759   : > { %v2650_v38 = vmax.f32 %v2649_v36, 0.0  ;;  %v5483_v36 = vld [vmem:[%s9179_s4 + $0xd8] sm:$0xff] }
 0x75b   : > { %6471 = vmatprep.subr.mxu0 %v2650_v38 }
 0x75c   : > { %6472 = vmatpush3.msra.mxu0 %v2650_v38  ;;  %v5488_v38 = vld [vmem:[%s9179_s4 + $0x100] sm:$0xff] }
 0x75d   : > { %6474 = vmatmul.mubr.msk.f32.vlgmr.msra.gmra.mxu0 %vm2653_vm5, %v2652_v39  ;;  %6487 = vmatprep.subr.mxu0 %v5464_v42  ;;  %v5482_v39 = vld [vmem:[%s9179_s4 + $0xd0] sm:$0xff] }
 0x75e   : > { %6488 = vmatpush3.msra.mxu0 %v5464_v42  ;;  %v5480_v42 = vld [vmem:[%s9179_s4 + $0xc0] sm:$0xff] }
 0x75f   : > { %6489 = vmatprep.subr.mxu0 %v5463_v37 }
 0x760   : > { %6490 = vmatpush3.msra.mxu0 %v5463_v37  ;;  %v3559_v37 = vld [vmem:[#allocation9 + $0xf8] sm:$0xff] }
 0x761   : > { %6491 = vmatprep.subr.mxu0 %v5462_v46 }
 0x762   : > { %6492 = vmatpush3.msra.mxu0 %v5462_v46 }
 0x763   : > { %6493 = vmatprep.subr.mxu0 %v5461_v54 }
 0x764   : > { %6494 = vmatpush3.msra.mxu0 %v5461_v54 }
 0x765   : > { %6495 = vmatprep.subr.mxu0 %v5460_v55 }
 0x766   : > { %6496 = vmatpush3.msra.mxu0 %v5460_v55 }
 0x767   : > { %6497 = vmatprep.subr.mxu0 %v5459_v44 }
 0x768   : > { %6498 = vmatpush3.msra.mxu0 %v5459_v44 }
 0x769   : > { %6499 = vmatprep.subr.mxu0 %v5458_v14 }
 0x76a   : > { %6500 = vmatpush3.msra.mxu0 %v5458_v14 }
 0x76b   : > { %6501 = vmatprep.subr.mxu0 %v5457_v49 }
 0x76c   : > { %6502 = vmatpush3.msra.mxu0 %v5457_v49 }
 0x76d   : > { %6525 = vmatprep.subr.mxu0 %v5476_v58 }
 0x81d   : > { %v6475_v56 = vpop.f32.mrf.mxu0 }
 0x81f   : > { %v2726_v57 = vpop.f32.mrf.mxu0 }
 0x820   : > { %6484 = vmatprep.mubr.msk.f32.mxu1 %vm2168_vm4, %v2726_v57 }
 0x821   : > { %6485 = vmatmul.mubr.msk.f32.vlgmr.msra.gmra.mxu1 %vm2168_vm4, %v6475_v56 }
 0x822   : > { %6507 = vmatpush3.msra.mxu1 %v2873_v45 }
 0x823   : > { %6508 = vmatprep.subr.mxu1 %v2872_v24 }
 0x824   : > { %6509 = vmatpush3.msra.mxu1 %v2872_v24  ;;  %v5479_v24 = vld [vmem:[#allocation6] ss:$0 sm:$0xff] }
 0x825   : > { %6510 = vmatprep.subr.mxu1 %v2871_v47 }
 0x826   : > { %6511 = vmatpush3.msra.mxu1 %v2871_v47 }
 0x827   : > { %6512 = vmatprep.subr.mxu1 %v2870_v48 }
 0x828   : > { %6513 = vmatpush3.msra.mxu1 %v2870_v48 }
 0x829   : > { %6514 = vmatprep.subr.mxu1 %v2869_v8 }
 0x82a   : > { %6515 = vmatpush3.msra.mxu1 %v2869_v8 }
 0x82b   : > { %6516 = vmatprep.subr.mxu1 %v2868_v18 }
 0x82c   : > { %6517 = vmatpush3.msra.mxu1 %v2868_v18 }
 0x82d   : > { %6518 = vmatprep.subr.mxu1 %v2867_v61 }
 0x82e   : > { %6519 = vmatpush3.msra.mxu1 %v2867_v61 }
 0x82f   : > { %6520 = vmatprep.subr.mxu1 %v2866_v33 }
 0x830   : > { %6521 = vmatpush3.msra.mxu1 %v2866_v33 }
 0x831   : > { %6544 = vmatprep.subr.mxu1 %v5495_v11 }
 0x8e1   : > { %v6486_v7 = vpop.f32.mrf.mxu1 }
 0x8e2   : > { %v2817_v21 = vadd.f32 %v6486_v7, %v8308_v59 }
 0x8e3   : > { %v2811_v60 = vpop.f32.mrf.mxu1 }
 0x8e4   : > { %v8687_v23 = vadd.f32 %v2817_v21, %v1969_v16  ;;  %v2812_v43 = vadd.f32 %v2811_v60, %v8311_v26  ;;  %v8705_v26 = vpop.permute.xlu1 %2840  ;;  %v8707_v16 = vpop.permute.xlu0 %2856  ;;  %v5506_v60 = vld [vmem:[%s9179_s4 + $0x170] sm:$0xff] }
 0x8e6   : > { %v8692_v50 = vadd.f32 %v2812_v43, %v1968_v17  ;;  %v2823_v51 = vrot.slane %v8687_v23, 7  ;;  %v2846_v52 = vrot.slane %v8687_v23, 1 }
 0x8e8   : > { %v2826_v62 = vrot.slane %v8692_v50, 7  ;;  %v2845_v59 = vrot.slane %v8692_v50, 1  ;;  %6503 = vmatprep.mubr.msk.f32.mxu0 %vm871_vm0, %v8692_v50  ;;  %v8737_v9 = vpop.permute.xlu1 %2861 }
 0x8e9   : > { %6504 = vmatmul.mubr.msk.f32.vlgmr.msra.gmra.mxu0 %vm871_vm0, %v8687_v23 }
 0x8ea   : > { %6526 = vmatpush3.msra.mxu0 %v5476_v58  ;;  %v2830_v17 = vsel %vm811_vm1, %v2823_v51, %v2826_v62  ;;  %v2847_v63 = vsel %vm831_vm2, %v2845_v59, %v2846_v52  ;;  %v2827_v0 = vsel %vm811_vm1, %v2826_v62, %v2823_v51  ;;  %v2851_v10 = vsel %vm831_vm2, %v2846_v52, %v2845_v59  ;;  %v5505_v51 = vld [vmem:[%s9179_s4 + $0x168] sm:$0xff] }
 0x8eb   : > { %6527 = vmatprep.subr.mxu0 %v5475_v13  ;;  %v2843_v1 = vmul.f32 %v8683_v22, %v2830_v17  ;;  %v2864_v2 = vmul.f32 %v8707_v16, %v2847_v63  ;;  %v2844_v4 = vmul.f32 %v8705_v26, %v2827_v0  ;;  %v2865_v12 = vmul.f32 %v8737_v9, %v2851_v10  ;;  %v5504_v17 = vld [vmem:[%s9179_s4 + $0x160] sm:$0xff]  ;;  %v8815_v0 = vld [vmem:[%s7723_s0] sm:$0xff] }
 0x8ec   : > { %6528 = vmatpush3.msra.mxu0 %v5475_v13  ;;  %v3558_v63 = vld [vmem:[#allocation9 + $0xf0] sm:$0xff] }
 0x8ed   : > { %6529 = vmatprep.subr.mxu0 %v5474_v3  ;;  %6522 = vmatprep.mubr.msk.f32.mxu1 %vm871_vm0, %v2843_v1  ;;  %v5502_v1 = vld [vmem:[%s9179_s4 + $0x150] sm:$0xff]  ;;  %v3554_v10 = vld [vmem:[#allocation9 + $0xd0] sm:$0xff] }
 0x8ee   : > { %6530 = vmatpush3.msra.mxu0 %v5474_v3  ;;  %6541 = vmatprep.mubr.msk.f32.mxu0 %vm871_vm0, %v2864_v2  ;;  %v3556_v2 = vld [vmem:[#allocation9 + $0xe0] sm:$0xff] }
 0x8ef   : > { %6523 = vmatmul.mubr.msk.f32.vlgmr.msra.gmra.mxu1 %vm871_vm0, %v2844_v4  ;;  %6531 = vmatprep.subr.mxu0 %v5473_v5  ;;  %v5501_v4 = vld [vmem:[%s9179_s4 + $0x148] sm:$0xff] }
 0x8f0   : > { %6532 = vmatpush3.msra.mxu0 %v5473_v5  ;;  %6545 = vmatpush3.msra.mxu1 %v5495_v11  ;;  %v3542_v11 = vld [vmem:[#allocation9 + $0x78] sm:$0xff] }
 0x8f1   : > { %6533 = vmatprep.subr.mxu0 %v5472_v25  ;;  %6546 = vmatprep.subr.mxu1 %v5494_v15 }
 0x8f2   : > { %6534 = vmatpush3.msra.mxu0 %v5472_v25  ;;  %6547 = vmatpush3.msra.mxu1 %v5494_v15  ;;  %v3446_v25 = vrot.slane %v8815_v0, 7 }
 0x8f3   : > { %6535 = vmatprep.subr.mxu0 %v5471_v32  ;;  %6548 = vmatprep.subr.mxu1 %v5493_v27 }
 0x8f4   : > { %6536 = vmatpush3.msra.mxu0 %v5471_v32  ;;  %6549 = vmatpush3.msra.mxu1 %v5493_v27  ;;  %v8839_v27 = vpop.permute.xlu0 %3463 }
 0x8f5   : > { %6537 = vmatprep.subr.mxu0 %v5470_v34  ;;  %6550 = vmatprep.subr.mxu1 %v5492_v19 }
 0x8f6   : > { %6538 = vmatpush3.msra.mxu0 %v5470_v34  ;;  %6551 = vmatpush3.msra.mxu1 %v5492_v19  ;;  %v3555_v34 = vld [vmem:[#allocation9 + $0xd8] sm:$0xff] }
 0x8f7   : > { %6539 = vmatprep.subr.mxu0 %v5469_v6  ;;  %6552 = vmatprep.subr.mxu1 %v5491_v53 }
 0x8f8   : > { %6540 = vmatpush3.msra.mxu0 %v5469_v6  ;;  %6553 = vmatpush3.msra.mxu1 %v5491_v53  ;;  %v5500_v6 = vld [vmem:[%s9179_s4 + $0x140] sm:$0xff] }
 0x8f9   : > { %6542 = vmatmul.mubr.msk.f32.vlgmr.msra.gmra.mxu0 %vm871_vm0, %v2865_v12  ;;  %6563 = vmatprep.subr.mxu0 %v5487_v20  ;;  %v3540_v53 = vld [vmem:[#allocation9 + $0x68] sm:$0xff] }
 0x8fa   : > { %6564 = vmatpush3.msra.mxu0 %v5487_v20  ;;  %6554 = vmatprep.subr.mxu1 %v5490_v30  ;;  %v3553_v20 = vld [vmem:[#allocation9 + $0xc8] sm:$0xff] }
 0x8fb   : > { %6565 = vmatprep.subr.mxu0 %v5486_v28  ;;  %6555 = vmatpush3.msra.mxu1 %v5490_v30  ;;  %v3539_v30 = vld [vmem:[#allocation9 + $0x60] sm:$0xff] }
 0x8fc   : > { %6566 = vmatpush3.msra.mxu0 %v5486_v28  ;;  %6556 = vmatprep.subr.mxu1 %v5489_v35  ;;  %v3552_v28 = vld [vmem:[#allocation9 + $0xc0] sm:$0xff] }
 0x8fd   : > { %6567 = vmatprep.subr.mxu0 %v5485_v29  ;;  %6557 = vmatpush3.msra.mxu1 %v5489_v35  ;;  %v3538_v35 = vld [vmem:[#allocation9 + $0x58] sm:$0xff] }
 0x8fe   : > { %6568 = vmatpush3.msra.mxu0 %v5485_v29  ;;  %6558 = vmatprep.subr.mxu1 %v5488_v38  ;;  %v3551_v29 = vld [vmem:[#allocation9 + $0xb8] sm:$0xff] }
 0x8ff   : > { %6569 = vmatprep.subr.mxu0 %v5484_v31  ;;  %6559 = vmatpush3.msra.mxu1 %v5488_v38  ;;  %v3537_v38 = vld [vmem:[#allocation9 + $0x50] sm:$0xff] }
 0x900   : > { %6570 = vmatpush3.msra.mxu0 %v5484_v31  ;;  %6582 = vmatprep.subr.mxu1 %v5507_v40  ;;  %v3550_v31 = vld [vmem:[#allocation9 + $0xb0] sm:$0xff] }
 0x901   : > { %6571 = vmatprep.subr.mxu0 %v5483_v36 }
 0x902   : > { %6572 = vmatpush3.msra.mxu0 %v5483_v36  ;;  %v3549_v36 = vld [vmem:[#allocation9 + $0xa8] sm:$0xff] }
 0x903   : > { %6573 = vmatprep.subr.mxu0 %v5482_v39 }
 0x904   : > { %6574 = vmatpush3.msra.mxu0 %v5482_v39  ;;  %v3548_v39 = vld [vmem:[#allocation9 + $0xa0] sm:$0xff] }
 0x905   : > { %6575 = vmatprep.subr.mxu0 %v5481_v41 }
 0x906   : > { %6576 = vmatpush3.msra.mxu0 %v5481_v41  ;;  %v3547_v41 = vld [vmem:[#allocation9 + $0x98] sm:$0xff] }
 0x907   : > { %6577 = vmatprep.subr.mxu0 %v5480_v42 }
 0x908   : > { %6578 = vmatpush3.msra.mxu0 %v5480_v42  ;;  %v3535_v42 = vld [vmem:[#allocation9 + $0x40] sm:$0xff] }
 0x909   : > { %6601 = vmatprep.subr.mxu0 %v3559_v37 }
 0x9a9   : > { %v6505_v45 = vpop.f32.mrf.mxu0 }
 0x9ab   : > { %v2952_v54 = vpop.f32.mrf.mxu0 }
 0x9af   : > { %v6524_v46 = vpop.f32.mrf.mxu1 }
 0x9b0   : > { %v3039_v56 = vadd.f32 %v6524_v46, %v6505_v45  ;;  %v3534_v45 = vld [vmem:[#allocation9 + $0x38] sm:$0xff]  ;;  %v3545_v46 = vld [vmem:[#allocation9 + $0x88] sm:$0xff] }
 0x9b1   : > { %v3033_v55 = vpop.f32.mrf.mxu1 }
 0x9b2   : > { %v3034_v44 = vadd.f32 %v3033_v55, %v2952_v54  ;;  %v3533_v54 = vld [vmem:[#allocation9 + $0x30] sm:$0xff]  ;;  %v3544_v55 = vld [vmem:[#allocation9 + $0x80] sm:$0xff] }
 0x9b9   : > { %v6543_v57 = vpop.f32.mrf.mxu0 }
 0x9ba   : > { %v3132_v47 = vadd.f32 %v6543_v57, %v3039_v56  ;;  %v8844_v56 = vld [vmem:[%s7723_s0 + $0x8] sm:$0xff] }
 0x9bb   : > { %v3122_v14 = vpop.f32.mrf.mxu0  ;;  %v3532_v57 = vld [vmem:[#allocation9 + $0x28] sm:$0xff] }
 0x9bc   : > { %v3139_v48 = vadd.f32 %v5479_v24, %v3132_v47  ;;  %v3131_v49 = vadd.f32 %v3122_v14, %v3034_v44  ;;  %v3486_v44 = vrot.slane %v8844_v56, 1  ;;  %v3746_v47 = vld [vmem:[#allocation9 + $0x178] sm:$0xff]  ;;  %v3531_v14 = vld [vmem:[#allocation9 + $0x20] sm:$0xff] }
 0x9be   : > { %v3141_v8 = vmax.f32 %v3139_v48, 0.0  ;;  %v3138_v18 = vadd.f32 %v5479_v24, %v3131_v49  ;;  %v3485_v24 = vrot.slane %v8815_v0, 1  ;;  %v3745_v48 = vld [vmem:[#allocation9 + $0x170] sm:$0xff]  ;;  %v3530_v49 = vld [vmem:[#allocation9 + $0x18] sm:$0xff] }
 0x9c0   : > { %v3140_v58 = vmax.f32 %v3138_v18, 0.0  ;;  %v3143_v61 = vrot.slane %v3141_v8, 7  ;;  %v3154_v33 = vrot.slane %v3141_v8, 1  ;;  %v8853_v18 = vld [vmem:[%s7723_s0 + $0x10] sm:$0xff] }
 0x9c2   : > { %v3146_v7 = vrot.slane %v3140_v58, 7  ;;  %v3153_v21 = vrot.slane %v3140_v58, 1  ;;  %6560 = vmatprep.mubr.msk.f32.mxu1 %vm871_vm0, %v3140_v58  ;;  %v3487_v58 = vsel %vm831_vm2, %v3485_v24, %v3486_v44 }
 0x9c3   : > { %6561 = vmatmul.mubr.msk.f32.vlgmr.msra.gmra.mxu1 %vm871_vm0, %v3141_v8  ;;  %v8850_v8 = vpop.permute.xlu1 %3468 }
 0x9c4   : > { %v3147_v43 = vsel %vm811_vm1, %v3146_v7, %v3143_v61  ;;  %6583 = vmatpush3.msra.mxu1 %v5507_v40  ;;  %v3150_v52 = vsel %vm811_vm1, %v3143_v61, %v3146_v7  ;;  %v3155_v62 = vsel %vm831_vm2, %v3153_v21, %v3154_v33  ;;  %v3159_v32 = vsel %vm831_vm2, %v3154_v33, %v3153_v21  ;;  %v3536_v40 = vld [vmem:[#allocation9 + $0x48] sm:$0xff]  ;;  %v3529_v33 = vld [vmem:[#allocation9 + $0x10] sm:$0xff]  ;;  %v8861_v7 = vpop.permute.xlu0 %3505 }
 0x9c5   : > { %6584 = vmatprep.subr.mxu1 %v5506_v60  ;;  %v3151_v59 = vmul.f32 %v3150_v52, %v8683_v22  ;;  %v3160_v13 = vmul.f32 %v3155_v62, %v8707_v16  ;;  %v3152_v3 = vmul.f32 %v3147_v43, %v8705_v26  ;;  %v5503_v22 = vld [vmem:[%s9179_s4 + $0x158] sm:$0xff]  ;;  %v8819_v26 = vld [vmem:[%s7723_s0 + $0x18] sm:$0xff]  ;;  %v3161_v12 = vmul.f32 %v3159_v32, %v8737_v9  ;;  %s9128_s0 = scalar_lea.hbm %s9253_s25, %s5537_s29 }
 0x9c6   : > { %6585 = vmatpush3.msra.mxu1 %v5506_v60  ;;  %v3557_v16 = vld [vmem:[#allocation9 + $0xe8] sm:$0xff]  ;;  %v3441_v5 = vrot.slane %v8819_v26, 7  ;;  %v3541_v9 = vld [vmem:[#allocation9 + $0x70] sm:$0xff]  ;;  %v3447_v21 = vrot.slane %v8844_v56, 7  ;;  %v3449_v60 = vrot.slane %v8853_v18, 7  ;;  %v3523_v43 = vmul.f32 %v8861_v7, %v3487_v58  ;;  %v3742_v62 = vld [vmem:[#allocation9 + $0x158] sm:$0xff] }
 0x9c7   : > { %6586 = vmatprep.subr.mxu1 %v5505_v51  ;;  %6579 = vmatprep.mubr.msk.f32.mxu0 %vm871_vm0, %v3151_v59  ;;  %v3744_v61 = vld [vmem:[#allocation9 + $0x168] sm:$0xff]  ;;  %v8867_v59 = vpop.permute.xlu1 %3510  ;;  %v3917_v58 = vld [vmem:[#allocation9 + $0x260] sm:$0xff] }
 0x9c8   : > { %6587 = vmatpush3.msra.mxu1 %v5505_v51  ;;  %6598 = vmatprep.mubr.msk.f32.mxu1 %vm871_vm0, %v3160_v13  ;;  %v3456_v15 = vsel %vm811_vm1, %v3441_v5, %v3446_v25  ;;  %v3743_v51 = vld [vmem:[#allocation9 + $0x160] sm:$0xff]  ;;  %v3528_v52 = vld [vmem:[#allocation9 + $0x8] sm:$0xff] }
 0x9c9   : > { %6580 = vmatmul.mubr.msk.f32.vlgmr.msra.gmra.mxu0 %vm871_vm0, %v3152_v3  ;;  %6588 = vmatprep.subr.mxu1 %v5504_v17  ;;  %v3481_v19 = vmul.f32 %v8839_v27, %v3456_v15  ;;  %v3527_v13 = vld [vmem:[#allocation9] sm:$0xff]  ;;  %v3448_v3 = vsel %vm811_vm1, %v3446_v25, %v3447_v21  ;;  %v3733_v15 = vld [vmem:[#allocation9 + $0x110] sm:$0xff] }
 0x9ca   : > { %6602 = vmatpush3.msra.mxu0 %v3559_v37  ;;  %6589 = vmatpush3.msra.mxu1 %v5504_v17  ;;  %v3546_v37 = vld [vmem:[#allocation9 + $0x90] sm:$0xff]  ;;  %v3739_v25 = vld [vmem:[#allocation9 + $0x140] sm:$0xff] }
 0x9cb   : > { %6603 = vmatprep.subr.mxu0 %v3558_v63  ;;  %6590 = vmatprep.subr.mxu1 %v5503_v22  ;;  %v3741_v17 = vld [vmem:[#allocation9 + $0x150] sm:$0xff]  ;;  %v8880_v32 = vpop.permute.xlu1 %3478 }
 0x9cc   : > { %6604 = vmatpush3.msra.mxu0 %v3558_v63  ;;  %6591 = vmatpush3.msra.mxu1 %v5503_v22  ;;  %v3450_v63 = vsel %vm811_vm1, %v3447_v21, %v3449_v60  ;;  %v8873_v22 = vpop.permute.xlu0 %3473  ;;  %v3914_v21 = vld [vmem:[#allocation9 + $0x248] sm:$0xff] }
 0x9cd   : > { %6605 = vmatprep.subr.mxu0 %v3557_v16  ;;  %6592 = vmatprep.subr.mxu1 %v5502_v1 }
 0x9ce   : > { %6606 = vmatpush3.msra.mxu0 %v3557_v16  ;;  %6593 = vmatpush3.msra.mxu1 %v5502_v1  ;;  %v3482_v16 = vmul.f32 %v8850_v8, %v3448_v3  ;;  %v3740_v1 = vld [vmem:[#allocation9 + $0x148] sm:$0xff]  ;;  %v3907_v3 = vld [vmem:[#allocation9 + $0x210] sm:$0xff] }
 0x9cf   : > { %6607 = vmatprep.subr.mxu0 %v3556_v2  ;;  %6594 = vmatprep.subr.mxu1 %v5501_v4 }
 0x9d0   : > { %6608 = vmatpush3.msra.mxu0 %v3556_v2  ;;  %6595 = vmatpush3.msra.mxu1 %v5501_v4  ;;  %v3483_v2 = vmul.f32 %v8873_v22, %v3450_v63  ;;  %v3451_v4 = vsel %vm811_vm1, %v3449_v60, %v3441_v5  ;;  %v3735_v5 = vld [vmem:[#allocation9 + $0x120] sm:$0xff] }
 0x9d1   : > { %6609 = vmatprep.subr.mxu0 %v3555_v34  ;;  %6596 = vmatprep.subr.mxu1 %v5500_v6  ;;  %v3913_v60 = vld [vmem:[#allocation9 + $0x240] sm:$0xff] }
 0x9d2   : > { %6610 = vmatpush3.msra.mxu0 %v3555_v34  ;;  %6597 = vmatpush3.msra.mxu1 %v5500_v6  ;;  %v3484_v34 = vmul.f32 %v8880_v32, %v3451_v4  ;;  %v3738_v6 = vld [vmem:[#allocation9 + $0x138] sm:$0xff]  ;;  %v3905_v63 = vld [vmem:[#allocation9 + $0x200] sm:$0xff] }
 0x9d3   : > { %6611 = vmatprep.subr.mxu0 %v3554_v10  ;;  %6599 = vmatmul.mubr.msk.f32.vlgmr.msra.gmra.mxu1 %vm871_vm0, %v3161_v12  ;;  %v3736_v12 = vld [vmem:[#allocation9 + $0x128] sm:$0xff] }
 0x9d4   : > { %6612 = vmatpush3.msra.mxu0 %v3554_v10  ;;  %6639 = vmatprep.subr.mxu1 %v3542_v11  ;;  %v3737_v10 = vld [vmem:[#allocation9 + $0x130] sm:$0xff] }
 0x9d5   : > { %6613 = vmatprep.subr.mxu0 %v3553_v20  ;;  %6640 = vmatpush3.msra.mxu1 %v3542_v11  ;;  %v3734_v11 = vld [vmem:[#allocation9 + $0x118] sm:$0xff] }
 0x9d6   : > { %6671 = vmatprep.mubr.f32.mxu1 %v3481_v19  ;;  %6614 = vmatpush3.msra.mxu0 %v3553_v20  ;;  %v3490_v20 = vrot.slane %v8819_v26, 1  ;;  %v3488_v19 = vrot.slane %v8853_v18, 1 }
 0x9d7   : > { %6641 = vmatprep.subr.mxu1 %v3541_v9  ;;  %6615 = vmatprep.subr.mxu0 %v3552_v28 }
 0x9d8   : > { %6642 = vmatpush3.msra.mxu1 %v3541_v9  ;;  %6616 = vmatpush3.msra.mxu0 %v3552_v28  ;;  %v3732_v9 = vld [vmem:[#allocation9 + $0x108] sm:$0xff]  ;;  %v3489_v28 = vsel %vm831_vm2, %v3486_v44, %v3488_v19  ;;  %v3890_v44 = vld [vmem:[#allocation9 + $0x190] sm:$0xff] }
 0x9d9   : > { %6643 = vmatprep.subr.mxu1 %v3540_v53  ;;  %6617 = vmatprep.subr.mxu0 %v3551_v29 }
 0x9da   : > { %6644 = vmatpush3.msra.mxu1 %v3540_v53  ;;  %6618 = vmatpush3.msra.mxu0 %v3551_v29  ;;  %v3731_v53 = vld [vmem:[#allocation9 + $0x100] sm:$0xff]  ;;  %v8888_v29 = vpop.permute.xlu0 %3515 }
 0x9db   : > { %6645 = vmatprep.subr.mxu1 %v3539_v30  ;;  %6619 = vmatprep.subr.mxu0 %v3550_v31 }
 0x9dc   : > { %6646 = vmatpush3.msra.mxu1 %v3539_v30  ;;  %6620 = vmatpush3.msra.mxu0 %v3550_v31  ;;  %v3491_v30 = vsel %vm831_vm2, %v3488_v19, %v3490_v20  ;;  %v3903_v31 = vld [vmem:[#allocation9 + $0x1f8] sm:$0xff] }
 0x9dd   : > { %6647 = vmatprep.subr.mxu1 %v3538_v35  ;;  %6621 = vmatprep.subr.mxu0 %v3549_v36 }
 0x9de   : > { %6648 = vmatpush3.msra.mxu1 %v3538_v35  ;;  %6622 = vmatpush3.msra.mxu0 %v3549_v36  ;;  %v8892_v35 = vpop.permute.xlu1 %3520  ;;  %v3497_v36 = vsel %vm831_vm2, %v3490_v20, %v3485_v24  ;;  %v3891_v24 = vld [vmem:[#allocation9 + $0x198] sm:$0xff] }
 0x9df   : > { %6649 = vmatprep.subr.mxu1 %v3537_v38  ;;  %6623 = vmatprep.subr.mxu0 %v3548_v39 }
 0x9e0   : > { %6650 = vmatpush3.msra.mxu1 %v3537_v38  ;;  %6624 = vmatpush3.msra.mxu0 %v3548_v39  ;;  %v3525_v38 = vmul.f32 %v8888_v29, %v3491_v30  ;;  %v3902_v39 = vld [vmem:[#allocation9 + $0x1f0] sm:$0xff] }
 0x9e1   : > { %6651 = vmatprep.subr.mxu1 %v3536_v40  ;;  %6625 = vmatprep.subr.mxu0 %v3547_v41 }
 0x9e2   : > { %6652 = vmatpush3.msra.mxu1 %v3536_v40  ;;  %6626 = vmatpush3.msra.mxu0 %v3547_v41  ;;  %v3901_v40 = vld [vmem:[#allocation9 + $0x1e8] sm:$0xff]  ;;  %v3526_v41 = vmul.f32 %v8892_v35, %v3497_v36 }
 0x9e3   : > { %6653 = vmatprep.subr.mxu1 %v3535_v42  ;;  %6627 = vmatprep.subr.mxu0 %v3546_v37 }
 0x9e4   : > { %6654 = vmatpush3.msra.mxu1 %v3535_v42  ;;  %6628 = vmatpush3.msra.mxu0 %v3546_v37  ;;  %v3900_v42 = vld [vmem:[#allocation9 + $0x1e0] sm:$0xff]  ;;  %v3898_v37 = vld [vmem:[#allocation9 + $0x1d0] sm:$0xff] }
 0x9e5   : > { %6655 = vmatprep.subr.mxu1 %v3534_v45  ;;  %6629 = vmatprep.subr.mxu0 %v3545_v46 }
 0x9e6   : > { %6656 = vmatpush3.msra.mxu1 %v3534_v45  ;;  %6630 = vmatpush3.msra.mxu0 %v3545_v46  ;;  %v3897_v45 = vld [vmem:[#allocation9 + $0x1c8] sm:$0xff]  ;;  %v3896_v46 = vld [vmem:[#allocation9 + $0x1c0] sm:$0xff] }
 0x9e7   : > { %6657 = vmatprep.subr.mxu1 %v3533_v54  ;;  %6631 = vmatprep.subr.mxu0 %v3544_v55 }
 0x9e8   : > { %6658 = vmatpush3.msra.mxu1 %v3533_v54  ;;  %6632 = vmatpush3.msra.mxu0 %v3544_v55  ;;  %v3895_v54 = vld [vmem:[#allocation9 + $0x1b8] sm:$0xff]  ;;  %v3894_v55 = vld [vmem:[#allocation9 + $0x1b0] sm:$0xff] }
 0x9e9   : > { %6633 = vmatprep.mubr.f32.mxu0 %v8815_v0  ;;  %6659 = vmatprep.subr.mxu1 %v3532_v57  ;;  %v3899_v0 = vld [vmem:[#allocation9 + $0x1d8] sm:$0xff] }
 0x9ea   : > { %6634 = vmatmul.mubr.f32.vlgmr.msra.gmra.mxu0 %v8844_v56  ;;  %6660 = vmatpush3.msra.mxu1 %v3532_v57  ;;  %v3893_v56 = vld [vmem:[#allocation9 + $0x1a8] sm:$0xff]  ;;  %v3892_v57 = vld [vmem:[#allocation9 + $0x1a0] sm:$0xff] }
 0x9eb   : > { %6677 = vmatprep.subr.mxu0 %v3746_v47  ;;  %6661 = vmatprep.subr.mxu1 %v3531_v14 }
 0x9ec   : > { %6678 = vmatpush3.msra.mxu0 %v3746_v47  ;;  %6662 = vmatpush3.msra.mxu1 %v3531_v14  ;;  %v3889_v47 = vld [vmem:[#allocation9 + $0x188] sm:$0xff]  ;;  %v3888_v14 = vld [vmem:[#allocation9 + $0x180] sm:$0xff] }
 0x9ed   : > { %6679 = vmatprep.subr.mxu0 %v3745_v48  ;;  %6636 = vmatprep.mubr.f32.mxu0 %v8853_v18  ;;  %v3918_v18 = vld [vmem:[#allocation9 + $0x268] sm:$0xff] }
 0x9ee   : > { %6663 = vmatprep.subr.mxu1 %v3530_v49  ;;  %6680 = vmatpush3.msra.mxu0 %v3745_v48  ;;  %v3920_v48 = vld [vmem:[#allocation9 + $0x278] sm:$0xff] }
 0x9ef   : > { %6637 = vmatmul.mubr.f32.gmra.mxu0 %v8819_v26  ;;  %6664 = vmatpush3.msra.mxu1 %v3530_v49  ;;  %v3524_v26 = vmul.f32 %v8867_v59, %v3489_v28  ;;  %v3919_v49 = vld [vmem:[#allocation9 + $0x270] sm:$0xff] }
 0x9f0   : > { %6681 = vmatprep.subr.mxu0 %v3744_v61  ;;  %6665 = vmatprep.subr.mxu1 %v3529_v33 }
 0x9f1   : > { %6682 = vmatpush3.msra.mxu0 %v3744_v61  ;;  %6709 = vmatprep.mubr.f32.mxu0 %v3523_v43  ;;  %v3916_v61 = vld [vmem:[#allocation9 + $0x258] sm:$0xff] }
 0x9f2   : > { %6666 = vmatpush3.msra.mxu1 %v3529_v33  ;;  %6683 = vmatprep.subr.mxu0 %v3743_v51  ;;  %v3915_v33 = vld [vmem:[#allocation9 + $0x250] sm:$0xff]  ;;  %v3912_v43 = vld [vmem:[#allocation9 + $0x238] sm:$0xff] }
 0x9f3   : > { %6667 = vmatprep.subr.mxu1 %v3528_v52  ;;  %6684 = vmatpush3.msra.mxu0 %v3743_v51  ;;  %v3911_v51 = vld [vmem:[#allocation9 + $0x230] sm:$0xff] }
 0x9f4   : > { %6668 = vmatpush3.msra.mxu1 %v3528_v52  ;;  %6685 = vmatprep.subr.mxu0 %v3742_v62  ;;  %v3910_v52 = vld [vmem:[#allocation9 + $0x228] sm:$0xff] }
 0x9f5   : > { %6669 = vmatprep.subr.mxu1 %v3527_v13  ;;  %6686 = vmatpush3.msra.mxu0 %v3742_v62  ;;  %v3909_v62 = vld [vmem:[#allocation9 + $0x220] sm:$0xff] }
 0x9f6   : > { %6670 = vmatpush3.msra.mxu1 %v3527_v13  ;;  %6687 = vmatprep.subr.mxu0 %v3741_v17  ;;  %v3908_v13 = vld [vmem:[#allocation9 + $0x218] sm:$0xff] }
 0x9f7   : > { %6672 = vmatmul.mubr.f32.vlgmr.msra.gmra.mxu1 %v3482_v16  ;;  %6688 = vmatpush3.msra.mxu0 %v3741_v17  ;;  %v3906_v17 = vld [vmem:[#allocation9 + $0x208] sm:$0xff]  ;;  %v4107_v16 = vld [vmem:[#allocation9 + $0x2f8] sm:$0xff] }
 0x9f8   : > { %6674 = vmatprep.mubr.f32.mxu1 %v3483_v2  ;;  %6689 = vmatprep.subr.mxu0 %v3740_v1 }
 0x9f9   : > { %6690 = vmatpush3.msra.mxu0 %v3740_v1  ;;  %6715 = vmatprep.subr.mxu1 %v3920_v48 }
 0x9fa   : > { %6691 = vmatprep.subr.mxu0 %v3739_v25  ;;  %6716 = vmatpush3.msra.mxu1 %v3920_v48 }
 0x9fb   : > { %6675 = vmatmul.mubr.f32.gmra.mxu1 %v3484_v34  ;;  %6692 = vmatpush3.msra.mxu0 %v3739_v25 }
 0x9fc   : > { %6693 = vmatprep.subr.mxu0 %v3738_v6  ;;  %6717 = vmatprep.subr.mxu1 %v3919_v49 }
 0x9fd   : > { %6694 = vmatpush3.msra.mxu0 %v3738_v6  ;;  %6718 = vmatpush3.msra.mxu1 %v3919_v49 }
 0x9fe   : > { %6695 = vmatprep.subr.mxu0 %v3737_v10  ;;  %6719 = vmatprep.subr.mxu1 %v3918_v18 }
 0x9ff   : > { %6696 = vmatpush3.msra.mxu0 %v3737_v10  ;;  %6720 = vmatpush3.msra.mxu1 %v3918_v18  ;;  %v5510_v10 = vld [vmem:[#allocation6 + $0x1] ss:$0 sm:$0xff] }
 0xa00   : > { %6697 = vmatprep.subr.mxu0 %v3736_v12  ;;  %6721 = vmatprep.subr.mxu1 %v3917_v58 }
 0xa01   : > { %6698 = vmatpush3.msra.mxu0 %v3736_v12  ;;  %6722 = vmatpush3.msra.mxu1 %v3917_v58 }
 0xa02   : > { %6699 = vmatprep.subr.mxu0 %v3735_v5  ;;  %6723 = vmatprep.subr.mxu1 %v3916_v61 }
 0xa03   : > { %6700 = vmatpush3.msra.mxu0 %v3735_v5  ;;  %6724 = vmatpush3.msra.mxu1 %v3916_v61 }
 0xa04   : > { %6701 = vmatprep.subr.mxu0 %v3734_v11  ;;  %6725 = vmatprep.subr.mxu1 %v3915_v33 }
 0xa05   : > { %6702 = vmatpush3.msra.mxu0 %v3734_v11  ;;  %6726 = vmatpush3.msra.mxu1 %v3915_v33 }
 0xa06   : > { %6703 = vmatprep.subr.mxu0 %v3733_v15  ;;  %6727 = vmatprep.subr.mxu1 %v3914_v21 }
 0xa07   : > { %6704 = vmatpush3.msra.mxu0 %v3733_v15  ;;  %6728 = vmatpush3.msra.mxu1 %v3914_v21 }
 0xa08   : > { %6705 = vmatprep.subr.mxu0 %v3732_v9  ;;  %6729 = vmatprep.subr.mxu1 %v3913_v60 }
 0xa09   : > { %6706 = vmatpush3.msra.mxu0 %v3732_v9  ;;  %6730 = vmatpush3.msra.mxu1 %v3913_v60  ;;  %v4106_v60 = vld [vmem:[#allocation9 + $0x2f0] sm:$0xff] }
 0xa0a   : > { %6707 = vmatprep.subr.mxu0 %v3731_v53  ;;  %6731 = vmatprep.subr.mxu1 %v3912_v43 }
 0xa0b   : > { %6708 = vmatpush3.msra.mxu0 %v3731_v53  ;;  %6732 = vmatpush3.msra.mxu1 %v3912_v43 }
 0xa0c   : > { %6710 = vmatmul.mubr.f32.vlgmr.msra.gmra.mxu0 %v3524_v26  ;;  %6753 = vmatprep.subr.mxu0 %v3903_v31 }
 0xa0d   : > { %6712 = vmatprep.mubr.f32.mxu0 %v3525_v38  ;;  %6754 = vmatpush3.msra.mxu0 %v3903_v31 }
 0xa0e   : > { %6755 = vmatprep.subr.mxu0 %v3902_v39  ;;  %6733 = vmatprep.subr.mxu1 %v3911_v51 }
 0xa0f   : > { %6756 = vmatpush3.msra.mxu0 %v3902_v39  ;;  %6734 = vmatpush3.msra.mxu1 %v3911_v51 }
 0xa10   : > { %6713 = vmatmul.mubr.f32.gmra.mxu0 %v3526_v41  ;;  %6757 = vmatprep.subr.mxu0 %v3901_v40 }
 0xa11   : > { %6758 = vmatpush3.msra.mxu0 %v3901_v40  ;;  %6735 = vmatprep.subr.mxu1 %v3910_v52 }
 0xa12   : > { %6759 = vmatprep.subr.mxu0 %v3900_v42  ;;  %6736 = vmatpush3.msra.mxu1 %v3910_v52 }
 0xa13   : > { %6760 = vmatpush3.msra.mxu0 %v3900_v42  ;;  %6737 = vmatprep.subr.mxu1 %v3909_v62  ;;  %v5515_v42 = vld [vmem:[#allocation11] ss:$0 sm:$0xff] }
 0xa14   : > { %6761 = vmatprep.subr.mxu0 %v3899_v0  ;;  %6738 = vmatpush3.msra.mxu1 %v3909_v62  ;;  %v4105_v62 = vld [vmem:[#allocation9 + $0x2e8] sm:$0xff] }
 0xa15   : > { %6762 = vmatpush3.msra.mxu0 %v3899_v0  ;;  %6739 = vmatprep.subr.mxu1 %v3908_v13 }
 0xa16   : > { %6763 = vmatprep.subr.mxu0 %v3898_v37  ;;  %6740 = vmatpush3.msra.mxu1 %v3908_v13 }
 0xa17   : > { %6764 = vmatpush3.msra.mxu0 %v3898_v37  ;;  %6741 = vmatprep.subr.mxu1 %v3907_v3 }
 0xa18   : > { %6765 = vmatprep.subr.mxu0 %v3897_v45  ;;  %6742 = vmatpush3.msra.mxu1 %v3907_v3 }
 0xa19   : > { %6766 = vmatpush3.msra.mxu0 %v3897_v45  ;;  %6743 = vmatprep.subr.mxu1 %v3906_v17 }
 0xa1a   : > { %6767 = vmatprep.subr.mxu0 %v3896_v46  ;;  %6744 = vmatpush3.msra.mxu1 %v3906_v17 }
 0xa1b   : > { %6768 = vmatpush3.msra.mxu0 %v3896_v46  ;;  %6745 = vmatprep.subr.mxu1 %v3905_v63 }
 0xa1c   : > { %6769 = vmatprep.subr.mxu0 %v3895_v54  ;;  %6746 = vmatpush3.msra.mxu1 %v3905_v63 }
 0xa1d   : > { %6770 = vmatpush3.msra.mxu0 %v3895_v54  ;;  %6791 = vmatprep.subr.mxu1 %v4107_v16 }
 0xa1e   : > { %6771 = vmatprep.subr.mxu0 %v3894_v55 }
 0xa1f   : > { %6772 = vmatpush3.msra.mxu0 %v3894_v55 }
 0xa20   : > { %6773 = vmatprep.subr.mxu0 %v3893_v56 }
 0xa21   : > { %6774 = vmatpush3.msra.mxu0 %v3893_v56 }
 0xa22   : > { %6775 = vmatprep.subr.mxu0 %v3892_v57 }
 0xa23   : > { %6776 = vmatpush3.msra.mxu0 %v3892_v57 }
 0xa24   : > { %6777 = vmatprep.subr.mxu0 %v3891_v24 }
 0xa25   : > { %6778 = vmatpush3.msra.mxu0 %v3891_v24 }
 0xa26   : > { %6779 = vmatprep.subr.mxu0 %v3890_v44 }
 0xa27   : > { %6780 = vmatpush3.msra.mxu0 %v3890_v44 }
 0xa28   : > { %6781 = vmatprep.subr.mxu0 %v3889_v47 }
 0xa29   : > { %6782 = vmatpush3.msra.mxu0 %v3889_v47 }
 0xa2a   : > { %6783 = vmatprep.subr.mxu0 %v3888_v14 }
 0xa2b   : > { %6784 = vmatpush3.msra.mxu0 %v3888_v14 }
 0xa83   : > { %v6562_v1 = vpop.f32.mrf.mxu1 }
 0xa85   : > { %v3248_v4 = vpop.f32.mrf.mxu1 }
 0xa89   : > { %v6581_v2 = vpop.f32.mrf.mxu0 }
 0xa8a   : > { %v3335_v34 = vadd.f32 %v6581_v2, %v6562_v1 }
 0xa8b   : > { %v3329_v25 = vpop.f32.mrf.mxu0 }
 0xa8c   : > { %v3330_v12 = vadd.f32 %v3329_v25, %v3248_v4 }
 0xa93   : > { %v6600_v6 = vpop.f32.mrf.mxu1 }
 0xa94   : > { %v3428_v5 = vadd.f32 %v6600_v6, %v3335_v34  ;;  %v4103_v6 = vld [vmem:[#allocation9 + $0x2d8] sm:$0xff] }
 0xa95   : > { %v3418_v11 = vpop.f32.mrf.mxu1 }
 0xa96   : > { %v3435_v15 = vadd.f32 %v5510_v10, %v3428_v5  ;;  %v3427_v20 = vadd.f32 %v3418_v11, %v3330_v12  ;;  %v4102_v5 = vld [vmem:[#allocation9 + $0x2d0] sm:$0xff] }
 0xa98   : > { %v3434_v19 = vadd.f32 %v5510_v10, %v3427_v20  ;;  %v8900_v9 = vadd.f32 %v3435_v15, %v8687_v23  ;;  %v4101_v15 = vld [vmem:[#allocation9 + $0x2c8] sm:$0xff] }
 0xa9a   : > { %v3439_v28 = vmax.f32 %v8900_v9, 0.0  ;;  %v3436_v25 = vadd.f32 %v3434_v19, %v8692_v50  ;;  %v4210_v19 = vld [vmem:[%s9189_s14] sm:$0xff]  ;;  %v4099_v9 = vld [vmem:[#allocation9 + $0x2b8] sm:$0xff] }
 0xa9c   : > { %6829 = vmatprep.subr.mxu0 %v3439_v28  ;;  %v3438_v50 = vmax.f32 %v3436_v25, 0.0 }
 0xaaa   : > { %v6635_v53 = vpop.f32.mrf.mxu0 }
 0xaac   : > { %v3626_v31 = vpop.f32.mrf.mxu0 }
 0xaaf   : > { %v6638_v26 = vpop.f32.mrf.mxu0 }
 0xab1   : > { %v3636_v38 = vpop.f32.mrf.mxu0 }
 0xab7   : > { %v6673_v30 = vpop.f32.mrf.mxu1 }
 0xab8   : > { %v3717_v39 = vadd.f32 %v6673_v30, %v6635_v53  ;;  %v4100_v53 = vld [vmem:[#allocation9 + $0x2c0] sm:$0xff] }
 0xab9   : > { %v3711_v36 = vpop.f32.mrf.mxu1  ;;  %v4212_v30 = vld [vmem:[%s9189_s14 + $0x10] sm:$0xff] }
 0xaba   : > { %v3712_v0 = vadd.f32 %v3711_v36, %v3626_v31  ;;  %v4098_v31 = vld [vmem:[#allocation9 + $0x2b0] sm:$0xff]  ;;  %v4213_v36 = vld [vmem:[%s9189_s14 + $0x18] sm:$0xff] }
 0xabb   : > { %v6676_v40 = vpop.f32.mrf.mxu1 }
 0xabc   : > { %v3727_v23 = vadd.f32 %v6676_v40, %v6638_v26  ;;  %v4097_v26 = vld [vmem:[#allocation9 + $0x2a8] sm:$0xff] }
 0xabd   : > { %v3721_v46 = vpop.f32.mrf.mxu1 }
 0xabe   : > { %v3722_v47 = vadd.f32 %v3721_v46, %v3636_v38  ;;  %v4096_v38 = vld [vmem:[#allocation9 + $0x2a0] sm:$0xff] }
 0xacc   : > { %v6711_v41 = vpop.f32.mrf.mxu0 }
 0xacd   : > { %v3833_v37 = vadd.f32 %v6711_v41, %v3717_v39  ;;  %v4095_v39 = vld [vmem:[#allocation9 + $0x298] sm:$0xff]  ;;  %v4094_v41 = vld [vmem:[#allocation9 + $0x290] sm:$0xff] }
 0xace   : > { %v3813_v45 = vpop.f32.mrf.mxu0 }
 0xacf   : > { %v3842_v54 = vadd.f32 %v5515_v42, %v3833_v37  ;;  %v3832_v55 = vadd.f32 %v3813_v45, %v3712_v0  ;;  %v4092_v45 = vld [vmem:[#allocation9 + $0x280] sm:$0xff] }
 0xad0   : > { %v6714_v56 = vpop.f32.mrf.mxu0 }
 0xad1   : > { %v8905_v57 = vmax.f32 %v3842_v54, 0.0  ;;  %v3841_v24 = vadd.f32 %v5515_v42, %v3832_v55  ;;  %v3835_v44 = vadd.f32 %v6714_v56, %v3727_v23 }
 0xad2   : > { %v3823_v14 = vpop.f32.mrf.mxu0 }
 0xad3   : > { %v8907_v48 = vmax.f32 %v3841_v24, 0.0  ;;  %v3844_v49 = vadd.f32 %v5515_v42, %v3835_v44  ;;  %v3834_v18 = vadd.f32 %v3823_v14, %v3722_v47  ;;  %v3871_v58 = vrot.slane %v8905_v57, 1  ;;  %v4318_v24 = vld [vmem:[%s9190_s15 + $0x30] sm:$0xff]  ;;  %v4317_v44 = vld [vmem:[%s9190_s15 + $0x28] sm:$0xff]  ;;  %v4316_v47 = vld [vmem:[%s9190_s15 + $0x20] sm:$0xff] }
 0xad4   : > { %v3856_v51 = vrot.slane %v8905_v57, 7  ;;  %v4315_v14 = vld [vmem:[%s9190_s15 + $0x18] sm:$0xff] }
 0xad5   : > { %v3855_v61 = vrot.slane %v8907_v48, 7  ;;  %v3870_v33 = vrot.slane %v8907_v48, 1  ;;  %v8912_v21 = vmax.f32 %v3844_v49, 0.0  ;;  %6747 = vmatprep.mubr.f32.mxu1 %v8907_v48  ;;  %v3843_v43 = vadd.f32 %v5515_v42, %v3834_v18  ;;  %v4093_v42 = vld [vmem:[#allocation9 + $0x288] sm:$0xff]  ;;  %v4314_v48 = vld [vmem:[%s9190_s15 + $0x10] sm:$0xff]  ;;  %v4313_v49 = vld [vmem:[%s9190_s15 + $0x8] sm:$0xff] }
 0xad6   : > { %6748 = vmatmul.mubr.f32.vlgmr.msra.gmra.mxu1 %v8905_v57  ;;  %v4319_v57 = vld [vmem:[%s9190_s15 + $0x38] sm:$0xff]  ;;  %v4312_v18 = vld [vmem:[%s9190_s15] sm:$0xff] }
 0xad7   : > { %v3850_v52 = vrot.slane %v8912_v21, 7  ;;  %6792 = vmatpush3.msra.mxu1 %v4107_v16  ;;  %v3872_v13 = vsel %vm831_vm2, %v3870_v33, %v3871_v58  ;;  %v8923_v3 = vmax.f32 %v3843_v43, 0.0  ;;  %v3857_v63 = vsel %vm811_vm1, %v3855_v61, %v3856_v51  ;;  %v4104_v16 = vld [vmem:[#allocation9 + $0x2e0] sm:$0xff]  ;;  %v4484_v43 = vld [vmem:[#allocation9 + $0x3d8] sm:$0xff] }
 0xad8   : > { %6793 = vmatprep.subr.mxu1 %v4106_v60  ;;  %v3883_v17 = vmul.f32 %v3872_v13, %v8861_v7  ;;  %v3867_v34 = vmul.f32 %v3857_v63, %v8850_v8  ;;  %v3875_v0 = vrot.slane %v8912_v21, 1  ;;  %v4480_v13 = vld [vmem:[#allocation9 + $0x3b8] sm:$0xff]  ;;  %v4477_v63 = vld [vmem:[#allocation9 + $0x3a0] sm:$0xff] }
 0xad9   : > { %6794 = vmatpush3.msra.mxu1 %v4106_v60  ;;  %v3865_v1 = vsel %vm811_vm1, %v3850_v52, %v3855_v61  ;;  %v3858_v2 = vrot.slane %v8923_v3, 7  ;;  %6750 = vmatprep.mubr.f32.mxu1 %v8923_v3  ;;  %v3873_v40 = vrot.slane %v8923_v3, 1  ;;  %v4487_v61 = vld [vmem:[#allocation9 + $0x3f0] sm:$0xff]  ;;  %v4485_v60 = vld [vmem:[#allocation9 + $0x3e0] sm:$0xff] }
 0xada   : > { %6795 = vmatprep.subr.mxu1 %v4105_v62  ;;  %v3866_v4 = vmul.f32 %v3865_v1, %v8839_v27  ;;  %6751 = vmatmul.mubr.f32.gmra.mxu1 %v8912_v21  ;;  %v3882_v55 = vsel %vm831_vm2, %v3875_v0, %v3870_v33  ;;  %v4471_v33 = vld [vmem:[#allocation9 + $0x378] sm:$0xff]  ;;  %v4486_v21 = vld [vmem:[#allocation9 + $0x3e8] sm:$0xff]  ;;  %v4479_v3 = vld [vmem:[#allocation9 + $0x3b0] sm:$0xff] }
 0xadb   : > { %6796 = vmatpush3.msra.mxu1 %v4105_v62  ;;  %6823 = vmatprep.mubr.f32.mxu1 %v3883_v17  ;;  %v3859_v10 = vsel %vm811_vm1, %v3856_v51, %v3858_v2  ;;  %v3860_v11 = vsel %vm811_vm1, %v3858_v2, %v3850_v52  ;;  %v3874_v37 = vsel %vm831_vm2, %v3871_v58, %v3873_v40  ;;  %v4488_v58 = vld [vmem:[#allocation9 + $0x3f8] sm:$0xff]  ;;  %v4483_v51 = vld [vmem:[#allocation9 + $0x3d0] sm:$0xff]  ;;  %v4482_v52 = vld [vmem:[#allocation9 + $0x3c8] sm:$0xff] }
 0xadc   : > { %6797 = vmatprep.subr.mxu1 %v4104_v16  ;;  %6785 = vmatprep.mubr.f32.mxu0 %v3866_v4  ;;  %v3868_v12 = vmul.f32 %v3859_v10, %v8873_v22  ;;  %v3869_v20 = vmul.f32 %v3860_v11, %v8880_v32  ;;  %v3876_v23 = vsel %vm831_vm2, %v3873_v40, %v3875_v0  ;;  %v4481_v62 = vld [vmem:[#allocation9 + $0x3c0] sm:$0xff]  ;;  %v4478_v17 = vld [vmem:[#allocation9 + $0x3a8] sm:$0xff]  ;;  %v4476_v1 = vld [vmem:[#allocation9 + $0x398] sm:$0xff] }
 0xadd   : > { %6798 = vmatpush3.msra.mxu1 %v4104_v16  ;;  %6786 = vmatmul.mubr.f32.vlgmr.msra.gmra.mxu0 %v3867_v34  ;;  %v3884_v46 = vmul.f32 %v3874_v37, %v8867_v59  ;;  %v3885_v54 = vmul.f32 %v3876_v23, %v8888_v29  ;;  %v3886_v56 = vmul.f32 %v3882_v55, %v8892_v35  ;;  %v4475_v2 = vld [vmem:[#allocation9 + $0x390] sm:$0xff]  ;;  %v4469_v11 = vld [vmem:[#allocation9 + $0x368] sm:$0xff]  ;;  %v4675_v40 = vld [vmem:[#allocation9 + $0x478] sm:$0xff] }
 0xade   : > { %6799 = vmatprep.subr.mxu1 %v4103_v6  ;;  %6830 = vmatpush3.msra.mxu0 %v3439_v28  ;;  %v4211_v28 = vld [vmem:[%s9189_s14 + $0x8] sm:$0xff]  ;;  %v4456_v0 = vld [vmem:[#allocation9 + $0x300] sm:$0xff] }
 0xadf   : > { %6788 = vmatprep.mubr.f32.mxu0 %v3868_v12  ;;  %6800 = vmatpush3.msra.mxu1 %v4103_v6  ;;  %v4470_v12 = vld [vmem:[#allocation9 + $0x370] sm:$0xff] }
 0xae0   : > { %6831 = vmatprep.subr.mxu0 %v3438_v50  ;;  %6801 = vmatprep.subr.mxu1 %v4102_v5 }
 0xae1   : > { %6832 = vmatpush3.msra.mxu0 %v3438_v50  ;;  %6802 = vmatpush3.msra.mxu1 %v4102_v5 }
 0xae2   : > { %6789 = vmatmul.mubr.f32.gmra.mxu0 %v3869_v20  ;;  %6803 = vmatprep.subr.mxu1 %v4101_v15  ;;  %v4467_v20 = vld [vmem:[#allocation9 + $0x358] sm:$0xff] }
 0xae3   : > { %6804 = vmatpush3.msra.mxu1 %v4101_v15  ;;  %6833 = vmatprep.mubr.msk.f32.mxu0 %vm4214_vm6, %v4210_v19  ;;  %v4468_v15 = vld [vmem:[#allocation9 + $0x360] sm:$0xff]  ;;  %v4466_v19 = vld [vmem:[#allocation9 + $0x350] sm:$0xff] }
 0xae4   : > { %6805 = vmatprep.subr.mxu1 %v4100_v53  ;;  %6861 = vmatprep.subr.mxu0 %v4488_v58 }
 0xae5   : > { %6806 = vmatpush3.msra.mxu1 %v4100_v53  ;;  %v4465_v53 = vld [vmem:[#allocation9 + $0x348] sm:$0xff] }
 0xae6   : > { %6807 = vmatprep.subr.mxu1 %v4099_v9  ;;  %6834 = vmatmul.mubr.msk.f32.vlgmr.msra.gmra.mxu0 %vm4214_vm6, %v4211_v28  ;;  %v4463_v28 = vld [vmem:[#allocation9 + $0x338] sm:$0xff] }
 0xae7   : > { %6808 = vmatpush3.msra.mxu1 %v4099_v9  ;;  %6836 = vmatprep.mubr.msk.f32.mxu0 %vm4214_vm6, %v4212_v30  ;;  %v4464_v9 = vld [vmem:[#allocation9 + $0x340] sm:$0xff]  ;;  %v4462_v30 = vld [vmem:[#allocation9 + $0x330] sm:$0xff] }
 0xae8   : > { %6809 = vmatprep.subr.mxu1 %v4098_v31  ;;  %6862 = vmatpush3.msra.mxu0 %v4488_v58 }
 0xae9   : > { %6810 = vmatpush3.msra.mxu1 %v4098_v31  ;;  %6863 = vmatprep.subr.mxu0 %v4487_v61  ;;  %v4474_v31 = vld [vmem:[#allocation9 + $0x388] sm:$0xff] }
 0xaea   : > { %6811 = vmatprep.subr.mxu1 %v4097_v26  ;;  %6837 = vmatmul.mubr.msk.f32.gmra.mxu0 %vm4214_vm6, %v4213_v36  ;;  %v4473_v36 = vld [vmem:[#allocation9 + $0x380] sm:$0xff] }
 0xaeb   : > { %6812 = vmatpush3.msra.mxu1 %v4097_v26  ;;  %6864 = vmatpush3.msra.mxu0 %v4487_v61  ;;  %v4461_v26 = vld [vmem:[#allocation9 + $0x328] sm:$0xff] }
 0xaec   : > { %6813 = vmatprep.subr.mxu1 %v4096_v38  ;;  %6865 = vmatprep.subr.mxu0 %v4486_v21 }
 0xaed   : > { %6814 = vmatpush3.msra.mxu1 %v4096_v38  ;;  %6866 = vmatpush3.msra.mxu0 %v4486_v21  ;;  %v4460_v38 = vld [vmem:[#allocation9 + $0x320] sm:$0xff] }
 0xaee   : > { %6815 = vmatprep.subr.mxu1 %v4095_v39  ;;  %6867 = vmatprep.subr.mxu0 %v4485_v60 }
 0xaef   : > { %6816 = vmatpush3.msra.mxu1 %v4095_v39  ;;  %6868 = vmatpush3.msra.mxu0 %v4485_v60  ;;  %v4459_v39 = vld [vmem:[#allocation9 + $0x318] sm:$0xff] }
 0xaf0   : > { %6817 = vmatprep.subr.mxu1 %v4094_v41  ;;  %6869 = vmatprep.subr.mxu0 %v4484_v43 }
 0xaf1   : > { %6818 = vmatpush3.msra.mxu1 %v4094_v41  ;;  %6870 = vmatpush3.msra.mxu0 %v4484_v43  ;;  %v4458_v41 = vld [vmem:[#allocation9 + $0x310] sm:$0xff] }
 0xaf2   : > { %6819 = vmatprep.subr.mxu1 %v4093_v42  ;;  %6871 = vmatprep.subr.mxu0 %v4483_v51 }
 0xaf3   : > { %6820 = vmatpush3.msra.mxu1 %v4093_v42  ;;  %6872 = vmatpush3.msra.mxu0 %v4483_v51  ;;  %v4457_v42 = vld [vmem:[#allocation9 + $0x308] sm:$0xff] }
 0xaf4   : > { %6821 = vmatprep.subr.mxu1 %v4092_v45  ;;  %6873 = vmatprep.subr.mxu0 %v4482_v52 }
 0xaf5   : > { %6822 = vmatpush3.msra.mxu1 %v4092_v45  ;;  %6874 = vmatpush3.msra.mxu0 %v4482_v52 }
 0xaf6   : > { %6824 = vmatmul.mubr.f32.vlgmr.msra.gmra.mxu1 %v3884_v46  ;;  %6839 = vmatprep.subr.mxu1 %v4319_v57 }
 0xaf7   : > { %6826 = vmatprep.mubr.f32.mxu1 %v3885_v54  ;;  %6840 = vmatpush3.msra.mxu1 %v4319_v57 }
 0xaf8   : > { %6841 = vmatprep.subr.mxu1 %v4318_v24  ;;  %6875 = vmatprep.subr.mxu0 %v4481_v62 }
 0xaf9   : > { %6842 = vmatpush3.msra.mxu1 %v4318_v24  ;;  %6876 = vmatpush3.msra.mxu0 %v4481_v62 }
 0xafa   : > { %6827 = vmatmul.mubr.f32.gmra.mxu1 %v3886_v56  ;;  %6843 = vmatprep.subr.mxu1 %v4317_v44 }
 0xafb   : > { %6844 = vmatpush3.msra.mxu1 %v4317_v44  ;;  %6877 = vmatprep.subr.mxu0 %v4480_v13 }
 0xafc   : > { %6845 = vmatprep.subr.mxu1 %v4316_v47  ;;  %6878 = vmatpush3.msra.mxu0 %v4480_v13 }
 0xafd   : > { %6846 = vmatpush3.msra.mxu1 %v4316_v47  ;;  %6879 = vmatprep.subr.mxu0 %v4479_v3 }
 0xafe   : > { %6847 = vmatprep.subr.mxu1 %v4315_v14  ;;  %6880 = vmatpush3.msra.mxu0 %v4479_v3 }
 0xaff   : > { %6848 = vmatpush3.msra.mxu1 %v4315_v14  ;;  %6881 = vmatprep.subr.mxu0 %v4478_v17  ;;  %v5516_v14 = vld [vmem:[#allocation11 + $0x1] ss:$0 sm:$0xff] }
 0xb00   : > { %6849 = vmatprep.subr.mxu1 %v4314_v48  ;;  %6882 = vmatpush3.msra.mxu0 %v4478_v17 }
 0xb01   : > { %6850 = vmatpush3.msra.mxu1 %v4314_v48  ;;  %6883 = vmatprep.subr.mxu0 %v4477_v63 }
 0xb02   : > { %6851 = vmatprep.subr.mxu1 %v4313_v49  ;;  %6884 = vmatpush3.msra.mxu0 %v4477_v63 }
 0xb03   : > { %6852 = vmatpush3.msra.mxu1 %v4313_v49  ;;  %6885 = vmatprep.subr.mxu0 %v4476_v1 }
 0xb04   : > { %6853 = vmatprep.subr.mxu1 %v4312_v18  ;;  %6886 = vmatpush3.msra.mxu0 %v4476_v1 }
 0xb05   : > { %6854 = vmatpush3.msra.mxu1 %v4312_v18  ;;  %6887 = vmatprep.subr.mxu0 %v4475_v2 }
 0xb06   : > { %6899 = vmatprep.subr.mxu1 %v4471_v33  ;;  %6888 = vmatpush3.msra.mxu0 %v4475_v2 }
 0xb07   : > { %6889 = vmatprep.subr.mxu0 %v4474_v31 }
 0xb08   : > { %6890 = vmatpush3.msra.mxu0 %v4474_v31 }
 0xb09   : > { %6891 = vmatprep.subr.mxu0 %v4473_v36 }
 0xb0a   : > { %6892 = vmatpush3.msra.mxu0 %v4473_v36 }
 0xb0b   : > { %6937 = vmatprep.subr.mxu0 %v4675_v40 }
 0xb96   : > { %v6749_v37 = vpop.f32.mrf.mxu1 }
 0xb98   : > { %v3987_v45 = vpop.f32.mrf.mxu1 }
 0xb9a   : > { %v6752_v23 = vpop.f32.mrf.mxu1 }
 0xb9c   : > { %v3997_v46 = vpop.f32.mrf.mxu1 }
 0xb9d   : > { %v8992_v16 = vpop.f32.mrf.mxu0 }
 0xb9e   : > { %v4078_v56 = vadd.f32 %v8992_v16, %v6749_v37  ;;  %v4667_v37 = vld [vmem:[#allocation9 + $0x438] sm:$0xff] }
 0xb9f   : > { %v8994_v4 = vpop.f32.mrf.mxu0 }
 0xba0   : > { %v4073_v24 = vadd.f32 %v8994_v4, %v3987_v45  ;;  %v4666_v45 = vld [vmem:[#allocation9 + $0x430] sm:$0xff] }
 0xba2   : > { %v8996_v25 = vpop.f32.mrf.mxu0 }
 0xba3   : > { %v4088_v47 = vadd.f32 %v8996_v25, %v6752_v23  ;;  %v4665_v23 = vld [vmem:[#allocation9 + $0x428] sm:$0xff] }
 0xba4   : > { %v8998_v34 = vpop.f32.mrf.mxu0 }
 0xba5   : > { %v4083_v18 = vadd.f32 %v8998_v34, %v3997_v46  ;;  %v4674_v34 = vld [vmem:[#allocation9 + $0x470] sm:$0xff]  ;;  %v4664_v46 = vld [vmem:[#allocation9 + $0x420] sm:$0xff] }
 0xba6   : > { %v6835_v6 = vpop.f32.mrf.mxu0 }
 0xba8   : > { %v4293_v10 = vpop.f32.mrf.mxu0 }
 0xba9   : > { %6855 = vmatprep.mubr.msk.f32.mxu1 %vm871_vm0, %v4293_v10 }
 0xbaa   : > { %v6838_v5 = vpop.f32.mrf.mxu0  ;;  %6856 = vmatmul.mubr.msk.f32.vlgmr.msra.gmra.mxu1 %vm871_vm0, %v6835_v6 }
 0xbab   : > { %6900 = vmatpush3.msra.mxu1 %v4471_v33 }
 0xbac   : > { %v4303_v50 = vpop.f32.mrf.mxu0  ;;  %6901 = vmatprep.subr.mxu1 %v4470_v12 }
 0xbad   : > { %6858 = vmatprep.mubr.msk.f32.mxu1 %vm871_vm0, %v4303_v50  ;;  %6902 = vmatpush3.msra.mxu1 %v4470_v12  ;;  %v4673_v50 = vld [vmem:[#allocation9 + $0x468] sm:$0xff] }
 0xbae   : > { %6859 = vmatmul.mubr.msk.f32.gmra.mxu1 %vm871_vm0, %v6838_v5  ;;  %6903 = vmatprep.subr.mxu1 %v4469_v11 }
 0xbaf   : > { %6904 = vmatpush3.msra.mxu1 %v4469_v11 }
 0xbb0   : > { %6905 = vmatprep.subr.mxu1 %v4468_v15 }
 0xbb1   : > { %6906 = vmatpush3.msra.mxu1 %v4468_v15 }
 0xbb2   : > { %6907 = vmatprep.subr.mxu1 %v4467_v20 }
 0xbb3   : > { %6908 = vmatpush3.msra.mxu1 %v4467_v20 }
 0xbb4   : > { %6909 = vmatprep.subr.mxu1 %v4466_v19 }
 0xbb5   : > { %6910 = vmatpush3.msra.mxu1 %v4466_v19 }
 0xbb6   : > { %6911 = vmatprep.subr.mxu1 %v4465_v53  ;;  %v6825_v54 = vpop.f32.mrf.mxu1 }
 0xbb7   : > { %6912 = vmatpush3.msra.mxu1 %v4465_v53  ;;  %v4194_v44 = vadd.f32 %v6825_v54, %v4078_v56  ;;  %v4672_v53 = vld [vmem:[#allocation9 + $0x460] sm:$0xff]  ;;  %v4663_v54 = vld [vmem:[#allocation9 + $0x418] sm:$0xff]  ;;  %v4662_v56 = vld [vmem:[#allocation9 + $0x410] sm:$0xff] }
 0xbb8   : > { %6913 = vmatprep.subr.mxu1 %v4464_v9  ;;  %v4174_v55 = vpop.f32.mrf.mxu1 }
 0xbb9   : > { %6914 = vmatpush3.msra.mxu1 %v4464_v9  ;;  %v4193_v48 = vadd.f32 %v4174_v55, %v4073_v24  ;;  %v9008_v61 = vadd.f32 %v5516_v14, %v4194_v44 }
 0xbba   : > { %6915 = vmatprep.subr.mxu1 %v4463_v28  ;;  %v6828_v57 = vpop.f32.mrf.mxu1 }
 0xbbb   : > { %6916 = vmatpush3.msra.mxu1 %v4463_v28  ;;  %v4196_v58 = vadd.f32 %v6828_v57, %v4088_v47  ;;  %v9010_v33 = vadd.f32 %v5516_v14, %v4193_v48  ;;  %v4207_v43 = vmax.f32 %v9008_v61, 0.0  ;;  %v4661_v57 = vld [vmem:[#allocation9 + $0x408] sm:$0xff]  ;;  %v4660_v47 = vld [vmem:[#allocation9 + $0x400] sm:$0xff] }
 0xbbc   : > { %6917 = vmatprep.subr.mxu1 %v4462_v30  ;;  %v4184_v49 = vpop.f32.mrf.mxu1 }
 0xbbd   : > { %6918 = vmatpush3.msra.mxu1 %v4462_v30  ;;  %v4195_v21 = vadd.f32 %v4184_v49, %v4083_v18  ;;  %v9012_v60 = vadd.f32 %v5516_v14, %v4196_v58  ;;  %v4206_v62 = vmax.f32 %v9010_v33, 0.0 }
 0xbbe   : > { %6919 = vmatprep.subr.mxu1 %v4461_v26 }
 0xbbf   : > { %6920 = vmatpush3.msra.mxu1 %v4461_v26  ;;  %v9015_v52 = vadd.f32 %v5516_v14, %v4195_v21  ;;  %v4209_v63 = vmax.f32 %v9012_v60, 0.0  ;;  %v4671_v26 = vld [vmem:[#allocation9 + $0x458] sm:$0xff] }
 0xbc0   : > { %6921 = vmatprep.subr.mxu1 %v4460_v38  ;;  %v4849_v21 = vld [vmem:[#allocation9 + $0x578] sm:$0xff] }
 0xbc1   : > { %6922 = vmatpush3.msra.mxu1 %v4460_v38  ;;  %v4208_v25 = vmax.f32 %v9015_v52, 0.0 }
 0xbc2   : > { %6923 = vmatprep.subr.mxu1 %v4459_v39 }
 0xbc3   : > { %6924 = vmatpush3.msra.mxu1 %v4459_v39 }
 0xbc4   : > { %6925 = vmatprep.subr.mxu1 %v4458_v41 }
 0xbc5   : > { %6926 = vmatpush3.msra.mxu1 %v4458_v41 }
 0xbc6   : > { %6927 = vmatprep.subr.mxu1 %v4457_v42 }
 0xbc7   : > { %6928 = vmatpush3.msra.mxu1 %v4457_v42  ;;  %v4669_v42 = vld [vmem:[#allocation9 + $0x448] sm:$0xff] }
 0xbc8   : > { %6929 = vmatprep.subr.mxu1 %v4456_v0 }
 0xbc9   : > { %6930 = vmatpush3.msra.mxu1 %v4456_v0  ;;  %v4668_v0 = vld [vmem:[#allocation9 + $0x440] sm:$0xff] }
 0xbca   : > { %6975 = vmatprep.subr.mxu1 %v4849_v21 }
 0xc6a   : > { %v6857_v51 = vpop.f32.mrf.mxu1 }
 0xc6b   : > { %v9020_v13 = vadd.f32 %v6857_v51, %v4207_v43  ;;  %v4848_v51 = vld [vmem:[#allocation9 + $0x570] sm:$0xff] }
 0xc6c   : > { %v4398_v3 = vpop.f32.mrf.mxu1 }
 0xc6d   : > { %v9024_v17 = vadd.f32 %v4398_v3, %v4206_v62  ;;  %v4424_v6 = vrot.slane %v9020_v13, 7  ;;  %v4439_v10 = vrot.slane %v9020_v13, 1  ;;  %v4846_v3 = vld [vmem:[#allocation9 + $0x560] sm:$0xff] }
 0xc6e   : > { %v6860_v1 = vpop.f32.mrf.mxu1 }
 0xc6f   : > { %v4423_v2 = vrot.slane %v9024_v17, 7  ;;  %v4438_v16 = vrot.slane %v9024_v17, 1  ;;  %v9031_v4 = vadd.f32 %v6860_v1, %v4209_v63  ;;  %6893 = vmatprep.mubr.f32.mxu0 %v9024_v17  ;;  %v4845_v1 = vld [vmem:[#allocation9 + $0x558] sm:$0xff]  ;;  %v4831_v17 = vld [vmem:[#allocation9 + $0x4f0] sm:$0xff] }
 0xc70   : > { %v4408_v12 = vpop.f32.mrf.mxu1  ;;  %6894 = vmatmul.mubr.f32.vlgmr.msra.gmra.mxu0 %v9020_v13  ;;  %v4847_v13 = vld [vmem:[#allocation9 + $0x568] sm:$0xff] }
 0xc71   : > { %v4418_v5 = vrot.slane %v9031_v4, 7  ;;  %v9041_v11 = vadd.f32 %v4408_v12, %v4208_v25  ;;  %6938 = vmatpush3.msra.mxu0 %v4675_v40  ;;  %v4425_v15 = vsel %vm811_vm1, %v4423_v2, %v4424_v6  ;;  %v4440_v20 = vsel %vm831_vm2, %v4438_v16, %v4439_v10  ;;  %v4670_v40 = vld [vmem:[#allocation9 + $0x450] sm:$0xff]  ;;  %v4828_v12 = vld [vmem:[#allocation9 + $0x4d8] sm:$0xff] }
 0xc72   : > { %6939 = vmatprep.subr.mxu0 %v4674_v34  ;;  %v4451_v9 = vmul.f32 %v4440_v20, %v8861_v7  ;;  %v4435_v31 = vmul.f32 %v4425_v15, %v8850_v8  ;;  %v4443_v24 = vrot.slane %v9031_v4, 1  ;;  %v4826_v15 = vld [vmem:[#allocation9 + $0x4c8] sm:$0xff] }
 0xc73   : > { %v4426_v19 = vrot.slane %v9041_v11, 7  ;;  %6940 = vmatpush3.msra.mxu0 %v4674_v34  ;;  %6896 = vmatprep.mubr.f32.mxu0 %v9041_v11  ;;  %v4433_v28 = vsel %vm811_vm1, %v4418_v5, %v4423_v2  ;;  %v4441_v55 = vrot.slane %v9041_v11, 1  ;;  %v4832_v2 = vld [vmem:[#allocation9 + $0x4f8] sm:$0xff]  ;;  %v4843_v34 = vld [vmem:[#allocation9 + $0x548] sm:$0xff]  ;;  %v4827_v11 = vld [vmem:[#allocation9 + $0x4d0] sm:$0xff] }
 0xc74   : > { %6941 = vmatprep.subr.mxu0 %v4673_v50  ;;  %6897 = vmatmul.mubr.f32.gmra.mxu0 %v9031_v4  ;;  %v4434_v30 = vmul.f32 %v4433_v28, %v8839_v27  ;;  %v4450_v18 = vsel %vm831_vm2, %v4443_v24, %v4438_v16  ;;  %v4844_v16 = vld [vmem:[#allocation9 + $0x550] sm:$0xff]  ;;  %v4830_v4 = vld [vmem:[#allocation9 + $0x4e8] sm:$0xff]  ;;  %v4824_v28 = vld [vmem:[#allocation9 + $0x4b8] sm:$0xff] }
 0xc75   : > { %6942 = vmatpush3.msra.mxu0 %v4673_v50  ;;  %6969 = vmatprep.mubr.f32.mxu0 %v4451_v9  ;;  %v4427_v36 = vsel %vm811_vm1, %v4424_v6, %v4426_v19  ;;  %v4428_v39 = vsel %vm811_vm1, %v4426_v19, %v4418_v5  ;;  %v4442_v44 = vsel %vm831_vm2, %v4439_v10, %v4441_v55  ;;  %v4829_v6 = vld [vmem:[#allocation9 + $0x4e0] sm:$0xff]  ;;  %v4841_v5 = vld [vmem:[#allocation9 + $0x538] sm:$0xff]  ;;  %v4840_v50 = vld [vmem:[#allocation9 + $0x530] sm:$0xff] }
 0xc76   : > { %6943 = vmatprep.subr.mxu0 %v4672_v53  ;;  %6931 = vmatprep.mubr.f32.mxu1 %v4434_v30  ;;  %v4436_v38 = vmul.f32 %v4427_v36, %v8873_v22  ;;  %v4437_v41 = vmul.f32 %v4428_v39, %v8880_v32  ;;  %v4444_v14 = vsel %vm831_vm2, %v4441_v55, %v4443_v24  ;;  %v4842_v10 = vld [vmem:[#allocation9 + $0x540] sm:$0xff]  ;;  %v4839_v20 = vld [vmem:[#allocation9 + $0x528] sm:$0xff]  ;;  %v4837_v9 = vld [vmem:[#allocation9 + $0x518] sm:$0xff] }
 0xc77   : > { %6944 = vmatpush3.msra.mxu0 %v4672_v53  ;;  %6932 = vmatmul.mubr.f32.vlgmr.msra.gmra.mxu1 %v4435_v31  ;;  %v4452_v48 = vmul.f32 %v4442_v44, %v8867_v59  ;;  %v4453_v49 = vmul.f32 %v4444_v14, %v8888_v29  ;;  %v4454_v58 = vmul.f32 %v4450_v18, %v8892_v35  ;;  %v4825_v19 = vld [vmem:[#allocation9 + $0x4c0] sm:$0xff]  ;;  %v4836_v30 = vld [vmem:[#allocation9 + $0x510] sm:$0xff]  ;;  %v4822_v36 = vld [vmem:[#allocation9 + $0x4a8] sm:$0xff] }
 0xc78   : > { %6945 = vmatprep.subr.mxu0 %v4671_v26  ;;  %6934 = vmatprep.mubr.f32.mxu1 %v4436_v38  ;;  %v4838_v53 = vld [vmem:[#allocation9 + $0x520] sm:$0xff]  ;;  %v4823_v31 = vld [vmem:[#allocation9 + $0x4b0] sm:$0xff] }
 0xc79   : > { %6946 = vmatpush3.msra.mxu0 %v4671_v26  ;;  %6976 = vmatpush3.msra.mxu1 %v4849_v21  ;;  %v4835_v26 = vld [vmem:[#allocation9 + $0x508] sm:$0xff]  ;;  %v4834_v38 = vld [vmem:[#allocation9 + $0x500] sm:$0xff] }
 0xc7a   : > { %6947 = vmatprep.subr.mxu0 %v4670_v40  ;;  %6977 = vmatprep.subr.mxu1 %v4848_v51  ;;  %v4821_v39 = vld [vmem:[#allocation9 + $0x4a0] sm:$0xff] }
 0xc7b   : > { %6948 = vmatpush3.msra.mxu0 %v4670_v40  ;;  %6935 = vmatmul.mubr.f32.gmra.mxu1 %v4437_v41  ;;  %v4820_v40 = vld [vmem:[#allocation9 + $0x498] sm:$0xff] }
 0xc7c   : > { %6949 = vmatprep.subr.mxu0 %v4669_v42  ;;  %6978 = vmatpush3.msra.mxu1 %v4848_v51  ;;  %v5036_v41 = vld [vmem:[#allocation9 + $0x5f8] sm:$0xff] }
 0xc7d   : > { %6950 = vmatpush3.msra.mxu0 %v4669_v42  ;;  %6979 = vmatprep.subr.mxu1 %v4847_v13  ;;  %v4819_v42 = vld [vmem:[#allocation9 + $0x490] sm:$0xff] }
 0xc7e   : > { %6951 = vmatprep.subr.mxu0 %v4668_v0  ;;  %6980 = vmatpush3.msra.mxu1 %v4847_v13 }
 0xc7f   : > { %6952 = vmatpush3.msra.mxu0 %v4668_v0  ;;  %6981 = vmatprep.subr.mxu1 %v4846_v3  ;;  %v4818_v0 = vld [vmem:[#allocation9 + $0x488] sm:$0xff] }
 0xc80   : > { %6953 = vmatprep.subr.mxu0 %v4667_v37  ;;  %6982 = vmatpush3.msra.mxu1 %v4846_v3 }
 0xc81   : > { %6954 = vmatpush3.msra.mxu0 %v4667_v37  ;;  %6983 = vmatprep.subr.mxu1 %v4845_v1  ;;  %v4817_v37 = vld [vmem:[#allocation9 + $0x480] sm:$0xff] }
 0xc82   : > { %6955 = vmatprep.subr.mxu0 %v4666_v45  ;;  %6984 = vmatpush3.msra.mxu1 %v4845_v1 }
 0xc83   : > { %6956 = vmatpush3.msra.mxu0 %v4666_v45  ;;  %6985 = vmatprep.subr.mxu1 %v4844_v16 }
 0xc84   : > { %6957 = vmatprep.subr.mxu0 %v4665_v23  ;;  %6986 = vmatpush3.msra.mxu1 %v4844_v16 }
 0xc85   : > { %6958 = vmatpush3.msra.mxu0 %v4665_v23  ;;  %6987 = vmatprep.subr.mxu1 %v4843_v34 }
 0xc86   : > { %6959 = vmatprep.subr.mxu0 %v4664_v46  ;;  %6988 = vmatpush3.msra.mxu1 %v4843_v34 }
 0xc87   : > { %6960 = vmatpush3.msra.mxu0 %v4664_v46  ;;  %6989 = vmatprep.subr.mxu1 %v4842_v10 }
 0xc88   : > { %6961 = vmatprep.subr.mxu0 %v4663_v54  ;;  %6990 = vmatpush3.msra.mxu1 %v4842_v10 }
 0xc89   : > { %6962 = vmatpush3.msra.mxu0 %v4663_v54  ;;  %6991 = vmatprep.subr.mxu1 %v4841_v5 }
 0xc8a   : > { %6963 = vmatprep.subr.mxu0 %v4662_v56  ;;  %6992 = vmatpush3.msra.mxu1 %v4841_v5 }
 0xc8b   : > { %6964 = vmatpush3.msra.mxu0 %v4662_v56  ;;  %6993 = vmatprep.subr.mxu1 %v4840_v50 }
 0xc8c   : > { %6965 = vmatprep.subr.mxu0 %v4661_v57  ;;  %6994 = vmatpush3.msra.mxu1 %v4840_v50  ;;  %v5035_v50 = vld [vmem:[#allocation9 + $0x5f0] sm:$0xff] }
 0xc8d   : > { %6966 = vmatpush3.msra.mxu0 %v4661_v57  ;;  %6995 = vmatprep.subr.mxu1 %v4839_v20 }
 0xc8e   : > { %6967 = vmatprep.subr.mxu0 %v4660_v47  ;;  %6996 = vmatpush3.msra.mxu1 %v4839_v20 }
 0xc8f   : > { %6968 = vmatpush3.msra.mxu0 %v4660_v47  ;;  %6997 = vmatprep.subr.mxu1 %v4838_v53  ;;  %v5525_v47 = vld [vmem:[#allocation11 + $0x2] ss:$0 sm:$0xff] }
 0xc90   : > { %6970 = vmatmul.mubr.f32.vlgmr.msra.gmra.mxu0 %v4452_v48  ;;  %7013 = vmatprep.subr.mxu0 %v4832_v2 }
 0xc91   : > { %6972 = vmatprep.mubr.f32.mxu0 %v4453_v49  ;;  %7014 = vmatpush3.msra.mxu0 %v4832_v2 }
 0xc92   : > { %7015 = vmatprep.subr.mxu0 %v4831_v17  ;;  %6998 = vmatpush3.msra.mxu1 %v4838_v53  ;;  %v5034_v53 = vld [vmem:[#allocation9 + $0x5e8] sm:$0xff] }
 0xc93   : > { %7016 = vmatpush3.msra.mxu0 %v4831_v17  ;;  %6999 = vmatprep.subr.mxu1 %v4837_v9 }
 0xc94   : > { %6973 = vmatmul.mubr.f32.gmra.mxu0 %v4454_v58  ;;  %7017 = vmatprep.subr.mxu0 %v4830_v4 }
 0xc95   : > { %7018 = vmatpush3.msra.mxu0 %v4830_v4  ;;  %7000 = vmatpush3.msra.mxu1 %v4837_v9 }
 0xc96   : > { %7019 = vmatprep.subr.mxu0 %v4829_v6  ;;  %7001 = vmatprep.subr.mxu1 %v4836_v30 }
 0xc97   : > { %7020 = vmatpush3.msra.mxu0 %v4829_v6  ;;  %7002 = vmatpush3.msra.mxu1 %v4836_v30 }
 0xc98   : > { %7021 = vmatprep.subr.mxu0 %v4828_v12  ;;  %7003 = vmatprep.subr.mxu1 %v4835_v26 }
 0xc99   : > { %7022 = vmatpush3.msra.mxu0 %v4828_v12  ;;  %7004 = vmatpush3.msra.mxu1 %v4835_v26 }
 0xc9a   : > { %7023 = vmatprep.subr.mxu0 %v4827_v11  ;;  %7005 = vmatprep.subr.mxu1 %v4834_v38 }
 0xc9b   : > { %7024 = vmatpush3.msra.mxu0 %v4827_v11  ;;  %7006 = vmatpush3.msra.mxu1 %v4834_v38  ;;  %v5033_v38 = vld [vmem:[#allocation9 + $0x5e0] sm:$0xff] }
 0xc9c   : > { %7025 = vmatprep.subr.mxu0 %v4826_v15  ;;  %7051 = vmatprep.subr.mxu1 %v5036_v41 }
 0xc9d   : > { %7026 = vmatpush3.msra.mxu0 %v4826_v15 }
 0xc9e   : > { %7027 = vmatprep.subr.mxu0 %v4825_v19 }
 0xc9f   : > { %7028 = vmatpush3.msra.mxu0 %v4825_v19 }
 0xca0   : > { %7029 = vmatprep.subr.mxu0 %v4824_v28 }
 0xca1   : > { %7030 = vmatpush3.msra.mxu0 %v4824_v28 }
 0xca2   : > { %7031 = vmatprep.subr.mxu0 %v4823_v31 }
 0xca3   : > { %7032 = vmatpush3.msra.mxu0 %v4823_v31 }
 0xca4   : > { %7033 = vmatprep.subr.mxu0 %v4822_v36 }
 0xca5   : > { %7034 = vmatpush3.msra.mxu0 %v4822_v36 }
 0xca6   : > { %7035 = vmatprep.subr.mxu0 %v4821_v39 }
 0xca7   : > { %7036 = vmatpush3.msra.mxu0 %v4821_v39 }
 0xca8   : > { %7037 = vmatprep.subr.mxu0 %v4820_v40 }
 0xca9   : > { %7038 = vmatpush3.msra.mxu0 %v4820_v40 }
 0xcaa   : > { %7039 = vmatprep.subr.mxu0 %v4819_v42 }
 0xcab   : > { %7040 = vmatpush3.msra.mxu0 %v4819_v42 }
 0xcac   : > { %7041 = vmatprep.subr.mxu0 %v4818_v0 }
 0xcad   : > { %7042 = vmatpush3.msra.mxu0 %v4818_v0 }
 0xcae   : > { %7043 = vmatprep.subr.mxu0 %v4817_v37 }
 0xcaf   : > { %7044 = vmatpush3.msra.mxu0 %v4817_v37  ;;  %v5031_v37 = vld [vmem:[#allocation9 + $0x5d0] sm:$0xff] }
 0xd30   : > { %v6895_v45 = vpop.f32.mrf.mxu0 }
 0xd32   : > { %v4555_v23 = vpop.f32.mrf.mxu0 }
 0xd34   : > { %v6898_v54 = vpop.f32.mrf.mxu0 }
 0xd36   : > { %v4565_v56 = vpop.f32.mrf.mxu0 }
 0xd37   : > { %v6933_v46 = vpop.f32.mrf.mxu1 }
 0xd38   : > { %v4646_v57 = vadd.f32 %v6933_v46, %v6895_v45  ;;  %v5030_v45 = vld [vmem:[#allocation9 + $0x5c8] sm:$0xff] }
 0xd39   : > { %v4640_v55 = vpop.f32.mrf.mxu1  ;;  %v5026_v46 = vld [vmem:[#allocation9 + $0x5a8] sm:$0xff] }
 0xd3a   : > { %v4641_v14 = vadd.f32 %v4640_v55, %v4555_v23  ;;  %v5028_v23 = vld [vmem:[#allocation9 + $0x5b8] sm:$0xff] }
 0xd3b   : > { %v6936_v24 = vpop.f32.mrf.mxu1 }
 0xd3c   : > { %v4656_v18 = vadd.f32 %v6936_v24, %v6898_v54  ;;  %v5025_v54 = vld [vmem:[#allocation9 + $0x5a0] sm:$0xff] }
 0xd3d   : > { %v4650_v58 = vpop.f32.mrf.mxu1 }
 0xd3e   : > { %v4651_v17 = vadd.f32 %v4650_v58, %v4565_v56  ;;  %v5023_v56 = vld [vmem:[#allocation9 + $0x590] sm:$0xff] }
 0xd50   : > { %v6971_v44 = vpop.f32.mrf.mxu0 }
 0xd51   : > { %v4762_v48 = vadd.f32 %v6971_v44, %v4646_v57  ;;  %v5022_v57 = vld [vmem:[#allocation9 + $0x588] sm:$0xff] }
 0xd52   : > { %v4742_v49 = vpop.f32.mrf.mxu0 }
 0xd53   : > { %v4771_v21 = vadd.f32 %v5525_v47, %v4762_v48  ;;  %v4761_v51 = vadd.f32 %v4742_v49, %v4641_v14 }
 0xd54   : > { %v6974_v13 = vpop.f32.mrf.mxu0 }
 0xd55   : > { %v9072_v3 = vmax.f32 %v4771_v21, 0.0  ;;  %v4770_v1 = vadd.f32 %v5525_v47, %v4761_v51  ;;  %v4764_v2 = vadd.f32 %v6974_v13, %v4656_v18 }
 0xd56   : > { %v4752_v16 = vpop.f32.mrf.mxu0 }
 0xd57   : > { %v9074_v4 = vmax.f32 %v4770_v1, 0.0  ;;  %v4773_v34 = vadd.f32 %v5525_v47, %v4764_v2  ;;  %v4763_v6 = vadd.f32 %v4752_v16, %v4651_v17  ;;  %v4800_v10 = vrot.slane %v9072_v3, 1 }
 0xd58   : > { %v4785_v20 = vrot.slane %v9072_v3, 7 }
 0xd59   : > { %v4784_v12 = vrot.slane %v9074_v4, 7  ;;  %v4799_v5 = vrot.slane %v9074_v4, 1  ;;  %v9079_v11 = vmax.f32 %v4773_v34, 0.0  ;;  %7007 = vmatprep.mubr.f32.mxu1 %v9074_v4  ;;  %v4772_v15 = vadd.f32 %v5525_v47, %v4763_v6  ;;  %v5021_v47 = vld [vmem:[#allocation9 + $0x580] sm:$0xff] }
 0xd5a   : > { %7008 = vmatmul.mubr.f32.vlgmr.msra.gmra.mxu1 %v9072_v3  ;;  %v5526_v34 = vld [vmem:[#allocation11 + $0x3] ss:$0 sm:$0xff] }
 0xd5b   : > { %v4779_v19 = vrot.slane %v9079_v11, 7  ;;  %7052 = vmatpush3.msra.mxu1 %v5036_v41  ;;  %v4801_v9 = vsel %vm831_vm2, %v4799_v5, %v4800_v10  ;;  %v9090_v28 = vmax.f32 %v4772_v15, 0.0  ;;  %v4786_v31 = vsel %vm811_vm1, %v4784_v12, %v4785_v20 }
 0xd5c   : > { %7053 = vmatprep.subr.mxu1 %v5035_v50  ;;  %v4812_v30 = vmul.f32 %v4801_v9, %v8861_v7  ;;  %v4796_v40 = vmul.f32 %v4786_v31, %v8850_v8  ;;  %v5032_v7 = vld [vmem:[#allocation9 + $0x5d8] sm:$0xff]  ;;  %v5029_v8 = vld [vmem:[#allocation9 + $0x5c0] sm:$0xff]  ;;  %v4804_v24 = vrot.slane %v9079_v11, 1 }
 0xd5d   : > { %7054 = vmatpush3.msra.mxu1 %v5035_v50  ;;  %v4794_v26 = vsel %vm811_vm1, %v4779_v19, %v4784_v12  ;;  %v4787_v36 = vrot.slane %v9090_v28, 7  ;;  %7010 = vmatprep.mubr.f32.mxu1 %v9090_v28  ;;  %v4802_v55 = vrot.slane %v9090_v28, 1 }
 0xd5e   : > { %7055 = vmatprep.subr.mxu1 %v5034_v53  ;;  %v4795_v39 = vmul.f32 %v4794_v26, %v8839_v27  ;;  %7011 = vmatmul.mubr.f32.gmra.mxu1 %v9079_v11  ;;  %v4811_v18 = vsel %vm831_vm2, %v4804_v24, %v4799_v5 }
 0xd5f   : > { %7056 = vmatpush3.msra.mxu1 %v5034_v53  ;;  %7083 = vmatprep.mubr.f32.mxu1 %v4812_v30  ;;  %v4788_v41 = vsel %vm811_vm1, %v4785_v20, %v4787_v36  ;;  %v4789_v0 = vsel %vm811_vm1, %v4787_v36, %v4779_v19  ;;  %v4803_v44 = vsel %vm831_vm2, %v4800_v10, %v4802_v55 }
 0xd60   : > { %7057 = vmatprep.subr.mxu1 %v5033_v38  ;;  %7045 = vmatprep.mubr.f32.mxu0 %v4795_v39  ;;  %v4797_v42 = vmul.f32 %v4788_v41, %v8873_v22  ;;  %v4798_v27 = vmul.f32 %v4789_v0, %v8880_v32  ;;  %v5027_v22 = vld [vmem:[#allocation9 + $0x5b0] sm:$0xff]  ;;  %v5024_v32 = vld [vmem:[#allocation9 + $0x598] sm:$0xff]  ;;  %v4805_v14 = vsel %vm831_vm2, %v4802_v55, %v4804_v24 }
 0xd61   : > { %7058 = vmatpush3.msra.mxu1 %v5033_v38  ;;  %7046 = vmatmul.mubr.f32.vlgmr.msra.gmra.mxu0 %v4796_v40  ;;  %v4813_v48 = vmul.f32 %v4803_v44, %v8867_v59  ;;  %v4814_v49 = vmul.f32 %v4805_v14, %v8888_v29  ;;  %v4815_v58 = vmul.f32 %v4811_v18, %v8892_v35 }
 0xd62   : > { %7059 = vmatprep.subr.mxu1 %v5032_v7  ;;  %7048 = vmatprep.mubr.f32.mxu0 %v4797_v42 }
 0xd63   : > { %7060 = vmatpush3.msra.mxu1 %v5032_v7 }
 0xd64   : > { %7061 = vmatprep.subr.mxu1 %v5031_v37 }
 0xd65   : > { %7062 = vmatpush3.msra.mxu1 %v5031_v37  ;;  %7049 = vmatmul.mubr.f32.gmra.mxu0 %v4798_v27 }
 0xd66   : > { %7063 = vmatprep.subr.mxu1 %v5030_v45 }
 0xd67   : > { %7064 = vmatpush3.msra.mxu1 %v5030_v45 }
 0xd68   : > { %7065 = vmatprep.subr.mxu1 %v5029_v8 }
 0xd69   : > { %7066 = vmatpush3.msra.mxu1 %v5029_v8 }
 0xd6a   : > { %7067 = vmatprep.subr.mxu1 %v5028_v23 }
 0xd6b   : > { %7068 = vmatpush3.msra.mxu1 %v5028_v23 }
 0xd6c   : > { %7069 = vmatprep.subr.mxu1 %v5027_v22 }
 0xd6d   : > { %7070 = vmatpush3.msra.mxu1 %v5027_v22 }
 0xd6e   : > { %7071 = vmatprep.subr.mxu1 %v5026_v46 }
 0xd6f   : > { %7072 = vmatpush3.msra.mxu1 %v5026_v46 }
 0xd70   : > { %7073 = vmatprep.subr.mxu1 %v5025_v54 }
 0xd71   : > { %7074 = vmatpush3.msra.mxu1 %v5025_v54 }
 0xd72   : > { %7075 = vmatprep.subr.mxu1 %v5024_v32 }
 0xd73   : > { %7076 = vmatpush3.msra.mxu1 %v5024_v32 }
 0xd74   : > { %7077 = vmatprep.subr.mxu1 %v5023_v56 }
 0xd75   : > { %7078 = vmatpush3.msra.mxu1 %v5023_v56 }
 0xd76   : > { %7079 = vmatprep.subr.mxu1 %v5022_v57 }
 0xd77   : > { %7080 = vmatpush3.msra.mxu1 %v5022_v57 }
 0xd78   : > { %7081 = vmatprep.subr.mxu1 %v5021_v47 }
 0xd79   : > { %7082 = vmatpush3.msra.mxu1 %v5021_v47 }
 0xd7a   : > { %7084 = vmatmul.mubr.f32.vlgmr.msra.gmra.mxu1 %v4813_v48 }
 0xd7b   : > { %7086 = vmatprep.mubr.f32.mxu1 %v4814_v49 }
 0xd7e   : > { %7087 = vmatmul.mubr.f32.gmra.mxu1 %v4815_v58 }
 0xe1a   : > { %v7009_v21 = vpop.f32.mrf.mxu1 }
 0xe1c   : > { %v4916_v51 = vpop.f32.mrf.mxu1 }
 0xe1e   : > { %v7012_v3 = vpop.f32.mrf.mxu1 }
 0xe20   : > { %v4926_v2 = vpop.f32.mrf.mxu1 }
 0xe21   : > { %v7047_v13 = vpop.f32.mrf.mxu0 }
 0xe22   : > { %v5007_v59 = vadd.f32 %v7047_v13, %v7009_v21 }
 0xe23   : > { %v5001_v1 = vpop.f32.mrf.mxu0 }
 0xe24   : > { %v5002_v29 = vadd.f32 %v5001_v1, %v4916_v51 }
 0xe25   : > { %v7050_v17 = vpop.f32.mrf.mxu0 }
 0xe26   : > { %v5017_v12 = vadd.f32 %v7050_v17, %v7012_v3 }
 0xe27   : > { %v5011_v4 = vpop.f32.mrf.mxu0 }
 0xe28   : > { %v5012_v35 = vadd.f32 %v5011_v4, %v4926_v2 }
 0xe3a   : > { %v7085_v16 = vpop.f32.mrf.mxu1 }
 0xe3b   : > { %v5123_v6 = vadd.f32 %v7085_v16, %v5007_v59 }
 0xe3c   : > { %v5103_v10 = vpop.f32.mrf.mxu1 }
 0xe3d   : > { %v5132_v5 = vadd.f32 %v5526_v34, %v5123_v6  ;;  %v5122_v11 = vadd.f32 %v5103_v10, %v5002_v29 }
 0xe3e   : > { %v7088_v50 = vpop.f32.mrf.mxu1 }
 0xe3f   : > { %v5528_v15 = vmul.f32 -1.442695, %v5132_v5  ;;  %v5131_v20 = vadd.f32 %v5526_v34, %v5122_v11  ;;  %v5125_v19 = vadd.f32 %v7088_v50, %v5017_v12 }
 0xe40   : > { %v5113_v53 = vpop.f32.mrf.mxu1 }
 0xe41   : > { %7195 = vpow2.f32 %v5528_v15  ;;  %v5527_v9 = vmul.f32 -1.442695, %v5131_v20  ;;  %v5134_v28 = vadd.f32 %v5526_v34, %v5125_v19  ;;  %v5124_v30 = vadd.f32 %v5113_v53, %v5012_v35 }
 0xe43   : > { %7197 = vpow2.f32 %v5527_v9  ;;  %v5530_v31 = vmul.f32 -1.442695, %v5134_v28  ;;  %v5133_v26 = vadd.f32 %v5526_v34, %v5124_v30 }
 0xe45   : > { %7199 = vpow2.f32 %v5530_v31  ;;  %v5529_v36 = vmul.f32 -1.442695, %v5133_v26 }
 0xe47   : > { %7201 = vpow2.f32 %v5529_v36 }
 0xe4e   : > { %v7196_v38 = vpop.eup %7195 }
 0xe4f   : > { %v5148_v39 = vadd.f32 1.0, %v7196_v38 }
 0xe50   : > { %v7198_v40 = vpop.eup %7197 }
 0xe51   : > { %7203 = vrcp.f32 %v5148_v39  ;;  %v5147_v7 = vadd.f32 1.0, %v7198_v40 }
 0xe52   : > { %v7200_v41 = vpop.eup %7199 }
 0xe53   : > { %7205 = vrcp.f32 %v5147_v7  ;;  %v5150_v42 = vadd.f32 1.0, %v7200_v41 }
 0xe54   : > { %v7202_v0 = vpop.eup %7201 }
 0xe55   : > { %7207 = vrcp.f32 %v5150_v42  ;;  %v5149_v37 = vadd.f32 1.0, %v7202_v0 }
 0xe57   : > { %7209 = vrcp.f32 %v5149_v37 }
 0xe5e   : > { %v7204_v27 = vpop.eup %7203 }
 0xe5f   : > { %v5160_v45 = vadd.f32 1.0, %v7204_v27 }
 0xe60   : > { %v7206_v8 = vpop.eup %7205 }
 0xe61   : > { %v5164_v23 = vmul.f32 %v5160_v45, %v4207_v43  ;;  %v5159_v22 = vadd.f32 1.0, %v7206_v8 }
 0xe62   : > { %v7208_v46 = vpop.eup %7207 }
 0xe63   : > { %5168 = vst [vmem:[%s606_s7 + $0x8] sm:$0xff] %v5164_v23  ;;  %v5163_v54 = vmul.f32 %v5159_v22, %v4206_v62  ;;  %v5162_v32 = vadd.f32 1.0, %v7208_v46 }
 0xe64   : > { %v7210_v55 = vpop.eup %7209 }
 0xe65   : > { %5167 = vst [vmem:[%s606_s7] sm:$0xff] %v5163_v54  ;;  %v5166_v56 = vmul.f32 %v5162_v32, %v4209_v63  ;;  %v5161_v61 = vadd.f32 1.0, %v7210_v55 }
 0xe67   : > { %5170 = vst [vmem:[%s606_s7 + $0x18] sm:$0xff] %v5166_v56  ;;  %v5165_v33 = vmul.f32 %v5161_v61, %v4208_v25 }
 0xe69   : > { %5169 = vst [vmem:[%s606_s7 + $0x10] sm:$0xff] %v5165_v33 }
 0xe6a   : > { %7382 = shalt.err (!%p7379_p5)
}
 0xe6b   : > { %s7383_s8 = scalar_lea.hbm %s9128_s0, 512  ;;  %s7387_s26 = scalar_lea.hbm %s9253_s25, 1024 }
 0xe6c   : > { %p7384_p6 = scmp.ne.s32.totalorder %s9128_s0, %s7383_s8  ;;  %p7388_p4 = scmp.lt.s32.totalorder %s9128_s0, %s9253_s25 }
 0xe6d   : > { %p7389_p7 = scmp.lt.s32.totalorder %s7387_s26, %s7383_s8 }
 0xe6e   : > { %p7385_p11 = pnand %p7384_p6, %p9254_p2 }
 0xe6f   : > { %p7390_p13 = por %p7389_p7, %p7388_p4 }
 0xe70   : > { %p7386_p10 = pneg %p7385_p11 }
 0xe72   : > { %p7391_p0 = pnand %p7390_p13, %p7386_p10 }
 0xe74   : > { %7394 = shalt.err (!%p7391_p0)
}
 0xe75   : > { %s7459_s29 = smov 128   ;;  %s7460_s23 = smov 8  }
 0xe76   : > { %7111 = dma.vmem_to_hbm [thread:$0]  (%p9254_p2), %s9130_s13, 512, %s9128_s0, %s5172_s27, %s7459_s29, %s7459_s29, %s7460_s23  }
 0xe77 PF: > { %s9255_s28 = sld [smem:[#allocation20_spill]] }
 0xe78   : > { %s9256_s21 = sld [smem:[#allocation25_spill]] }
 0xe79   : > { %s9257_s17 = sld [smem:[#allocation22_spill]] }
 0xe7d   : > { %s5200_s19 = sand.u32 1, %s9255_s28  }
 0xe7e   : > { %p9258_p8 = scmp.ne.s32.totalorder %s9256_s21, 0  ;;  %s5201_s18 = scalar_lea.sflag [#allocation5], %s5200_s19 }
 0xe7f   : > { %p9259_p9 = scmp.ge.s32.totalorder %s9257_s17, 2 }
 0xe81   : > { %p7134_p12 = pnand %p9259_p9, %p9258_p8 }
 0xe83   : > { %p7135_p3 = pneg %p7134_p12 }
 0xe85   : > { %7428 = dma.done.wait (%p7135_p3), %s5201_s18, 512  }
 0xe86   : > { %7430 = vsyncadd (%p7135_p3), %s5201_s18, 4294966784  ;;  %s9260_s24 = sld [smem:[#allocation23_spill]]  ;;  %s9263_s21 = smov %s7437_s22 }
 0xe87   : > { %s9261_s8 = sld [smem:[#allocation21_spill]] }
 0xe88   : > { %s9262_s23 = sld [smem:[#allocation24_spill]] }
 0xe8c   : > { %p32_p1 = scmp.ge.s32.totalorder %s9260_s24, 4  }
 0xe8d   : > { %s9264_s22 = smov %s9261_s8 }
 0xe8e   :  { %34 = sbr.rel (!%p32_p1) target bundleno = 16 (0x10), region = 179 }
 0xe93   :  { %5206 = vsyncpa [#allocation4], 1 }
 0xe94   :  { %5208 = vsyncpa [#allocation4 + $0x1], 1 }
 0xe95   :  { %5209 = vsyncpa [#allocation7], 1 }
 0xe96   :  { %5210 = vsyncpa [#allocation10], 1 }
 0xe97   :  { %5211 = vsyncpa [#allocation13], 1 }
 0xe98   :  { %5212 = vsyncpa [#allocation5], 1 }
 0xe99   :  { %5214 = vsyncpa [#allocation5 + $0x1], 1 }

</bundles_post_ra>
